<compile_context>
chip_gen: v5e
topology: v5e:2x2
jax: 0.10.0
libtpu: 0.0.40
codegen_flags: <defaults>
</compile_context>

<pallas_src>
import jax
import jax.numpy as jnp
from jax.experimental import pallas as pl
from jax.experimental.pallas import tpu as pltpu


IN_FEATURES = 64 * 64 * 3   # 12288
HIDDEN = 128                # first / last hidden width

_LAYER_DIMS = (
    (IN_FEATURES, 128), (128, 64), (64, 12), (12, 3),    # encoder
    (3, 12), (12, 64), (64, 128), (128, IN_FEATURES),    # decoder
)
_LAYER_ACTS = ("relu", "relu", "relu", None,
               "relu", "relu", "relu", "tanh")

TILE = 4096                 # layer-1 K chunk / layer-8 N chunk (lane-dense)
NT = IN_FEATURES // TILE    # 3


def _apply_act(y, act):
    if act == "relu":
        return jnp.maximum(y, 0.0)
    if act == "tanh":
        return jnp.tanh(y)
    return y


# --------------------------------------------------------------------------
# Fused kernel: grid = (2 phases, NT tiles), everything else VMEM-resident.
# --------------------------------------------------------------------------
def _fcn_ae_kernel(x_ref, w1_ref, b1_ref,
                   w2_ref, b2_ref, w3_ref, b3_ref, w4_ref, b4_ref,
                   w5_ref, b5_ref, w6_ref, b6_ref, w7_ref, b7_ref,
                   w8_ref, b8_ref,
                   o_ref,
                   acc_ref, h_ref):
    p = pl.program_id(0)       # 0: encoder layer-1 K-stream, 1: decoder N-stream
    j = pl.program_id(1)       # chunk index within the phase
    nt = pl.num_programs(1)

    @pl.when(p == 0)
    def _encoder_phase():
        @pl.when(j == 0)
        def _():
            acc_ref[...] = jnp.zeros_like(acc_ref)

        # In-kernel f32 -> bf16 cast of the input chunk (hidden under the DMA).
        xb = x_ref[...].astype(jnp.bfloat16)                  # [B, TILE]
        acc_ref[...] += jnp.dot(xb, w1_ref[...],              # [TILE, 128] bf16
                                preferred_element_type=jnp.float32)

        @pl.when(j == nt - 1)
        def _():
            # Finish layer 1 (bias + ReLU) then run the tiny layers 2..7.
            h = jnp.maximum(acc_ref[...] + b1_ref[...], 0.0)  # [B,128] f32
            mids = ((w2_ref, b2_ref, "relu"), (w3_ref, b3_ref, "relu"),
                    (w4_ref, b4_ref, None),   (w5_ref, b5_ref, "relu"),
                    (w6_ref, b6_ref, "relu"), (w7_ref, b7_ref, "relu"))
            for w_ref, b_ref, act in mids:
                y = jnp.dot(h.astype(jnp.bfloat16), w_ref[...],
                            preferred_element_type=jnp.float32) + b_ref[...]
                h = _apply_act(y, act)
            h_ref[...] = h.astype(jnp.bfloat16)               # layer-7 act [B,128]

    @pl.when(p == 1)
    def _decoder_phase():
        # Layer 8, one N chunk per grid step: output written per tile so the
        # writeback + tanh overlap with the next w8 chunk's DMA.
        y = jnp.dot(h_ref[...], w8_ref[...],                  # [B,128]x[128,TILE]
                    preferred_element_type=jnp.float32) + b8_ref[...]
        o_ref[...] = jnp.tanh(y).astype(o_ref.dtype)


@jax.jit
def fcn_autoencoder_forward(x, params):
    """x: [B, 12288] f32, params from prepare_params() -> [B, 12288] f32.

    NOTE: at B=8 the resident set is ~5 MiB; for B in the hundreds add an M
    (batch) grid axis before scaling (v7x VMEM is smaller than v5e/v6e).
    """
    batch = x.shape[0]
    assert x.shape[1] == IN_FEATURES

    args = (x,
            params["w1"], params["b1"],
            params["w2"], params["b2"], params["w3"], params["b3"],
            params["w4"], params["b4"], params["w5"], params["b5"],
            params["w6"], params["b6"], params["w7"], params["b7"],
            params["w8"], params["b8"])

    # Phase 0 streams chunk j; phase 1 keeps the last chunk resident (no re-DMA).
    def _k_stream_rows(p, j):      # w1: [TILE,128] chunks along K (rows)
        return (j * (1 - p) + (NT - 1) * p, 0)

    def _k_stream_cols(p, j):      # x: [B,TILE] chunks along K (cols)
        return (0, j * (1 - p) + (NT - 1) * p)

    def _n_stream(p, j):           # w8 / b8 / out: chunk 0 in phase 0, j in phase 1
        return (0, j * p)

    def _const(shape):             # small, fully resident operands
        return pl.BlockSpec(shape, lambda p, j: (0, 0))

    in_specs = [
        pl.BlockSpec((batch, TILE), _k_stream_cols),   # x (f32, cast in kernel)
        pl.BlockSpec((TILE, HIDDEN), _k_stream_rows),  # w1 (bf16)
        _const((1, 128)),                              # b1
        _const((128, 64)), _const((1, 64)),            # w2, b2
        _const((64, 12)),  _const((1, 12)),            # w3, b3
        _const((12, 3)),   _const((1, 3)),             # w4, b4
        _const((3, 12)),   _const((1, 12)),            # w5, b5
        _const((12, 64)),  _const((1, 64)),            # w6, b6
        _const((64, 128)), _const((1, 128)),           # w7, b7
        pl.BlockSpec((HIDDEN, TILE), _n_stream),       # w8 (bf16)
        pl.BlockSpec((1, TILE), _n_stream),            # b8
    ]
    out_spec = pl.BlockSpec((batch, TILE), _n_stream)

    return pl.pallas_call(
        _fcn_ae_kernel,
        out_shape=jax.ShapeDtypeStruct((batch, IN_FEATURES), jnp.float32),
        grid_spec=pltpu.PrefetchScalarGridSpec(
            num_scalar_prefetch=0,
            grid=(2, NT),
            in_specs=in_specs,
            out_specs=out_spec,
            scratch_shapes=[
                pltpu.VMEM((batch, HIDDEN), jnp.float32),    # layer-1 accumulator
                pltpu.VMEM((batch, HIDDEN), jnp.bfloat16),   # layer-7 activation
            ]),
        compiler_params=pltpu.CompilerParams(
            dimension_semantics=("arbitrary", "arbitrary"),
            vmem_limit_bytes=32 * 1024 * 1024),
    )(*args)


# --------------------------------------------------------------------------
# Parameters
# --------------------------------------------------------------------------
def init_params(key):
    """PyTorch nn.Linear default init, f32, weights stored as [in, out]."""
    params = {}
    keys = jax.random.split(key, len(_LAYER_DIMS))
    for li, (fan_in, fan_out) in enumerate(_LAYER_DIMS):
        kw, kb = jax.random.split(keys[li])
        bound = 1.0 / (fan_in ** 0.5)
        params[f"w{li + 1}"] = jax.random.uniform(
            kw, (fan_in, fan_out), jnp.float32, -bound, bound)
        params[f"b{li + 1}"] = jax.random.uniform(
            kb, (fan_out,), jnp.float32, -bound, bound)
    return params


def prepare_params(params):
    """One-time conversion to the kernel's layout: bf16 weights (MXU operand
    dtype), f32 [1, out] biases.  Call ONCE at load time and reuse the result
    for every forward call; the jitted forward performs no per-call casts."""
    prepared = {}
    for li in range(1, len(_LAYER_DIMS) + 1):
        prepared[f"w{li}"] = params[f"w{li}"].astype(jnp.bfloat16)
        prepared[f"b{li}"] = params[f"b{li}"].reshape(1, -1).astype(jnp.float32)
    return prepared


# --------------------------------------------------------------------------
# Pure-JAX references (correctness checks only)
# --------------------------------------------------------------------------
def _ref_forward_f32(x, params):
    h = x
    for li in range(len(_LAYER_DIMS)):
        h = h @ params[f"w{li + 1}"] + params[f"b{li + 1}"]
        h = _apply_act(h, _LAYER_ACTS[li])
    return h


def _ref_forward_bf16(x, params):
    """Matches kernel numerics: bf16 operands, f32 accumulation, and layer-1
    K-accumulation chunked identically to the kernel."""
    xb = x.astype(jnp.bfloat16)
    w1 = params["w1"].astype(jnp.bfloat16)
    acc = jnp.zeros((x.shape[0], HIDDEN), jnp.float32)
    for j in range(NT):
        acc = acc + jnp.dot(xb[:, j * TILE:(j + 1) * TILE],
                            w1[j * TILE:(j + 1) * TILE, :],
                            preferred_element_type=jnp.float32)
    h = jnp.maximum(acc + params["b1"], 0.0)
    for li in range(2, len(_LAYER_DIMS) + 1):
        y = jnp.dot(h.astype(jnp.bfloat16),
                    params[f"w{li}"].astype(jnp.bfloat16),
                    preferred_element_type=jnp.float32) + params[f"b{li}"]
        h = _apply_act(y, _LAYER_ACTS[li - 1])
    return h


if __name__ == "__main__":
    key = jax.random.PRNGKey(0)
    k_x, k_p = jax.random.split(key)

    batch = 8  # input feature dim is fixed at 64*64*3 = 12288 by the module
    x = jax.random.normal(k_x, (batch, IN_FEATURES), jnp.float32)
    params = init_params(k_p)
    kernel_params = prepare_params(params)   # one-time bf16 layout

    y = jax.block_until_ready(fcn_autoencoder_forward(x, kernel_params))
    assert y.shape == (batch, IN_FEATURES), y.shape
    assert y.dtype == jnp.float32, y.dtype

    # Strict check against a reference with identical bf16/f32 numerics.
    y_bf16_ref = jax.block_until_ready(_ref_forward_bf16(x, params))
    err_exact = float(jnp.max(jnp.abs(y - y_bf16_ref)))
    assert err_exact < 5e-3, f"mismatch vs bf16 reference: {err_exact}"

    # Loose sanity check against the full-f32 model (bf16 quantization noise).
    y_f32_ref = jax.block_until_ready(_ref_forward_f32(x, params))
    err_model = float(jnp.max(jnp.abs(y - y_f32_ref)))
    assert err_model < 1e-1, f"mismatch vs f32 reference: {err_model}"

    print("KERNEL_OK")
</pallas_src>

<mosaic_0001>
module attributes {stable_mosaic.version = 11 : i64} {
  func.func @_fcn_ae_kernel(%arg0: i32, %arg1: i32, %arg2: memref<8x4096xf32, #tpu.memory_space<vmem>>, %arg3: memref<4096x128xbf16, #tpu.memory_space<vmem>>, %arg4: memref<1x128xf32, #tpu.memory_space<vmem>>, %arg5: memref<128x64xbf16, #tpu.memory_space<vmem>>, %arg6: memref<1x64xf32, #tpu.memory_space<vmem>>, %arg7: memref<64x12xbf16, #tpu.memory_space<vmem>>, %arg8: memref<1x12xf32, #tpu.memory_space<vmem>>, %arg9: memref<12x3xbf16, #tpu.memory_space<vmem>>, %arg10: memref<1x3xf32, #tpu.memory_space<vmem>>, %arg11: memref<3x12xbf16, #tpu.memory_space<vmem>>, %arg12: memref<1x12xf32, #tpu.memory_space<vmem>>, %arg13: memref<12x64xbf16, #tpu.memory_space<vmem>>, %arg14: memref<1x64xf32, #tpu.memory_space<vmem>>, %arg15: memref<64x128xbf16, #tpu.memory_space<vmem>>, %arg16: memref<1x128xf32, #tpu.memory_space<vmem>>, %arg17: memref<128x4096xbf16, #tpu.memory_space<vmem>>, %arg18: memref<1x4096xf32, #tpu.memory_space<vmem>>, %arg19: memref<8x4096xf32, #tpu.memory_space<vmem>>, %arg20: memref<8x128xf32, #tpu.memory_space<vmem>>, %arg21: memref<8x128xbf16, #tpu.memory_space<vmem>>) attributes {dimension_semantics = [#tpu.dimension_semantics<arbitrary>, #tpu.dimension_semantics<arbitrary>], iteration_bounds = array<i64: 2, 3>, scalar_prefetch = 0 : i64, scratch_operands = 2 : i64, tpu.core_type = #tpu.core_type<tc>, window_params = [{transform_indices = @transform_0, window_bounds = array<i64: 8, 4096>}, {transform_indices = @transform_1, window_bounds = array<i64: 4096, 128>}, {pipeline_mode = #tpu.pipeline_mode<synchronous>, transform_indices = @transform_2, window_bounds = array<i64: 1, 128>}, {pipeline_mode = #tpu.pipeline_mode<synchronous>, transform_indices = @transform_3, window_bounds = array<i64: 128, 64>}, {pipeline_mode = #tpu.pipeline_mode<synchronous>, transform_indices = @transform_4, window_bounds = array<i64: 1, 64>}, {pipeline_mode = #tpu.pipeline_mode<synchronous>, transform_indices = @transform_5, window_bounds = array<i64: 64, 12>}, {pipeline_mode = #tpu.pipeline_mode<synchronous>, transform_indices = @transform_6, window_bounds = array<i64: 1, 12>}, {pipeline_mode = #tpu.pipeline_mode<synchronous>, transform_indices = @transform_7, window_bounds = array<i64: 12, 3>}, {pipeline_mode = #tpu.pipeline_mode<synchronous>, transform_indices = @transform_8, window_bounds = array<i64: 1, 3>}, {pipeline_mode = #tpu.pipeline_mode<synchronous>, transform_indices = @transform_9, window_bounds = array<i64: 3, 12>}, {pipeline_mode = #tpu.pipeline_mode<synchronous>, transform_indices = @transform_10, window_bounds = array<i64: 1, 12>}, {pipeline_mode = #tpu.pipeline_mode<synchronous>, transform_indices = @transform_11, window_bounds = array<i64: 12, 64>}, {pipeline_mode = #tpu.pipeline_mode<synchronous>, transform_indices = @transform_12, window_bounds = array<i64: 1, 64>}, {pipeline_mode = #tpu.pipeline_mode<synchronous>, transform_indices = @transform_13, window_bounds = array<i64: 64, 128>}, {pipeline_mode = #tpu.pipeline_mode<synchronous>, transform_indices = @transform_14, window_bounds = array<i64: 1, 128>}, {transform_indices = @transform_15, window_bounds = array<i64: 128, 4096>}, {transform_indices = @transform_16, window_bounds = array<i64: 1, 4096>}, {transform_indices = @transform_17, window_bounds = array<i64: 8, 4096>}]} {
    %c0_i32 = arith.constant 0 : i32
    %0 = arith.cmpi eq, %arg0, %c0_i32 : i32
    %1 = arith.extui %0 : i1 to i32
    %c0_i32_0 = arith.constant 0 : i32
    %2 = arith.cmpi ne, %1, %c0_i32_0 : i32
    scf.if %2 {
      %c0_i32_2 = arith.constant 0 : i32
      %6 = arith.cmpi eq, %arg1, %c0_i32_2 : i32
      %7 = arith.extui %6 : i1 to i32
      %c0_i32_3 = arith.constant 0 : i32
      %8 = arith.cmpi ne, %7, %c0_i32_3 : i32
      scf.if %8 {
        %cst_12 = arith.constant 0.000000e+00 : f32
        %19 = vector.broadcast %cst_12 : f32 to vector<8x128xf32>
        %c0_13 = arith.constant 0 : index
        %c0_14 = arith.constant 0 : index
        %20 = vector.load %arg20[%c0_13, %c0_14] : memref<8x128xf32, #tpu.memory_space<vmem>>, vector<8x128xf32>
        tpu.vector_store %arg20[%c0_13, %c0_14], %19 {strides = array<i32>} : memref<8x128xf32, #tpu.memory_space<vmem>>, vector<8x128xf32>,
      } else {
      }
      %c0 = arith.constant 0 : index
      %c0_4 = arith.constant 0 : index
      %9 = vector.load %arg2[%c0, %c0_4] : memref<8x4096xf32, #tpu.memory_space<vmem>>, vector<8x4096xf32>
      %10 = arith.truncf %9 : vector<8x4096xf32> to vector<8x4096xbf16>
      %c0_5 = arith.constant 0 : index
      %c0_6 = arith.constant 0 : index
      %11 = vector.load %arg20[%c0_5, %c0_6] : memref<8x128xf32, #tpu.memory_space<vmem>>, vector<8x128xf32>
      %c0_7 = arith.constant 0 : index
      %c0_8 = arith.constant 0 : index
      %12 = vector.load %arg3[%c0_7, %c0_8] : memref<4096x128xbf16, #tpu.memory_space<vmem>>, vector<4096x128xbf16>
      %cst = arith.constant dense<0.000000e+00> : vector<8x128xf32>
      %13 = tpu.matmul %10, %12, %cst {dimension_numbers = #tpu.dot_dimension_numbers<[1], [0], [0], [1], [0, 0, 1, 1], [], []>} : vector<8x4096xbf16>, vector<4096x128xbf16>, vector<8x128xf32> -> vector<8x128xf32>
      %14 = arith.addf %11, %13 : vector<8x128xf32>
      %c0_9 = arith.constant 0 : index
      %c0_10 = arith.constant 0 : index
      %15 = vector.load %arg20[%c0_9, %c0_10] : memref<8x128xf32, #tpu.memory_space<vmem>>, vector<8x128xf32>
      tpu.vector_store %arg20[%c0_9, %c0_10], %14 {strides = array<i32>} : memref<8x128xf32, #tpu.memory_space<vmem>>, vector<8x128xf32>,
      %c2_i32 = arith.constant 2 : i32
      %16 = arith.cmpi eq, %arg1, %c2_i32 : i32
      %17 = arith.extui %16 : i1 to i32
      %c0_i32_11 = arith.constant 0 : i32
      %18 = arith.cmpi ne, %17, %c0_i32_11 : i32
      scf.if %18 {
        %c0_12 = arith.constant 0 : index
        %c0_13 = arith.constant 0 : index
        %19 = vector.load %arg20[%c0_12, %c0_13] : memref<8x128xf32, #tpu.memory_space<vmem>>, vector<8x128xf32>
        %c0_14 = arith.constant 0 : index
        %c0_15 = arith.constant 0 : index
        %20 = vector.load %arg4[%c0_14, %c0_15] : memref<1x128xf32, #tpu.memory_space<vmem>>, vector<1x128xf32>
        %21 = vector.broadcast %20 : vector<1x128xf32> to vector<8x128xf32>
        %22 = arith.addf %19, %21 : vector<8x128xf32>
        %cst_16 = arith.constant 0.000000e+00 : f32
        %23 = vector.broadcast %cst_16 : f32 to vector<8x128xf32>
        %24 = arith.maximumf %22, %23 : vector<8x128xf32>
        %25 = arith.truncf %24 : vector<8x128xf32> to vector<8x128xbf16>
        %c0_17 = arith.constant 0 : index
        %c0_18 = arith.constant 0 : index
        %26 = vector.load %arg5[%c0_17, %c0_18] : memref<128x64xbf16, #tpu.memory_space<vmem>>, vector<128x64xbf16>
        %cst_19 = arith.constant dense<0.000000e+00> : vector<8x64xf32>
        %27 = tpu.matmul %25, %26, %cst_19 {dimension_numbers = #tpu.dot_dimension_numbers<[1], [0], [0], [1], [0, 0, 1, 1], [], []>} : vector<8x128xbf16>, vector<128x64xbf16>, vector<8x64xf32> -> vector<8x64xf32>
        %c0_20 = arith.constant 0 : index
        %c0_21 = arith.constant 0 : index
        %28 = vector.load %arg6[%c0_20, %c0_21] : memref<1x64xf32, #tpu.memory_space<vmem>>, vector<1x64xf32>
        %29 = vector.broadcast %28 : vector<1x64xf32> to vector<8x64xf32>
        %30 = arith.addf %27, %29 : vector<8x64xf32>
        %cst_22 = arith.constant 0.000000e+00 : f32
        %31 = vector.broadcast %cst_22 : f32 to vector<8x64xf32>
        %32 = arith.maximumf %30, %31 : vector<8x64xf32>
        %33 = arith.truncf %32 : vector<8x64xf32> to vector<8x64xbf16>
        %c0_23 = arith.constant 0 : index
        %c0_24 = arith.constant 0 : index
        %34 = vector.load %arg7[%c0_23, %c0_24] : memref<64x12xbf16, #tpu.memory_space<vmem>>, vector<64x12xbf16>
        %cst_25 = arith.constant dense<0.000000e+00> : vector<8x12xf32>
        %35 = tpu.matmul %33, %34, %cst_25 {dimension_numbers = #tpu.dot_dimension_numbers<[1], [0], [0], [1], [0, 0, 1, 1], [], []>} : vector<8x64xbf16>, vector<64x12xbf16>, vector<8x12xf32> -> vector<8x12xf32>
        %c0_26 = arith.constant 0 : index
        %c0_27 = arith.constant 0 : index
        %36 = vector.load %arg8[%c0_26, %c0_27] : memref<1x12xf32, #tpu.memory_space<vmem>>, vector<1x12xf32>
        %37 = vector.broadcast %36 : vector<1x12xf32> to vector<8x12xf32>
        %38 = arith.addf %35, %37 : vector<8x12xf32>
        %cst_28 = arith.constant 0.000000e+00 : f32
        %39 = vector.broadcast %cst_28 : f32 to vector<8x12xf32>
        %40 = arith.maximumf %38, %39 : vector<8x12xf32>
        %41 = arith.truncf %40 : vector<8x12xf32> to vector<8x12xbf16>
        %c0_29 = arith.constant 0 : index
        %c0_30 = arith.constant 0 : index
        %42 = vector.load %arg9[%c0_29, %c0_30] : memref<12x3xbf16, #tpu.memory_space<vmem>>, vector<12x3xbf16>
        %cst_31 = arith.constant dense<0.000000e+00> : vector<8x3xf32>
        %43 = tpu.matmul %41, %42, %cst_31 {dimension_numbers = #tpu.dot_dimension_numbers<[1], [0], [0], [1], [0, 0, 1, 1], [], []>} : vector<8x12xbf16>, vector<12x3xbf16>, vector<8x3xf32> -> vector<8x3xf32>
        %c0_32 = arith.constant 0 : index
        %c0_33 = arith.constant 0 : index
        %44 = vector.load %arg10[%c0_32, %c0_33] : memref<1x3xf32, #tpu.memory_space<vmem>>, vector<1x3xf32>
        %45 = vector.broadcast %44 : vector<1x3xf32> to vector<8x3xf32>
        %46 = arith.addf %43, %45 : vector<8x3xf32>
        %47 = arith.truncf %46 : vector<8x3xf32> to vector<8x3xbf16>
        %c0_34 = arith.constant 0 : index
        %c0_35 = arith.constant 0 : index
        %48 = vector.load %arg11[%c0_34, %c0_35] : memref<3x12xbf16, #tpu.memory_space<vmem>>, vector<3x12xbf16>
        %cst_36 = arith.constant dense<0.000000e+00> : vector<8x12xf32>
        %49 = tpu.matmul %47, %48, %cst_36 {dimension_numbers = #tpu.dot_dimension_numbers<[1], [0], [0], [1], [0, 0, 1, 1], [], []>} : vector<8x3xbf16>, vector<3x12xbf16>, vector<8x12xf32> -> vector<8x12xf32>
        %c0_37 = arith.constant 0 : index
        %c0_38 = arith.constant 0 : index
        %50 = vector.load %arg12[%c0_37, %c0_38] : memref<1x12xf32, #tpu.memory_space<vmem>>, vector<1x12xf32>
        %51 = vector.broadcast %50 : vector<1x12xf32> to vector<8x12xf32>
        %52 = arith.addf %49, %51 : vector<8x12xf32>
        %cst_39 = arith.constant 0.000000e+00 : f32
        %53 = vector.broadcast %cst_39 : f32 to vector<8x12xf32>
        %54 = arith.maximumf %52, %53 : vector<8x12xf32>
        %55 = arith.truncf %54 : vector<8x12xf32> to vector<8x12xbf16>
        %c0_40 = arith.constant 0 : index
        %c0_41 = arith.constant 0 : index
        %56 = vector.load %arg13[%c0_40, %c0_41] : memref<12x64xbf16, #tpu.memory_space<vmem>>, vector<12x64xbf16>
        %cst_42 = arith.constant dense<0.000000e+00> : vector<8x64xf32>
        %57 = tpu.matmul %55, %56, %cst_42 {dimension_numbers = #tpu.dot_dimension_numbers<[1], [0], [0], [1], [0, 0, 1, 1], [], []>} : vector<8x12xbf16>, vector<12x64xbf16>, vector<8x64xf32> -> vector<8x64xf32>
        %c0_43 = arith.constant 0 : index
        %c0_44 = arith.constant 0 : index
        %58 = vector.load %arg14[%c0_43, %c0_44] : memref<1x64xf32, #tpu.memory_space<vmem>>, vector<1x64xf32>
        %59 = vector.broadcast %58 : vector<1x64xf32> to vector<8x64xf32>
        %60 = arith.addf %57, %59 : vector<8x64xf32>
        %cst_45 = arith.constant 0.000000e+00 : f32
        %61 = vector.broadcast %cst_45 : f32 to vector<8x64xf32>
        %62 = arith.maximumf %60, %61 : vector<8x64xf32>
        %63 = arith.truncf %62 : vector<8x64xf32> to vector<8x64xbf16>
        %c0_46 = arith.constant 0 : index
        %c0_47 = arith.constant 0 : index
        %64 = vector.load %arg15[%c0_46, %c0_47] : memref<64x128xbf16, #tpu.memory_space<vmem>>, vector<64x128xbf16>
        %cst_48 = arith.constant dense<0.000000e+00> : vector<8x128xf32>
        %65 = tpu.matmul %63, %64, %cst_48 {dimension_numbers = #tpu.dot_dimension_numbers<[1], [0], [0], [1], [0, 0, 1, 1], [], []>} : vector<8x64xbf16>, vector<64x128xbf16>, vector<8x128xf32> -> vector<8x128xf32>
        %c0_49 = arith.constant 0 : index
        %c0_50 = arith.constant 0 : index
        %66 = vector.load %arg16[%c0_49, %c0_50] : memref<1x128xf32, #tpu.memory_space<vmem>>, vector<1x128xf32>
        %67 = vector.broadcast %66 : vector<1x128xf32> to vector<8x128xf32>
        %68 = arith.addf %65, %67 : vector<8x128xf32>
        %cst_51 = arith.constant 0.000000e+00 : f32
        %69 = vector.broadcast %cst_51 : f32 to vector<8x128xf32>
        %70 = arith.maximumf %68, %69 : vector<8x128xf32>
        %71 = arith.truncf %70 : vector<8x128xf32> to vector<8x128xbf16>
        %c0_52 = arith.constant 0 : index
        %c0_53 = arith.constant 0 : index
        %72 = vector.load %arg21[%c0_52, %c0_53] : memref<8x128xbf16, #tpu.memory_space<vmem>>, vector<8x128xbf16>
        tpu.vector_store %arg21[%c0_52, %c0_53], %71 {strides = array<i32>} : memref<8x128xbf16, #tpu.memory_space<vmem>>, vector<8x128xbf16>,
      } else {
      }
    } else {
    }
    %c1_i32 = arith.constant 1 : i32
    %3 = arith.cmpi eq, %arg0, %c1_i32 : i32
    %4 = arith.extui %3 : i1 to i32
    %c0_i32_1 = arith.constant 0 : i32
    %5 = arith.cmpi ne, %4, %c0_i32_1 : i32
    scf.if %5 {
      %c0 = arith.constant 0 : index
      %c0_2 = arith.constant 0 : index
      %6 = vector.load %arg21[%c0, %c0_2] : memref<8x128xbf16, #tpu.memory_space<vmem>>, vector<8x128xbf16>
      %c0_3 = arith.constant 0 : index
      %c0_4 = arith.constant 0 : index
      %7 = vector.load %arg17[%c0_3, %c0_4] : memref<128x4096xbf16, #tpu.memory_space<vmem>>, vector<128x4096xbf16>
      %cst = arith.constant dense<0.000000e+00> : vector<8x4096xf32>
      %8 = tpu.matmul %6, %7, %cst {dimension_numbers = #tpu.dot_dimension_numbers<[1], [0], [0], [1], [0, 0, 1, 1], [], []>} : vector<8x128xbf16>, vector<128x4096xbf16>, vector<8x4096xf32> -> vector<8x4096xf32>
      %c0_5 = arith.constant 0 : index
      %c0_6 = arith.constant 0 : index
      %9 = vector.load %arg18[%c0_5, %c0_6] : memref<1x4096xf32, #tpu.memory_space<vmem>>, vector<1x4096xf32>
      %10 = vector.broadcast %9 : vector<1x4096xf32> to vector<8x4096xf32>
      %11 = arith.addf %8, %10 : vector<8x4096xf32>
      %12 = math.tanh %11 : vector<8x4096xf32>
      %c0_7 = arith.constant 0 : index
      %c0_8 = arith.constant 0 : index
      %13 = vector.load %arg19[%c0_7, %c0_8] : memref<8x4096xf32, #tpu.memory_space<vmem>>, vector<8x4096xf32>
      tpu.vector_store %arg19[%c0_7, %c0_8], %12 {strides = array<i32>} : memref<8x4096xf32, #tpu.memory_space<vmem>>, vector<8x4096xf32>,
    } else {
    }
    return
  }
  func.func @transform_0(%arg0: i32, %arg1: i32) -> (i32, i32) {
    %c1_i32 = arith.constant 1 : i32
    %0 = arith.subi %c1_i32, %arg0 : i32
    %1 = arith.muli %arg1, %0 : i32
    %c2_i32 = arith.constant 2 : i32
    %2 = arith.muli %c2_i32, %arg0 : i32
    %3 = arith.addi %1, %2 : i32
    %c0_i32 = arith.constant 0 : i32
    %c0_i32_0 = arith.constant 0 : i32
    return %c0_i32, %3 : i32, i32
  }
  func.func @transform_1(%arg0: i32, %arg1: i32) -> (i32, i32) {
    %c1_i32 = arith.constant 1 : i32
    %0 = arith.subi %c1_i32, %arg0 : i32
    %1 = arith.muli %arg1, %0 : i32
    %c2_i32 = arith.constant 2 : i32
    %2 = arith.muli %c2_i32, %arg0 : i32
    %3 = arith.addi %1, %2 : i32
    %c0_i32 = arith.constant 0 : i32
    %c0_i32_0 = arith.constant 0 : i32
    return %3, %c0_i32 : i32, i32
  }
  func.func @transform_2(%arg0: i32, %arg1: i32) -> (i32, i32) {
    %c0_i32 = arith.constant 0 : i32
    %c0_i32_0 = arith.constant 0 : i32
    %c0_i32_1 = arith.constant 0 : i32
    return %c0_i32, %c0_i32_0 : i32, i32
  }
  func.func @transform_3(%arg0: i32, %arg1: i32) -> (i32, i32) {
    %c0_i32 = arith.constant 0 : i32
    %c0_i32_0 = arith.constant 0 : i32
    %c0_i32_1 = arith.constant 0 : i32
    return %c0_i32, %c0_i32_0 : i32, i32
  }
  func.func @transform_4(%arg0: i32, %arg1: i32) -> (i32, i32) {
    %c0_i32 = arith.constant 0 : i32
    %c0_i32_0 = arith.constant 0 : i32
    %c0_i32_1 = arith.constant 0 : i32
    return %c0_i32, %c0_i32_0 : i32, i32
  }
  func.func @transform_5(%arg0: i32, %arg1: i32) -> (i32, i32) {
    %c0_i32 = arith.constant 0 : i32
    %c0_i32_0 = arith.constant 0 : i32
    %c0_i32_1 = arith.constant 0 : i32
    return %c0_i32, %c0_i32_0 : i32, i32
  }
  func.func @transform_6(%arg0: i32, %arg1: i32) -> (i32, i32) {
    %c0_i32 = arith.constant 0 : i32
    %c0_i32_0 = arith.constant 0 : i32
    %c0_i32_1 = arith.constant 0 : i32
    return %c0_i32, %c0_i32_0 : i32, i32
  }
  func.func @transform_7(%arg0: i32, %arg1: i32) -> (i32, i32) {
    %c0_i32 = arith.constant 0 : i32
    %c0_i32_0 = arith.constant 0 : i32
    %c0_i32_1 = arith.constant 0 : i32
    return %c0_i32, %c0_i32_0 : i32, i32
  }
  func.func @transform_8(%arg0: i32, %arg1: i32) -> (i32, i32) {
    %c0_i32 = arith.constant 0 : i32
    %c0_i32_0 = arith.constant 0 : i32
    %c0_i32_1 = arith.constant 0 : i32
    return %c0_i32, %c0_i32_0 : i32, i32
  }
  func.func @transform_9(%arg0: i32, %arg1: i32) -> (i32, i32) {
    %c0_i32 = arith.constant 0 : i32
    %c0_i32_0 = arith.constant 0 : i32
    %c0_i32_1 = arith.constant 0 : i32
    return %c0_i32, %c0_i32_0 : i32, i32
  }
  func.func @transform_10(%arg0: i32, %arg1: i32) -> (i32, i32) {
    %c0_i32 = arith.constant 0 : i32
    %c0_i32_0 = arith.constant 0 : i32
    %c0_i32_1 = arith.constant 0 : i32
    return %c0_i32, %c0_i32_0 : i32, i32
  }
  func.func @transform_11(%arg0: i32, %arg1: i32) -> (i32, i32) {
    %c0_i32 = arith.constant 0 : i32
    %c0_i32_0 = arith.constant 0 : i32
    %c0_i32_1 = arith.constant 0 : i32
    return %c0_i32, %c0_i32_0 : i32, i32
  }
  func.func @transform_12(%arg0: i32, %arg1: i32) -> (i32, i32) {
    %c0_i32 = arith.constant 0 : i32
    %c0_i32_0 = arith.constant 0 : i32
    %c0_i32_1 = arith.constant 0 : i32
    return %c0_i32, %c0_i32_0 : i32, i32
  }
  func.func @transform_13(%arg0: i32, %arg1: i32) -> (i32, i32) {
    %c0_i32 = arith.constant 0 : i32
    %c0_i32_0 = arith.constant 0 : i32
    %c0_i32_1 = arith.constant 0 : i32
    return %c0_i32, %c0_i32_0 : i32, i32
  }
  func.func @transform_14(%arg0: i32, %arg1: i32) -> (i32, i32) {
    %c0_i32 = arith.constant 0 : i32
    %c0_i32_0 = arith.constant 0 : i32
    %c0_i32_1 = arith.constant 0 : i32
    return %c0_i32, %c0_i32_0 : i32, i32
  }
  func.func @transform_15(%arg0: i32, %arg1: i32) -> (i32, i32) {
    %0 = arith.muli %arg1, %arg0 : i32
    %c0_i32 = arith.constant 0 : i32
    %c0_i32_0 = arith.constant 0 : i32
    return %c0_i32, %0 : i32, i32
  }
  func.func @transform_16(%arg0: i32, %arg1: i32) -> (i32, i32) {
    %0 = arith.muli %arg1, %arg0 : i32
    %c0_i32 = arith.constant 0 : i32
    %c0_i32_0 = arith.constant 0 : i32
    return %c0_i32, %0 : i32, i32
  }
  func.func @transform_17(%arg0: i32, %arg1: i32) -> (i32, i32) {
    %0 = arith.muli %arg1, %arg0 : i32
    %c0_i32 = arith.constant 0 : i32
    %c0_i32_0 = arith.constant 0 : i32
    return %c0_i32, %0 : i32, i32
  }
}

</mosaic_0001>

<bundles_post_ra>
// kernel: fcn_autoencoder_forward.1
= control target key start
LH: loop header
LB: loop body
LE: loop exit
PB: predicated region body
PF: predicated region fallthrough
CT: control target
= control target key end

     0   :  { %s11136_s0 = inlined_call_operand.hbm [shape: f32[8,12288], index: 0, kind: input, shape index: {}]   ;;  %s11137_s1 = inlined_call_operand.hbm [shape: bf16[12288,128], index: 1, kind: input, shape index: {}]   ;;  %s11138_s2 = inlined_call_operand.hbm [shape: f32[1,128], index: 2, kind: input, shape index: {}]   ;;  %s11139_s3 = inlined_call_operand.vmem [shape: bf16[128,64], index: 3, kind: input, shape index: {}]   ;;  %s11140_s4 = inlined_call_operand.hbm [shape: f32[1,64], index: 4, kind: input, shape index: {}]   ;;  %s11141_s5 = inlined_call_operand.vmem [shape: bf16[64,12], index: 5, kind: input, shape index: {}]   ;;  %s11142_s6 = inlined_call_operand.hbm [shape: f32[1,12], index: 6, kind: input, shape index: {}]   ;;  %s11143_s7 = inlined_call_operand.vmem [shape: bf16[12,3], index: 7, kind: input, shape index: {}]   ;;  %s11144_s8 = inlined_call_operand.hbm [shape: f32[1,3], index: 8, kind: input, shape index: {}]   ;;  %s11145_s9 = inlined_call_operand.hbm [shape: bf16[3,12], index: 9, kind: input, shape index: {}]   ;;  %s11146_s10 = inlined_call_operand.hbm [shape: f32[1,12], index: 10, kind: input, shape index: {}]   ;;  %s11147_s11 = inlined_call_operand.hbm [shape: bf16[12,64], index: 11, kind: input, shape index: {}]   ;;  %s11148_s12 = inlined_call_operand.hbm [shape: f32[1,64], index: 12, kind: input, shape index: {}]   ;;  %s11149_s13 = inlined_call_operand.hbm [shape: bf16[64,128], index: 13, kind: input, shape index: {}]   ;;  %s11150_s14 = inlined_call_operand.hbm [shape: f32[1,128], index: 14, kind: input, shape index: {}]   ;;  %s11151_s15 = inlined_call_operand.hbm [shape: bf16[128,12288], index: 15, kind: input, shape index: {}]   ;;  %s11152_s16 = inlined_call_operand.hbm [shape: f32[1,12288], index: 16, kind: input, shape index: {}]   ;;  %s11153_s17 = inlined_call_operand.hbm [shape: f32[8,12288], index: 17, kind: output, shape index: {}]  }
   0x1   :  { %11176 = sst [smem:[#allocation52_spill]] %s11136_s0 }
   0x2   :  { %11177 = sst [smem:[#allocation53_spill]] %s11137_s1 }
   0x3   :  { %11178 = sst [smem:[#allocation54_spill]] %s11138_s2 }
   0x4   :  { %11179 = sst [smem:[#allocation55_spill]] %s11139_s3 }
   0x5   :  { %11180 = sst [smem:[#allocation56_spill]] %s11140_s4 }
   0x6   :  { %11181 = sst [smem:[#allocation57_spill]] %s11141_s5 }
   0x7   :  { %11182 = sst [smem:[#allocation58_spill]] %s11142_s6 }
   0x8   :  { %11183 = sst [smem:[#allocation59_spill]] %s11143_s7 }
   0x9   :  { %11184 = sst [smem:[#allocation60_spill]] %s11144_s8 }
   0xa   :  { %11185 = sst [smem:[#allocation61_spill]] %s11145_s9 }
   0xb   :  { %11186 = sst [smem:[#allocation62_spill]] %s11146_s10 }
   0xc   :  { %11187 = sst [smem:[#allocation63_spill]] %s11148_s12 }
   0xd   :  { %11188 = sst [smem:[#allocation64_spill]] %s11150_s14 }
   0xe   :  { %11189 = sst [smem:[#allocation65_spill]] %s11151_s15 }
   0xf   :  { %11190 = sst [smem:[#allocation66_spill]] %s11152_s16 }
  0x10   :  { %11191 = sst [smem:[#allocation67_spill]] %s11153_s17 }
  0x11   :  { %22 = vsyncpa [#allocation5], 0 }
  0x12   :  { %24 = vsyncpa [#allocation5 + $0x1], 0 }
  0x13   :  { %25 = vsyncpa [#allocation8], 0 }
  0x14   :  { %27 = vsyncpa [#allocation8 + $0x1], 0 }
  0x15   :  { %28 = vsyncpa [#allocation11], 0 }
  0x16   :  { %29 = vsyncpa [#allocation14], 0 }
  0x17   :  { %30 = vsyncpa [#allocation17], 0 }
  0x18   :  { %31 = vsyncpa [#allocation20], 0 }
  0x19   :  { %32 = vsyncpa [#allocation23], 0 }
  0x1a   :  { %33 = vsyncpa [#allocation6], 0 }
  0x1b   :  { %35 = vsyncpa [#allocation6 + $0x1], 0  ;;  %s9788_s24 = smov 0   ;;  %s9790_s25 = smov 0  }
  0x1c   :  { %s9792_s26 = smov 0   ;;  %s9794_s27 = smov 0  }
  0x1d   :  { %s9796_s28 = smov 0   ;;  %s9798_s29 = smov 0  }
  0x1e   :  { %s9800_s0 = smov 0   ;;  %s9802_s30 = smov 0  }
  0x1f   :  { %s9804_s18 = smov 0   ;;  %s9806_s19 = smov 0  }
  0x20   :  { %s9808_s1 = smov 0  }
  0x21 LB: > { %11192 = sst [smem:[#allocation38_spill]] %s9639_s24  ;;  %s9844_s20 = sadd.s32 4294967295, %s9679_s1   ;;  %s9679_s1 = sphi %s9808_s1, %s41_s1   ;;  %s9675_s19 = sphi %s9806_s19, %s11267_s19   ;;  %s9671_s18 = sphi %s9804_s18, %s11266_s18   ;;  %s9667_s30 = sphi %s9802_s30, %s11273_s30   ;;  %s9663_s0 = sphi %s9800_s0, %s11264_s0   ;;  %s9659_s29 = sphi %s9798_s29, %s11263_s29   ;;  %s9655_s28 = sphi %s9796_s28, %s11272_s28   ;;  %s9651_s27 = sphi %s9794_s27, %s11271_s27   ;;  %s9647_s26 = sphi %s9792_s26, %s11270_s26   ;;  %s9643_s25 = sphi %s9790_s25, %s11269_s25   ;;  %s9639_s24 = sphi %s9788_s24, %s11268_s24  }
  0x22   : > { %11193 = sst [smem:[#allocation39_spill]] %s9659_s29  ;;  %p6095_p0 = scmp.ge.s32.totalorder %s9679_s1, 1 }
  0x23   : > { %11194 = sst [smem:[#allocation40_spill]] %s9663_s0  ;;  %p11173_p1 = scmp.eq.s32.totalorder %s9844_s20, 0 }
  0x24   : > { %11195 = sst [smem:[#allocation41_spill]] %s9667_s30  ;;  %p483_p2 = scmp.lt.s32.totalorder %s9679_s1, 7 }
  0x25   : > { %11196 = sst [smem:[#allocation42_spill]] %s9671_s18  ;;  %s9681_s7 = smov [#allocation9]  }
  0x26   : > { %11197 = sst [smem:[#allocation43_spill]] %s9675_s19  ;;  %p9852_p3 = pnand %p6095_p0, %p483_p2 }
  0x27   : > { %s11198_s2 = sld [smem:[#allocation54_spill]]  ;;  %s497_s5 = sshll.u32 %s9681_s7, 4  ;;  %s498_s5 = int_to_ptr.vmem [resolvable:$true] %s497_s5 }
  0x28   : > { %s11199_s17 = scalar_select %p9852_p3, 1, 0 }
  0x29   : > { %p8854_p4 = pneg %p9852_p3  ;;  %s11201_s4 = sld [smem:[#allocation56_spill]] }
  0x2a   : > { %11200 = sst [smem:[#allocation44_spill]] %s11199_s17  ;;  %s9682_s17 = smov [#allocation10]  }
  0x2b   : > { %p9863_p5 = pnand %p8854_p4, %p11173_p1  ;;  %s11203_s8 = sld [smem:[#allocation60_spill]] }
  0x2c   : > { %s512_s7 = sshll.u32 %s9682_s17, 4  ;;  %s11204_s10 = sld [smem:[#allocation62_spill]]  ;;  %s513_s7 = int_to_ptr.vmem [resolvable:$true] %s512_s7 }
  0x2d   : > { %s495_s23 = sshll.u32 %s11198_s2, 4  ;;  %s9683_s15 = smov [#allocation13]   ;;  %s496_s23 = int_to_ptr.hbm [resolvable:$true] %s495_s23 }
  0x2e   : > { %8857 = dma.hbm_to_vmem [thread:$0]  (!%p9863_p5), %s496_s23, 16, %s498_s5, [#allocation8]  }
  0x2f   : > { %s510_s30 = sshll.u32 %s11201_s4, 4  ;;  %s542_s14 = sshll.u32 %s9683_s15, 4  ;;  %s511_s30 = int_to_ptr.hbm [resolvable:$true] %s510_s30  ;;  %s543_s14 = int_to_ptr.vmem [resolvable:$true] %s542_s14 }
  0x30   : > { %8860 = dma.hbm_to_vmem [thread:$0]  (!%p9863_p5), %s511_s30, 16, %s513_s7, [#allocation11]  }
  0x31   : > { %s540_s2 = sshll.u32 %s11203_s8, 4  ;;  %s9684_s5 = smov [#allocation16]   ;;  %s541_s2 = int_to_ptr.hbm [resolvable:$true] %s540_s2 }
  0x32   : > { %s564_s4 = sshll.u32 %s11204_s10, 4  ;;  %s566_s17 = sshll.u32 %s9684_s5, 4  ;;  %s565_s4 = int_to_ptr.hbm [resolvable:$true] %s564_s4  ;;  %s567_s17 = int_to_ptr.vmem [resolvable:$true] %s566_s17 }
  0x33   : > { %8866 = dma.hbm_to_vmem [thread:$0]  (!%p9863_p5), %s541_s2, 16, %s543_s14, [#allocation14]  }
  0x34   : > { %s11205_s12 = sld [smem:[#allocation63_spill]]  ;;  %s9685_s15 = smov [#allocation19]  }
  0x35   : > { %8872 = dma.hbm_to_vmem [thread:$0]  (!%p9863_p5), %s565_s4, 16, %s567_s17, [#allocation17]  }
  0x36   : > { %s592_s22 = sshll.u32 %s9685_s15, 4  ;;  %s50_s14 = sadd.s32 1, %s9671_s18  ;;  %s593_s22 = int_to_ptr.vmem [resolvable:$true] %s592_s22 }
  0x37   : > { %s53_s7 = sadd.s32 1, %s9675_s19  ;;  %p51_p6 = scmp.ge.s32.totalorder %s50_s14, 3 }
  0x38   : > { %s57_s3 = ssub.s32 1, %s9675_s19  ;;  %s6091_s4 = sshll.u32 %s9675_s19, 1 }
  0x39   : > { %s58_s0 = smul.u32 %s9671_s18, %s57_s3  ;;  %s11275_s14 = smov (%p51_p6, %s50_s14), 0 }
  0x3a   : > { %s590_s21 = sshll.u32 %s11205_s12, 4  ;;  %11206 = sst [smem:[#allocation45_spill]] %s11275_s14  ;;  %s591_s21 = int_to_ptr.hbm [resolvable:$true] %s590_s21 }
  0x3b   : > { %8878 = dma.hbm_to_vmem [thread:$0]  (!%p9863_p5), %s591_s21, 16, %s593_s22, [#allocation20]  }
  0x3c   : > { %s11277_s7 = smov (!%p51_p6, %s53_s7), %s9675_s19  ;;  %s9895_s5 = sadd.s32 %s6091_s4, %s58_s0 }
  0x3d   : > { %s68_s17 = sadd.s32 1, %s9659_s29  ;;  %p55_p7 = scmp.ge.s32.totalorder %s11277_s7, 2 }
  0x3e   : > { %p75_p8 = scmp.ne.s32.totalorder %s9659_s29, %s9655_s28  ;;  %p76_p9 = scmp.eq.s32.totalorder %s9679_s1, 0 }
  0x3f   : > { %p81_p10 = scmp.ne.s32.totalorder %s9655_s28, %s9651_s27  ;;  %s11279_s7 = smov (%p55_p7, %s11277_s7), 0 }
  0x40   : > { %11207 = sst [smem:[#allocation46_spill]] %s11279_s7  ;;  %p9907_p11 = por %p76_p9, %p75_p8 }
  0x41   : > { %p9913_p12 = por %p11173_p1, %p81_p10  ;;  %s61_s27 = ssub.s32 1, %s11279_s7 }
  0x42   : > { %s6092_s21 = sshll.u32 %s11279_s7, 1  ;;  %s62_s15 = smul.u32 %s61_s27, %s11275_s14 }
  0x43   : > { %s11209_s23 = scalar_select %p9913_p12, 1, 0 }
  0x44   : > { %s403_s22 = sadd.s32 1, %s9647_s26  ;;  %s9923_s3 = smul.u32 %s9671_s18, %s9675_s19 }
  0x45   : > { %p410_p13 = scmp.ne.s32.totalorder %s9647_s26, %s9643_s25  ;;  %s64_s0 = sadd.s32 %s6092_s21, %s62_s15 }
  0x46   : > { %s399_s4 = smul.u32 %s11279_s7, %s11275_s14  ;;  %s65_s2 = ssub.s32 %s9895_s5, %s64_s0 }
  0x47   : > { %p9935_p0 = por %p410_p13, %p76_p9  ;;  %p66_p2 = scmp.eq.s32.totalorder %s65_s2, 0 }
  0x48   : > { %s400_s27 = ssub.s32 %s9923_s3, %s399_s4  ;;  %p416_p6 = scmp.ne.s32.totalorder %s9643_s25, %s9639_s24 }
  0x49   : > { %p401_p4 = scmp.eq.s32.totalorder %s400_s27, 0  ;;  %p470_p8 = scmp.eq.s32.totalorder %s9844_s20, 5 }
  0x4a   : > { %s9943_s10 = scalar_select %p66_p2, %s9659_s29, %s68_s17  }
  0x4b   : > { %s9946_s12 = scalar_select %p401_p4, %s9647_s26, %s403_s22  }
  0x4c   : > { %11211 = sst [smem:[#allocation47_spill]] %s9943_s10  ;;  %p9950_p7 = por %p416_p6, %p11173_p1 }
  0x4d   : > { %11212 = sst [smem:[#allocation48_spill]] %s9946_s12  ;;  %s11215_s15 = sadd.s32 4294967294, %s9679_s1  }
  0x4e   : > { %s11213_s21 = scalar_select %p9950_p7, 1, 0 }
  0x4f   : > { %p476_p9 = scmp.eq.s32.totalorder %s11215_s15, 5  ;;  %p8912_p10 = scmp.lt.s32.totalorder %s9679_s1, 6 }
  0x50   : > { %11214 = sst [smem:[#allocation49_spill]] %s11213_s21  ;;  %p9961_p12 = por %p470_p8, %p410_p13 }
  0x51   : > { %p9966_p2 = por %p476_p9, %p416_p6  ;;  %s631_s0 = sand.u32 1, %s9659_s29  }
  0x52   : > { %s11216_s2 = scalar_select %p9961_p12, 1, 0 }
  0x53   : > { %s11218_s22 = scalar_select %p9966_p2, 1, 0 }
  0x54   : > { %11217 = sst [smem:[#allocation50_spill]] %s11216_s2  ;;  %s8270_s4 = sshll.u32 %s9895_s5, 8 }
  0x55   : > { %11219 = sst [smem:[#allocation51_spill]] %s11218_s22  ;;  %s6107_s27 = sshll.u32 %s631_s0, 8 }
  0x56   : > { %s11220_s19 = sld [smem:[#allocation52_spill]]  ;;  %s633_s12 = scalar_lea.vmem [#allocation4], %s6107_s27 }
  0x57   : > { %s646_s24 = sshll.u32 %s633_s12, 4  ;;  %p9979_p13 = pnand %p8912_p10, %p9907_p11  ;;  %s647_s24 = int_to_ptr.vmem [resolvable:$true] %s646_s24 }
  0x58   : > { %s6111_s29 = sshll.u32 %s631_s0, 11  ;;  %s11223_s22 = sand.u32 1, %s9679_s1  }
  0x59   : > { %s9985_s2 = scalar_lea.sflag [#allocation5], %s11223_s22  ;;  %p9255_p6 = pneg %p9979_p13 }
  0x5c   : > { %s11221_s10 = smov %s11220_s19  ;;  %s642_s18 = scalar_lea.hbm %s11220_s19, %s8270_s4 }
  0x5d   : > { %s644_s15 = sshll.u32 %s642_s18, 4  ;;  %s9258_s14 = scalar_lea.hbm %s11221_s10, 768  ;;  %s645_s15 = int_to_ptr.hbm [resolvable:$true] %s644_s15 }
  0x5e   : > { %s9251_s21 = sshra.s32 %s645_s15, 4  ;;  %s9252_s21 = int_to_ptr.hbm [resolvable:$true] %s9251_s21 }
  0x5f   : > { %s9253_s19 = scalar_lea.hbm %s9252_s21, 256 }
  0x60   : > { %p9254_p4 = scmp.ne.s32.totalorder %s9252_s21, %s9253_s19  ;;  %p9260_p11 = scmp.lt.s32.totalorder %s9258_s14, %s9253_s19 }
  0x62   : > { %p9256_p8 = pnand %p9255_p6, %p9254_p4 }
  0x64   : > { %p9257_p9 = pneg %p9256_p8 }
  0x66   : > { %p9262_p1 = pnand %p9260_p11, %p9257_p9 }
  0x68   : > { %9265 = shalt.err (!%p9262_p1)
}
  0x69   : > { %8888 = dma.hbm_to_vmem [thread:$0]  (!%p9979_p13), %s645_s15, 4096, %s647_s24, %s9985_s2  }
  0x6a   : > { %s8271_s7 = sshll.u32 %s9895_s5, 11  ;;  %s657_s30 = scalar_lea.vmem [#allocation7], %s6111_s29 }
  0x6b   : > { %s669_s21 = sshll.u32 %s657_s30, 4  ;;  %s11224_s4 = sld [smem:[#allocation53_spill]]  ;;  %s670_s21 = int_to_ptr.vmem [resolvable:$true] %s669_s21 }
  0x6c   : > { %p10006_p1 = pnand %p8912_p10, %p9935_p0  ;;  %s11226_s18 = sand.u32 1, %s9679_s1  }
  0x6d   : > { %s10012_s14 = scalar_lea.sflag [#allocation8], %s11226_s18 }
  0x71   : > { %s666_s27 = scalar_lea.hbm %s11224_s4, %s8271_s7  ;;  %s9288_s8 = scalar_lea.hbm %s11224_s4, 6144 }
  0x72   : > { %s667_s19 = sshll.u32 %s666_s27, 4  ;;  %s668_s19 = int_to_ptr.hbm [resolvable:$true] %s667_s19 }
  0x73   : > { %s9281_s24 = sshra.s32 %s668_s19, 4  ;;  %s9282_s24 = int_to_ptr.hbm [resolvable:$true] %s9281_s24 }
  0x74   : > { %s9283_s29 = scalar_lea.hbm %s9282_s24, 2048 }
  0x75   : > { %p9284_p4 = scmp.ne.s32.totalorder %s9282_s24, %s9283_s29  ;;  %p9290_p0 = scmp.lt.s32.totalorder %s9288_s8, %s9283_s29 }
  0x77   : > { %p9286_p8 = pnand %p9284_p4, %p9255_p6 }
  0x79   : > { %p9287_p9 = pneg %p9286_p8 }
  0x7b   : > { %p9292_p10 = pnand %p9290_p0, %p9287_p9 }
  0x7d   : > { %9295 = shalt.err (!%p9292_p10)
}
  0x7e   : > { %s9686_s7 = smov 64   ;;  %s9687_s30 = smov 4  }
  0x7f   : > { %8891 = dma.hbm_to_vmem [thread:$0]  (!%p9979_p13), %s668_s19, 32768, %s670_s21, %s10012_s14, %s9686_s7, %s9686_s7, %s9687_s30  }
  0x80   : > { %s11227_s6 = sld [smem:[#allocation58_spill]]  ;;  %s9688_s18 = smov [#allocation12]  }
  0x81   : > { %s527_s24 = sshll.u32 %s9688_s18, 4  ;;  %s11228_s9 = sld [smem:[#allocation61_spill]]  ;;  %s528_s24 = int_to_ptr.vmem [resolvable:$true] %s527_s24 }
  0x82   : > { %s9689_s17 = smov [#allocation15]   ;;  %s575_s19 = sshll.u32 %s11147_s11, 4  ;;  %s576_s19 = int_to_ptr.hbm [resolvable:$true] %s575_s19 }
  0x83   : > { %s554_s8 = sshll.u32 %s9689_s17, 4  ;;  %s601_s18 = sshll.u32 %s11149_s13, 4  ;;  %s555_s8 = int_to_ptr.vmem [resolvable:$true] %s554_s8  ;;  %s602_s18 = int_to_ptr.hbm [resolvable:$true] %s601_s18 }
  0x84   : > { %s9690_s29 = smov [#allocation18]   ;;  %s9691_s4 = smov [#allocation21]  }
  0x85   : > { %s681_s21 = sand.u32 1, %s9647_s26   ;;  %s9692_s22 = smov [#allocation22]  }
  0x86   : > { %s525_s27 = sshll.u32 %s11227_s6, 4  ;;  %s618_s0 = sshll.u32 %s9692_s22, 4  ;;  %s526_s27 = int_to_ptr.hbm [resolvable:$true] %s525_s27  ;;  %s619_s0 = int_to_ptr.vmem [resolvable:$true] %s618_s0 }
  0x87   : > { %s552_s15 = sshll.u32 %s11228_s9, 4  ;;  %s9695_s22 = smov 128   ;;  %s553_s15 = int_to_ptr.hbm [resolvable:$true] %s552_s15 }
  0x88   : > { %8863 = dma.hbm_to_vmem [thread:$0]  (!%p9863_p5), %s526_s27, 16, %s528_s24, [#allocation11]  }
  0x89   : > { %8869 = dma.hbm_to_vmem [thread:$0]  (!%p9863_p5), %s553_s15, 32, %s555_s8, [#allocation14]  }
  0x8a   : > { %s577_s27 = sshll.u32 %s9690_s29, 4  ;;  %s603_s24 = sshll.u32 %s9691_s4, 4  ;;  %s578_s27 = int_to_ptr.vmem [resolvable:$true] %s577_s27  ;;  %s604_s24 = int_to_ptr.vmem [resolvable:$true] %s603_s24 }
  0x8b   : > { %8875 = dma.hbm_to_vmem [thread:$0]  (!%p9863_p5), %s576_s19, 128, %s578_s27, [#allocation17], %s9686_s7, %s9686_s7, %s9687_s30  }
  0x8c   : > { %s11229_s15 = sld [smem:[#allocation64_spill]]  ;;  %s6115_s19 = sshll.u32 %s681_s21, 11 }
  0x8d   : > { %8881 = dma.hbm_to_vmem [thread:$0]  (!%p9863_p5), %s602_s18, 512, %s604_s24, [#allocation20], %s9686_s7, %s9686_s7, %s9687_s30  }
  0x8e   : > { %s8272_s29 = sshll.u32 %s9923_s3, 7  ;;  %s683_s27 = scalar_lea.vmem [#allocation24], %s6115_s19 }
  0x8f   : > { %s692_s4 = sshll.u32 %s683_s27, 4  ;;  %s6118_s30 = sshll.u32 %s681_s21, 5  ;;  %s693_s4 = int_to_ptr.vmem [resolvable:$true] %s692_s4 }
  0x90   : > { %s9693_s18 = smov 6144   ;;  %s9694_s24 = smov 2048  }
  0x91   : > { %s6119_s16 = sshll.u32 %s9923_s3, 5  ;;  %s11231_s19 = sld [smem:[#allocation66_spill]] }
  0x92   : > { %s616_s8 = sshll.u32 %s11229_s15, 4  ;;  %s11230_s15 = sld [smem:[#allocation65_spill]]  ;;  %s617_s8 = int_to_ptr.hbm [resolvable:$true] %s616_s8 }
  0x93   : > { %8884 = dma.hbm_to_vmem [thread:$0]  (!%p9863_p5), %s617_s8, 16, %s619_s0, [#allocation23]  }
  0x94   : > { %s706_s9 = scalar_lea.vmem [#allocation25], %s6118_s30  ;;  %s726_s21 = sand.u32 (!%p9852_p3), 1, %s9844_s20  }
  0x95   : > { %s715_s10 = sshll.u32 %s706_s9, 4  ;;  %p11233_p5 = scmp.ne.s32.totalorder (!%p9852_p3), %s11209_s23, 0  ;;  %s716_s10 = int_to_ptr.vmem [resolvable:$true] %s715_s10 }
  0x97   : > { %s711_s27 = scalar_lea.hbm %s11231_s19, %s6119_s16  ;;  %724 = sbr.rel (%p9852_p3) target bundleno = 1897 (0x769), region = 88 }
  0x98   : > { %s689_s6 = scalar_lea.hbm %s11230_s15, %s8272_s29  ;;  %s713_s5 = sshll.u32 %s711_s27, 4  ;;  %s714_s5 = int_to_ptr.hbm [resolvable:$true] %s713_s5 }
  0x99   : > { %s690_s7 = sshll.u32 %s689_s6, 4  ;;  %s727_s29 = scalar_lea.sflag (!%p9852_p3), [#allocation5], %s726_s21  ;;  %s691_s7 = int_to_ptr.hbm [resolvable:$true] %s690_s7 }
  0x9a   : > { %8894 = dma.hbm_to_vmem [thread:$0]  (!%p10006_p1), %s691_s7, 32768, %s693_s4, %s9985_s2, %s9693_s18, %s9694_s24, %s9695_s22  }
  0x9b   : > { %8897 = dma.hbm_to_vmem [thread:$0]  (!%p10006_p1), %s714_s5, 512, %s716_s10, %s10012_s14  }
  0x9c   : > { %s728_s2 = sand.u32 1, %s9655_s28  }
  0x9d   : > { %s6121_s3 = sshll.u32 %s728_s2, 8 }
  0x9e   : > { %s10076_s4 = scalar_lea.vmem [#allocation4], %s6121_s3 }
  0x9f   : > { %9594 = dma.done.wait (%p11233_p5), %s727_s29, 4096  }
  0xa0   : > { %9596 = vsyncadd (%p11233_p5), %s727_s29, 4294963200  ;;  %s6122_s9 = sshll.u32 %s728_s2, 11  ;;  %s737_s10 = scalar_lea.sflag [#allocation8], %s726_s21 }
  0xa1   : > { %s10082_s12 = scalar_lea.vmem [#allocation7], %s6122_s9 }
  0xa2   : > { %9598 = dma.done.wait (%p11233_p5), %s737_s10, 32768  }
  0xa3   : > { %9600 = vsyncadd (%p11233_p5), %s737_s10, 4294934528  ;;  %p11234_p3 = scmp.eq.s32.totalorder %s9844_s20, 0 }
  0xa5   : > { %9602 = dma.done.wait (%p11234_p3), [#allocation8], 16   ;;  %p11235_p13 = pmov %p11234_p3 }
  0xa6   : > { %p11236_p6 = pmov %p11234_p3 }
  0xa7   : > { %9604 = vsyncadd (%p11235_p13), [#allocation8], 4294967280 }
  0xa8   : > { %9606 = dma.done.wait (%p11236_p6), [#allocation11], 32   ;;  %p11237_p11 = pmov %p11234_p3 }
  0xa9   : > { %p11238_p1 = pmov %p11234_p3 }
  0xaa   : > { %9608 = vsyncadd (%p11237_p11), [#allocation11], 4294967264 }
  0xab   : > { %9610 = dma.done.wait (%p11238_p1), [#allocation14], 48   ;;  %p11239_p4 = pmov %p11238_p1 }
  0xac   : > { %p11240_p8 = pmov %p11238_p1 }
  0xad   : > { %9612 = vsyncadd (%p11239_p4), [#allocation14], 4294967248 }
  0xae   : > { %9614 = dma.done.wait (%p11240_p8), [#allocation17], 144   ;;  %p11241_p9 = pmov %p11238_p1 }
  0xaf   : > { %p11242_p0 = pmov %p11238_p1 }
  0xb0   : > { %9616 = vsyncadd (%p11241_p9), [#allocation17], 4294967152 }
  0xb1   : > { %9618 = dma.done.wait (%p11242_p0), [#allocation20], 528   ;;  %p11243_p10 = pmov %p11242_p0 }
  0xb2   : > { %p11244_p5 = pmov %p11242_p0 }
  0xb3   : > { %9620 = vsyncadd (%p11243_p10), [#allocation20], 4294966768 }
  0xb4   : > { %9622 = dma.done.wait (%p11244_p5), [#allocation23], 16   ;;  %p11245_p3 = pmov %p11242_p0 }
  0xb5   : > { %s10113_s14 = sand.u32 1, %s9643_s25  }
  0xb6   : > { %9624 = vsyncadd (%p11245_p3), [#allocation23], 4294967280  ;;  %s6133_s17 = sshll.u32 %s10113_s14, 11 }
  0xb7   : > { %s10116_s15 = scalar_lea.vmem [#allocation24], %s6133_s17 }
  0xb8   : > { %9626 = dma.done.wait (%p9950_p7), %s727_s29, 32768  }
  0xb9   : > { %9628 = vsyncadd (%p9950_p7), %s727_s29, 4294934528  ;;  %s6134_s7 = sshll.u32 %s10113_s14, 5 }
  0xba   : > { %s10123_s30 = scalar_lea.vmem [#allocation25], %s6134_s7 }
  0xbb   : > { %9630 = dma.done.wait (%p9950_p7), %s737_s10, 512  }
  0xbc   : > { %9632 = vsyncadd (%p9950_p7), %s737_s10, 4294966784  ;;  %s6135_s20 = sshll.u32 %s10113_s14, 8  ;;  %s11247_s24 = sld [smem:[#allocation41_spill]] }
  0xbd   : > { %s10130_s18 = scalar_lea.vmem [#allocation26], %s6135_s20 }
  0xc2   : > { %p6136_p13 = scmp.ne.s32.totalorder %s11247_s24, 0 }
  0xc3   : > { %s11248_s22 = sld [smem:[#allocation40_spill]] (!%p6136_p13) }
  0xc4   : > { %897 = sbr.rel (%p6136_p13) target bundleno = 1457 (0x5b1), region = 148 }
  0xc9   : > { %p6137_p6 = scmp.ne.s32.totalorder %s11248_s22, 0 }
  0xcb   : > { %901 = sbr.rel (%p6137_p6) target bundleno = 210 (0xd2), region = 152 }
  0xd0   : > { %v9696_v0 = vmov 0.0  }
  0xd1   : > { %902 = vst [vmem:[#allocation2] sm:$0xff] %v9696_v0 }
  0xd2 PF: > { %v8280_v1 = vld [vmem:[%s10082_s12 + $0x38] sm:$0xff]  ;;  %v8279_v5 = vld [vmem:[%s10082_s12 + $0x30] sm:$0xff]  ;;  %v8278_v9 = vld [vmem:[%s10082_s12 + $0x28] sm:$0xff]  ;;  %s11249_s16 = sld [smem:[#allocation40_spill]] }
  0xd3   : > { %v8288_v2 = vld [vmem:[%s10082_s12 + $0x78] sm:$0xff]  ;;  %3016 = vmatpush.bf16.msra.mxu0 %v8280_v1  ;;  %v8287_v6 = vld [vmem:[%s10082_s12 + $0x70] sm:$0xff]  ;;  %v8286_v10 = vld [vmem:[%s10082_s12 + $0x68] sm:$0xff] }
  0xd4   : > { %v8296_v3 = vld [vmem:[%s10082_s12 + $0xb8] sm:$0xff]  ;;  %3029 = vmatpush.bf16.msra.mxu1 %v8288_v2  ;;  %v8295_v7 = vld [vmem:[%s10082_s12 + $0xb0] sm:$0xff]  ;;  %v8294_v11 = vld [vmem:[%s10082_s12 + $0xa8] sm:$0xff] }
  0xd5   : > { %v8304_v4 = vld [vmem:[%s10082_s12 + $0xf8] sm:$0xff]  ;;  %3042 = vmatpush.bf16.msra.mxu2 %v8296_v3  ;;  %v8303_v8 = vld [vmem:[%s10082_s12 + $0xf0] sm:$0xff]  ;;  %v8302_v12 = vld [vmem:[%s10082_s12 + $0xe8] sm:$0xff] }
  0xd6   : > { %3055 = vmatpush.bf16.msra.mxu3 %v8304_v4  ;;  %v8277_v13 = vld [vmem:[%s10082_s12 + $0x20] sm:$0xff]  ;;  %v8276_v17 = vld [vmem:[%s10082_s12 + $0x18] sm:$0xff]  ;;  %v8275_v21 = vld [vmem:[%s10082_s12 + $0x10] sm:$0xff] }
  0xd7   : > { %3017 = vmatpush.bf16.msra.mxu0 %v8279_v5  ;;  %v8285_v14 = vld [vmem:[%s10082_s12 + $0x60] sm:$0xff]  ;;  %v8284_v18 = vld [vmem:[%s10082_s12 + $0x58] sm:$0xff]  ;;  %v8283_v22 = vld [vmem:[%s10082_s12 + $0x50] sm:$0xff] }
  0xd8   : > { %3030 = vmatpush.bf16.msra.mxu1 %v8287_v6  ;;  %v8293_v15 = vld [vmem:[%s10082_s12 + $0xa0] sm:$0xff]  ;;  %v8292_v19 = vld [vmem:[%s10082_s12 + $0x98] sm:$0xff]  ;;  %v8291_v23 = vld [vmem:[%s10082_s12 + $0x90] sm:$0xff]  ;;  %p7162_p7 = scmp.ne.s32.totalorder %s11249_s16, 2 }
  0xd9   : > { %3043 = vmatpush.bf16.msra.mxu2 %v8295_v7  ;;  %v8301_v16 = vld [vmem:[%s10082_s12 + $0xe0] sm:$0xff]  ;;  %v8300_v20 = vld [vmem:[%s10082_s12 + $0xd8] sm:$0xff]  ;;  %v8299_v24 = vld [vmem:[%s10082_s12 + $0xd0] sm:$0xff]  ;;  %s11250_s19 = sld [smem:[#allocation55_spill]] (!%p7162_p7) }
  0xda   : > { %3056 = vmatpush.bf16.msra.mxu3 %v8303_v8  ;;  %v8274_v25 = vld [vmem:[%s10082_s12 + $0x8] sm:$0xff]  ;;  %v8273_v29 = vld [vmem:[%s10082_s12] sm:$0xff]  ;;  %v8312_v33 = vld [vmem:[%s10082_s12 + $0x138] sm:$0xff]  ;;  %s11252_s3 = sld [smem:[#allocation57_spill]] (!%p7162_p7) }
  0xdb   : > { %3018 = vmatpush.bf16.msra.mxu0 %v8278_v9  ;;  %v8282_v26 = vld [vmem:[%s10082_s12 + $0x48] sm:$0xff]  ;;  %v8281_v30 = vld [vmem:[%s10082_s12 + $0x40] sm:$0xff]  ;;  %v905_v34 = vld [vmem:[%s10076_s4 + $0x10] sm:$0xff] }
  0xdc   : > { %3031 = vmatpush.bf16.msra.mxu1 %v8286_v10  ;;  %v8290_v27 = vld [vmem:[%s10082_s12 + $0x88] sm:$0xff]  ;;  %v8289_v31 = vld [vmem:[%s10082_s12 + $0x80] sm:$0xff]  ;;  %v8320_v36 = vld [vmem:[%s10082_s12 + $0x178] sm:$0xff]  ;;  %v937_v41 = vpack.c.bf16 %v905_v34, %v905_v34 }
  0xdd   : > { %3044 = vmatpush.bf16.msra.mxu2 %v8294_v11  ;;  %v8298_v28 = vld [vmem:[%s10082_s12 + $0xc8] sm:$0xff]  ;;  %v8297_v32 = vld [vmem:[%s10082_s12 + $0xc0] sm:$0xff]  ;;  %v906_v37 = vld [vmem:[%s10076_s4 + $0x18] sm:$0xff] }
  0xde   : > { %3057 = vmatpush.bf16.msra.mxu3 %v8302_v12  ;;  %v903_v35 = vld [vmem:[%s10076_s4] sm:$0xff]  ;;  %v904_v38 = vld [vmem:[%s10076_s4 + $0x8] sm:$0xff]  ;;  %v8328_v39 = vld [vmem:[%s10082_s12 + $0x1b8] sm:$0xff]  ;;  %v938_v43 = vpack.c.bf16 %v906_v37, %v906_v37 }
  0xdf   : > { %3019 = vmatpush.bf16.msra.mxu0 %v8277_v13  ;;  %v8336_v40 = vld [vmem:[%s10082_s12 + $0x1f8] sm:$0xff]  ;;  %v935_v42 = vpack.c.bf16 %v903_v35, %v903_v35  ;;  %v936_v44 = vpack.c.bf16 %v904_v38, %v904_v38  ;;  %v8311_v45 = vld [vmem:[%s10082_s12 + $0x130] sm:$0xff]  ;;  %v8310_v49 = vld [vmem:[%s10082_s12 + $0x128] sm:$0xff]  ;;  %s11251_s5 = smov (!%p7162_p7), %s11250_s19 }
  0xe0   : > { %3032 = vmatpush.bf16.msra.mxu1 %v8285_v14  ;;  %v8319_v46 = vld [vmem:[%s10082_s12 + $0x170] sm:$0xff]  ;;  %v8318_v50 = vld [vmem:[%s10082_s12 + $0x168] sm:$0xff]  ;;  %v8309_v53 = vld [vmem:[%s10082_s12 + $0x120] sm:$0xff] }
  0xe1   : > { %3045 = vmatpush.bf16.msra.mxu2 %v8293_v15  ;;  %v8327_v47 = vld [vmem:[%s10082_s12 + $0x1b0] sm:$0xff]  ;;  %v8326_v51 = vld [vmem:[%s10082_s12 + $0x1a8] sm:$0xff]  ;;  %v8317_v54 = vld [vmem:[%s10082_s12 + $0x160] sm:$0xff] }
  0xe2   : > { %3058 = vmatpush.bf16.msra.mxu3 %v8301_v16  ;;  %v8335_v48 = vld [vmem:[%s10082_s12 + $0x1f0] sm:$0xff]  ;;  %v8334_v52 = vld [vmem:[%s10082_s12 + $0x1e8] sm:$0xff]  ;;  %v8325_v55 = vld [vmem:[%s10082_s12 + $0x1a0] sm:$0xff] }
  0xe3   : > { %3020 = vmatpush.bf16.msra.mxu0 %v8276_v17  ;;  %v8333_v56 = vld [vmem:[%s10082_s12 + $0x1e0] sm:$0xff]  ;;  %v8308_v57 = vld [vmem:[%s10082_s12 + $0x118] sm:$0xff]  ;;  %v8307_v61 = vld [vmem:[%s10082_s12 + $0x110] sm:$0xff] }
  0xe4   : > { %3033 = vmatpush.bf16.msra.mxu1 %v8284_v18  ;;  %v8316_v58 = vld [vmem:[%s10082_s12 + $0x158] sm:$0xff]  ;;  %v8315_v62 = vld [vmem:[%s10082_s12 + $0x150] sm:$0xff]  ;;  %v8306_v1 = vld [vmem:[%s10082_s12 + $0x108] sm:$0xff] }
  0xe5   : > { %3046 = vmatpush.bf16.msra.mxu2 %v8292_v19  ;;  %v8324_v59 = vld [vmem:[%s10082_s12 + $0x198] sm:$0xff]  ;;  %v8323_v63 = vld [vmem:[%s10082_s12 + $0x190] sm:$0xff]  ;;  %v8314_v2 = vld [vmem:[%s10082_s12 + $0x148] sm:$0xff] }
  0xe6   : > { %3059 = vmatpush.bf16.msra.mxu3 %v8300_v20  ;;  %v8332_v60 = vld [vmem:[%s10082_s12 + $0x1d8] sm:$0xff]  ;;  %v8331_v0 = vld [vmem:[%s10082_s12 + $0x1d0] sm:$0xff]  ;;  %v8322_v3 = vld [vmem:[%s10082_s12 + $0x188] sm:$0xff] }
  0xe7   : > { %3021 = vmatpush.bf16.msra.mxu0 %v8275_v21  ;;  %v8330_v4 = vld [vmem:[%s10082_s12 + $0x1c8] sm:$0xff]  ;;  %v8305_v5 = vld [vmem:[%s10082_s12 + $0x100] sm:$0xff]  ;;  %v8344_v9 = vld [vmem:[%s10082_s12 + $0x238] sm:$0xff] }
  0xe8   : > { %3034 = vmatpush.bf16.msra.mxu1 %v8283_v22  ;;  %v8313_v6 = vld [vmem:[%s10082_s12 + $0x140] sm:$0xff]  ;;  %v909_v10 = vld [vmem:[%s10076_s4 + $0x30] sm:$0xff]  ;;  %v8352_v12 = vld [vmem:[%s10082_s12 + $0x278] sm:$0xff] }
  0xe9   : > { %3047 = vmatpush.bf16.msra.mxu2 %v8291_v23  ;;  %v8321_v7 = vld [vmem:[%s10082_s12 + $0x180] sm:$0xff]  ;;  %v910_v13 = vld [vmem:[%s10076_s4 + $0x38] sm:$0xff]  ;;  %v908_v14 = vld [vmem:[%s10076_s4 + $0x28] sm:$0xff]  ;;  %v941_v17 = vpack.c.bf16 %v909_v10, %v909_v10 }
  0xea   : > { %3060 = vmatpush.bf16.msra.mxu3 %v8299_v24  ;;  %v8329_v8 = vld [vmem:[%s10082_s12 + $0x1c0] sm:$0xff]  ;;  %v8360_v15 = vld [vmem:[%s10082_s12 + $0x2b8] sm:$0xff]  ;;  %v942_v19 = vpack.c.bf16 %v910_v13, %v910_v13  ;;  %v940_v20 = vpack.c.bf16 %v908_v14, %v908_v14  ;;  %v8343_v21 = vld [vmem:[%s10082_s12 + $0x230] sm:$0xff] }
  0xeb   : > { %3022 = vmatpush.bf16.msra.mxu0 %v8274_v25  ;;  %v907_v11 = vld [vmem:[%s10076_s4 + $0x20] sm:$0xff]  ;;  %v8368_v16 = vld [vmem:[%s10082_s12 + $0x2f8] sm:$0xff]  ;;  %v8351_v22 = vld [vmem:[%s10082_s12 + $0x270] sm:$0xff] }
  0xec   : > { %3035 = vmatpush.bf16.msra.mxu1 %v8282_v26  ;;  %v939_v18 = vpack.c.bf16 %v907_v11, %v907_v11  ;;  %v8359_v23 = vld [vmem:[%s10082_s12 + $0x2b0] sm:$0xff]  ;;  %v8342_v25 = vld [vmem:[%s10082_s12 + $0x228] sm:$0xff]  ;;  %v8348_v34 = vld [vmem:[%s10082_s12 + $0x258] sm:$0xff] }
  0xed   : > { %3048 = vmatpush.bf16.msra.mxu2 %v8290_v27  ;;  %v8367_v24 = vld [vmem:[%s10082_s12 + $0x2f0] sm:$0xff]  ;;  %v8350_v26 = vld [vmem:[%s10082_s12 + $0x268] sm:$0xff]  ;;  %v8356_v35 = vld [vmem:[%s10082_s12 + $0x298] sm:$0xff] }
  0xee   : > { %3061 = vmatpush.bf16.msra.mxu3 %v8298_v28  ;;  %v8358_v27 = vld [vmem:[%s10082_s12 + $0x2a8] sm:$0xff]  ;;  %v8339_v37 = vld [vmem:[%s10082_s12 + $0x210] sm:$0xff]  ;;  %v8380_v10 = vld [vmem:[%s10082_s12 + $0x358] sm:$0xff] }
  0xef   : > { %3023 = vmatpush.bf16.msra.mxu0 %v8273_v29  ;;  %v8366_v28 = vld [vmem:[%s10082_s12 + $0x2e8] sm:$0xff]  ;;  %v8341_v29 = vld [vmem:[%s10082_s12 + $0x220] sm:$0xff]  ;;  %v8347_v38 = vld [vmem:[%s10082_s12 + $0x250] sm:$0xff] }
  0xf0   : > { %3036 = vmatpush.bf16.msra.mxu1 %v8281_v30  ;;  %v8349_v30 = vld [vmem:[%s10082_s12 + $0x260] sm:$0xff]  ;;  %v8388_v11 = vld [vmem:[%s10082_s12 + $0x398] sm:$0xff]  ;;  %v8371_v13 = vld [vmem:[%s10082_s12 + $0x310] sm:$0xff] }
  0xf1   : > { %3049 = vmatpush.bf16.msra.mxu2 %v8289_v31  ;;  %v8357_v31 = vld [vmem:[%s10082_s12 + $0x2a0] sm:$0xff]  ;;  %v8379_v14 = vld [vmem:[%s10082_s12 + $0x350] sm:$0xff] }
  0xf2   : > { %3062 = vmatpush.bf16.msra.mxu3 %v8297_v32  ;;  %3024 = vmatmul.bf16.vlgmr.msra.gmra.mxu0 %v935_v42  ;;  %v8365_v32 = vld [vmem:[%s10082_s12 + $0x2e0] sm:$0xff]  ;;  %v8346_v42 = vld [vmem:[%s10082_s12 + $0x248] sm:$0xff] }
  0xf3   : > { %3068 = vmatpush.bf16.msrb.mxu0 %v8312_v33  ;;  %3037 = vmatmul.bf16.vlgmr.msra.gmra.mxu1 %v936_v44  ;;  %v8340_v33 = vld [vmem:[%s10082_s12 + $0x218] sm:$0xff]  ;;  %v8362_v44 = vld [vmem:[%s10082_s12 + $0x2c8] sm:$0xff] }
  0xf4   : > { %3081 = vmatpush.bf16.msrb.mxu1 %v8320_v36  ;;  %3050 = vmatmul.bf16.vlgmr.msra.gmra.mxu2 %v937_v41  ;;  %v8364_v36 = vld [vmem:[%s10082_s12 + $0x2d8] sm:$0xff]  ;;  %v8338_v41 = vld [vmem:[%s10082_s12 + $0x208] sm:$0xff] }
  0xf5   : > { %3094 = vmatpush.bf16.msrb.mxu2 %v8328_v39  ;;  %3063 = vmatmul.bf16.vlgmr.msra.gmra.mxu3 %v938_v43  ;;  %v8355_v39 = vld [vmem:[%s10082_s12 + $0x290] sm:$0xff]  ;;  %v8354_v43 = vld [vmem:[%s10082_s12 + $0x288] sm:$0xff] }
  0xf6   : > { %3107 = vmatpush.bf16.msrb.mxu3 %v8336_v40  ;;  %v8363_v40 = vld [vmem:[%s10082_s12 + $0x2d0] sm:$0xff] }
  0xf7   : > { %3069 = vmatpush.bf16.msrb.mxu0 %v8311_v45  ;;  %v8337_v45 = vld [vmem:[%s10082_s12 + $0x200] sm:$0xff] }
  0xf8   : > { %3082 = vmatpush.bf16.msrb.mxu1 %v8319_v46  ;;  %v8345_v46 = vld [vmem:[%s10082_s12 + $0x240] sm:$0xff] }
  0xf9   : > { %3095 = vmatpush.bf16.msrb.mxu2 %v8327_v47  ;;  %v8353_v47 = vld [vmem:[%s10082_s12 + $0x280] sm:$0xff] }
  0xfa   : > { %3108 = vmatpush.bf16.msrb.mxu3 %v8335_v48  ;;  %v8361_v48 = vld [vmem:[%s10082_s12 + $0x2c0] sm:$0xff] }
  0xfb   : > { %3070 = vmatpush.bf16.msrb.mxu0 %v8310_v49  ;;  %v8376_v49 = vld [vmem:[%s10082_s12 + $0x338] sm:$0xff] }
  0xfc   : > { %3083 = vmatpush.bf16.msrb.mxu1 %v8318_v50  ;;  %v911_v50 = vld [vmem:[%s10076_s4 + $0x40] sm:$0xff] }
  0xfd   : > { %3096 = vmatpush.bf16.msrb.mxu2 %v8326_v51  ;;  %v913_v51 = vld [vmem:[%s10076_s4 + $0x50] sm:$0xff] }
  0xfe   : > { %3109 = vmatpush.bf16.msrb.mxu3 %v8334_v52  ;;  %v8384_v52 = vld [vmem:[%s10082_s12 + $0x378] sm:$0xff] }
  0xff   : > { %3071 = vmatpush.bf16.msrb.mxu0 %v8309_v53  ;;  %v912_v53 = vld [vmem:[%s10076_s4 + $0x48] sm:$0xff] }
 0x100   : > { %3084 = vmatpush.bf16.msrb.mxu1 %v8317_v54  ;;  %v914_v54 = vld [vmem:[%s10076_s4 + $0x58] sm:$0xff] }
 0x101   : > { %3097 = vmatpush.bf16.msrb.mxu2 %v8325_v55  ;;  %v8392_v55 = vld [vmem:[%s10082_s12 + $0x3b8] sm:$0xff] }
 0x102   : > { %3110 = vmatpush.bf16.msrb.mxu3 %v8333_v56  ;;  %v8400_v56 = vld [vmem:[%s10082_s12 + $0x3f8] sm:$0xff] }
 0x103   : > { %3072 = vmatpush.bf16.msrb.mxu0 %v8308_v57  ;;  %v943_v57 = vpack.c.bf16 %v911_v50, %v911_v50  ;;  %v8412_v50 = vld [vmem:[%s10082_s12 + $0x458] sm:$0xff] }
 0x104   : > { %3085 = vmatpush.bf16.msrb.mxu1 %v8316_v58  ;;  %v945_v58 = vpack.c.bf16 %v913_v51, %v913_v51  ;;  %v8420_v51 = vld [vmem:[%s10082_s12 + $0x498] sm:$0xff] }
 0x105   : > { %3098 = vmatpush.bf16.msrb.mxu2 %v8324_v59  ;;  %v944_v59 = vpack.c.bf16 %v912_v53, %v912_v53  ;;  %v8403_v53 = vld [vmem:[%s10082_s12 + $0x410] sm:$0xff] }
 0x106   : > { %3111 = vmatpush.bf16.msrb.mxu3 %v8332_v60  ;;  %v946_v60 = vpack.c.bf16 %v914_v54, %v914_v54  ;;  %v8411_v54 = vld [vmem:[%s10082_s12 + $0x450] sm:$0xff] }
 0x107   : > { %3073 = vmatpush.bf16.msrb.mxu0 %v8307_v61  ;;  %v8375_v61 = vld [vmem:[%s10082_s12 + $0x330] sm:$0xff] }
 0x108   : > { %3086 = vmatpush.bf16.msrb.mxu1 %v8315_v62  ;;  %v8383_v62 = vld [vmem:[%s10082_s12 + $0x370] sm:$0xff] }
 0x109   : > { %3099 = vmatpush.bf16.msrb.mxu2 %v8323_v63  ;;  %v8391_v63 = vld [vmem:[%s10082_s12 + $0x3b0] sm:$0xff] }
 0x10a   : > { %3112 = vmatpush.bf16.msrb.mxu3 %v8331_v0  ;;  %v8399_v0 = vld [vmem:[%s10082_s12 + $0x3f0] sm:$0xff] }
 0x10b   : > { %3074 = vmatpush.bf16.msrb.mxu0 %v8306_v1  ;;  %v8374_v1 = vld [vmem:[%s10082_s12 + $0x328] sm:$0xff] }
 0x10c   : > { %3087 = vmatpush.bf16.msrb.mxu1 %v8314_v2  ;;  %v8382_v2 = vld [vmem:[%s10082_s12 + $0x368] sm:$0xff] }
 0x10d   : > { %3100 = vmatpush.bf16.msrb.mxu2 %v8322_v3  ;;  %v8390_v3 = vld [vmem:[%s10082_s12 + $0x3a8] sm:$0xff] }
 0x10e   : > { %3113 = vmatpush.bf16.msrb.mxu3 %v8330_v4  ;;  %v8398_v4 = vld [vmem:[%s10082_s12 + $0x3e8] sm:$0xff] }
 0x10f   : > { %3075 = vmatpush.bf16.msrb.mxu0 %v8305_v5  ;;  %v8373_v5 = vld [vmem:[%s10082_s12 + $0x320] sm:$0xff] }
 0x110   : > { %3088 = vmatpush.bf16.msrb.mxu1 %v8313_v6  ;;  %v8381_v6 = vld [vmem:[%s10082_s12 + $0x360] sm:$0xff] }
 0x111   : > { %3101 = vmatpush.bf16.msrb.mxu2 %v8321_v7  ;;  %v8389_v7 = vld [vmem:[%s10082_s12 + $0x3a0] sm:$0xff] }
 0x112   : > { %3114 = vmatpush.bf16.msrb.mxu3 %v8329_v8  ;;  %3076 = vmatmul.bf16.vlgmr.msrb.gmra.mxu0 %v939_v18  ;;  %v8397_v8 = vld [vmem:[%s10082_s12 + $0x3e0] sm:$0xff]  ;;  %v8378_v18 = vld [vmem:[%s10082_s12 + $0x348] sm:$0xff] }
 0x113   : > { %3120 = vmatpush.bf16.msra.mxu0 %v8344_v9  ;;  %3089 = vmatmul.bf16.vlgmr.msrb.gmra.mxu1 %v940_v20  ;;  %v8372_v9 = vld [vmem:[%s10082_s12 + $0x318] sm:$0xff]  ;;  %v8394_v20 = vld [vmem:[%s10082_s12 + $0x3c8] sm:$0xff] }
 0x114   : > { %3133 = vmatpush.bf16.msra.mxu1 %v8352_v12  ;;  %3102 = vmatmul.bf16.vlgmr.msrb.gmra.mxu2 %v941_v17  ;;  %v8396_v12 = vld [vmem:[%s10082_s12 + $0x3d8] sm:$0xff]  ;;  %v8370_v17 = vld [vmem:[%s10082_s12 + $0x308] sm:$0xff] }
 0x115   : > { %3146 = vmatpush.bf16.msra.mxu2 %v8360_v15  ;;  %3115 = vmatmul.bf16.vlgmr.msrb.gmra.mxu3 %v942_v19  ;;  %v8387_v15 = vld [vmem:[%s10082_s12 + $0x390] sm:$0xff]  ;;  %v8386_v19 = vld [vmem:[%s10082_s12 + $0x388] sm:$0xff] }
 0x116   : > { %3159 = vmatpush.bf16.msra.mxu3 %v8368_v16  ;;  %v8395_v16 = vld [vmem:[%s10082_s12 + $0x3d0] sm:$0xff] }
 0x117   : > { %3121 = vmatpush.bf16.msra.mxu0 %v8343_v21  ;;  %v8369_v21 = vld [vmem:[%s10082_s12 + $0x300] sm:$0xff] }
 0x118   : > { %3134 = vmatpush.bf16.msra.mxu1 %v8351_v22  ;;  %v8377_v22 = vld [vmem:[%s10082_s12 + $0x340] sm:$0xff] }
 0x119   : > { %3147 = vmatpush.bf16.msra.mxu2 %v8359_v23  ;;  %v8385_v23 = vld [vmem:[%s10082_s12 + $0x380] sm:$0xff] }
 0x11a   : > { %3160 = vmatpush.bf16.msra.mxu3 %v8367_v24  ;;  %v8393_v24 = vld [vmem:[%s10082_s12 + $0x3c0] sm:$0xff] }
 0x11b   : > { %3122 = vmatpush.bf16.msra.mxu0 %v8342_v25  ;;  %v8408_v25 = vld [vmem:[%s10082_s12 + $0x438] sm:$0xff] }
 0x11c   : > { %3135 = vmatpush.bf16.msra.mxu1 %v8350_v26  ;;  %v915_v26 = vld [vmem:[%s10076_s4 + $0x60] sm:$0xff] }
 0x11d   : > { %3148 = vmatpush.bf16.msra.mxu2 %v8358_v27  ;;  %v917_v27 = vld [vmem:[%s10076_s4 + $0x70] sm:$0xff] }
 0x11e   : > { %3161 = vmatpush.bf16.msra.mxu3 %v8366_v28  ;;  %v8416_v28 = vld [vmem:[%s10082_s12 + $0x478] sm:$0xff] }
 0x11f   : > { %3123 = vmatpush.bf16.msra.mxu0 %v8341_v29  ;;  %v916_v29 = vld [vmem:[%s10076_s4 + $0x68] sm:$0xff] }
 0x120   : > { %3136 = vmatpush.bf16.msra.mxu1 %v8349_v30  ;;  %v918_v30 = vld [vmem:[%s10076_s4 + $0x78] sm:$0xff] }
 0x121   : > { %3149 = vmatpush.bf16.msra.mxu2 %v8357_v31  ;;  %v8424_v31 = vld [vmem:[%s10082_s12 + $0x4b8] sm:$0xff] }
 0x122   : > { %3162 = vmatpush.bf16.msra.mxu3 %v8365_v32  ;;  %v8432_v32 = vld [vmem:[%s10082_s12 + $0x4f8] sm:$0xff] }
 0x123   : > { %3124 = vmatpush.bf16.msra.mxu0 %v8340_v33  ;;  %v947_v33 = vpack.c.bf16 %v915_v26, %v915_v26  ;;  %v8461_v26 = vld [vmem:[%s10082_s12 + $0x5e0] sm:$0xff] }
 0x124   : > { %3137 = vmatpush.bf16.msra.mxu1 %v8348_v34  ;;  %v949_v34 = vpack.c.bf16 %v917_v27, %v917_v27 }
 0x125   : > { %3150 = vmatpush.bf16.msra.mxu2 %v8356_v35  ;;  %v948_v35 = vpack.c.bf16 %v916_v29, %v916_v29  ;;  %v8444_v29 = vld [vmem:[%s10082_s12 + $0x558] sm:$0xff] }
 0x126   : > { %3163 = vmatpush.bf16.msra.mxu3 %v8364_v36  ;;  %v950_v36 = vpack.c.bf16 %v918_v30, %v918_v30  ;;  %v8452_v30 = vld [vmem:[%s10082_s12 + $0x598] sm:$0xff] }
 0x127   : > { %3125 = vmatpush.bf16.msra.mxu0 %v8339_v37  ;;  %v8407_v37 = vld [vmem:[%s10082_s12 + $0x430] sm:$0xff] }
 0x128   : > { %3138 = vmatpush.bf16.msra.mxu1 %v8347_v38  ;;  %v8415_v38 = vld [vmem:[%s10082_s12 + $0x470] sm:$0xff] }
 0x129   : > { %3151 = vmatpush.bf16.msra.mxu2 %v8355_v39  ;;  %v8423_v39 = vld [vmem:[%s10082_s12 + $0x4b0] sm:$0xff] }
 0x12a   : > { %3164 = vmatpush.bf16.msra.mxu3 %v8363_v40  ;;  %v8431_v40 = vld [vmem:[%s10082_s12 + $0x4f0] sm:$0xff] }
 0x12b   : > { %3126 = vmatpush.bf16.msra.mxu0 %v8338_v41  ;;  %v8406_v41 = vld [vmem:[%s10082_s12 + $0x428] sm:$0xff] }
 0x12c   : > { %3139 = vmatpush.bf16.msra.mxu1 %v8346_v42  ;;  %v8414_v42 = vld [vmem:[%s10082_s12 + $0x468] sm:$0xff] }
 0x12d   : > { %3152 = vmatpush.bf16.msra.mxu2 %v8354_v43  ;;  %v8422_v43 = vld [vmem:[%s10082_s12 + $0x4a8] sm:$0xff] }
 0x12e   : > { %3165 = vmatpush.bf16.msra.mxu3 %v8362_v44  ;;  %v8430_v44 = vld [vmem:[%s10082_s12 + $0x4e8] sm:$0xff] }
 0x12f   : > { %3127 = vmatpush.bf16.msra.mxu0 %v8337_v45  ;;  %v8405_v45 = vld [vmem:[%s10082_s12 + $0x420] sm:$0xff] }
 0x130   : > { %3140 = vmatpush.bf16.msra.mxu1 %v8345_v46  ;;  %v8413_v46 = vld [vmem:[%s10082_s12 + $0x460] sm:$0xff] }
 0x131   : > { %3153 = vmatpush.bf16.msra.mxu2 %v8353_v47  ;;  %v8421_v47 = vld [vmem:[%s10082_s12 + $0x4a0] sm:$0xff] }
 0x132   : > { %3166 = vmatpush.bf16.msra.mxu3 %v8361_v48  ;;  %3128 = vmatmul.bf16.vlgmr.msra.gmra.mxu0 %v943_v57  ;;  %v8429_v48 = vld [vmem:[%s10082_s12 + $0x4e0] sm:$0xff]  ;;  %v8402_v57 = vld [vmem:[%s10082_s12 + $0x408] sm:$0xff] }
 0x133   : > { %3172 = vmatpush.bf16.msrb.mxu0 %v8376_v49  ;;  %3141 = vmatmul.bf16.vlgmr.msra.gmra.mxu1 %v944_v59  ;;  %v8404_v49 = vld [vmem:[%s10082_s12 + $0x418] sm:$0xff]  ;;  %v8418_v59 = vld [vmem:[%s10082_s12 + $0x488] sm:$0xff] }
 0x134   : > { %3185 = vmatpush.bf16.msrb.mxu1 %v8384_v52  ;;  %3154 = vmatmul.bf16.vlgmr.msra.gmra.mxu2 %v945_v58  ;;  %v8428_v52 = vld [vmem:[%s10082_s12 + $0x4d8] sm:$0xff]  ;;  %v8410_v58 = vld [vmem:[%s10082_s12 + $0x448] sm:$0xff] }
 0x135   : > { %3198 = vmatpush.bf16.msrb.mxu2 %v8392_v55  ;;  %3167 = vmatmul.bf16.vlgmr.msra.gmra.mxu3 %v946_v60  ;;  %v8419_v55 = vld [vmem:[%s10082_s12 + $0x490] sm:$0xff]  ;;  %v8426_v60 = vld [vmem:[%s10082_s12 + $0x4c8] sm:$0xff] }
 0x136   : > { %3211 = vmatpush.bf16.msrb.mxu3 %v8400_v56  ;;  %v8427_v56 = vld [vmem:[%s10082_s12 + $0x4d0] sm:$0xff] }
 0x137   : > { %3173 = vmatpush.bf16.msrb.mxu0 %v8375_v61  ;;  %v8401_v61 = vld [vmem:[%s10082_s12 + $0x400] sm:$0xff] }
 0x138   : > { %3186 = vmatpush.bf16.msrb.mxu1 %v8383_v62  ;;  %v8409_v62 = vld [vmem:[%s10082_s12 + $0x440] sm:$0xff] }
 0x139   : > { %3199 = vmatpush.bf16.msrb.mxu2 %v8391_v63  ;;  %v8417_v63 = vld [vmem:[%s10082_s12 + $0x480] sm:$0xff] }
 0x13a   : > { %3212 = vmatpush.bf16.msrb.mxu3 %v8399_v0  ;;  %v8425_v0 = vld [vmem:[%s10082_s12 + $0x4c0] sm:$0xff] }
 0x13b   : > { %3174 = vmatpush.bf16.msrb.mxu0 %v8374_v1  ;;  %v8440_v1 = vld [vmem:[%s10082_s12 + $0x538] sm:$0xff] }
 0x13c   : > { %3187 = vmatpush.bf16.msrb.mxu1 %v8382_v2  ;;  %v919_v2 = vld [vmem:[%s10076_s4 + $0x80] sm:$0xff] }
 0x13d   : > { %3200 = vmatpush.bf16.msrb.mxu2 %v8390_v3  ;;  %v921_v3 = vld [vmem:[%s10076_s4 + $0x90] sm:$0xff] }
 0x13e   : > { %3213 = vmatpush.bf16.msrb.mxu3 %v8398_v4  ;;  %v8448_v4 = vld [vmem:[%s10082_s12 + $0x578] sm:$0xff] }
 0x13f   : > { %3175 = vmatpush.bf16.msrb.mxu0 %v8373_v5  ;;  %v920_v5 = vld [vmem:[%s10076_s4 + $0x88] sm:$0xff] }
 0x140   : > { %3188 = vmatpush.bf16.msrb.mxu1 %v8381_v6  ;;  %v922_v6 = vld [vmem:[%s10076_s4 + $0x98] sm:$0xff] }
 0x141   : > { %3201 = vmatpush.bf16.msrb.mxu2 %v8389_v7  ;;  %v8456_v7 = vld [vmem:[%s10082_s12 + $0x5b8] sm:$0xff] }
 0x142   : > { %3214 = vmatpush.bf16.msrb.mxu3 %v8397_v8  ;;  %v8464_v8 = vld [vmem:[%s10082_s12 + $0x5f8] sm:$0xff] }
 0x143   : > { %3176 = vmatpush.bf16.msrb.mxu0 %v8372_v9  ;;  %v951_v9 = vpack.c.bf16 %v919_v2, %v919_v2  ;;  %v8487_v2 = vld [vmem:[%s10082_s12 + $0x6b0] sm:$0xff] }
 0x144   : > { %3189 = vmatpush.bf16.msrb.mxu1 %v8380_v10  ;;  %v953_v10 = vpack.c.bf16 %v921_v3, %v921_v3  ;;  %v8495_v3 = vld [vmem:[%s10082_s12 + $0x6f0] sm:$0xff] }
 0x145   : > { %3202 = vmatpush.bf16.msrb.mxu2 %v8388_v11  ;;  %v952_v11 = vpack.c.bf16 %v920_v5, %v920_v5  ;;  %v8478_v5 = vld [vmem:[%s10082_s12 + $0x668] sm:$0xff] }
 0x146   : > { %3215 = vmatpush.bf16.msrb.mxu3 %v8396_v12  ;;  %v954_v12 = vpack.c.bf16 %v922_v6, %v922_v6  ;;  %v8486_v6 = vld [vmem:[%s10082_s12 + $0x6a8] sm:$0xff] }
 0x147   : > { %3177 = vmatpush.bf16.msrb.mxu0 %v8371_v13  ;;  %v8439_v13 = vld [vmem:[%s10082_s12 + $0x530] sm:$0xff] }
 0x148   : > { %3190 = vmatpush.bf16.msrb.mxu1 %v8379_v14  ;;  %v8447_v14 = vld [vmem:[%s10082_s12 + $0x570] sm:$0xff] }
 0x149   : > { %3203 = vmatpush.bf16.msrb.mxu2 %v8387_v15  ;;  %v8455_v15 = vld [vmem:[%s10082_s12 + $0x5b0] sm:$0xff] }
 0x14a   : > { %3216 = vmatpush.bf16.msrb.mxu3 %v8395_v16  ;;  %v8463_v16 = vld [vmem:[%s10082_s12 + $0x5f0] sm:$0xff] }
 0x14b   : > { %3178 = vmatpush.bf16.msrb.mxu0 %v8370_v17  ;;  %v8438_v17 = vld [vmem:[%s10082_s12 + $0x528] sm:$0xff] }
 0x14c   : > { %3191 = vmatpush.bf16.msrb.mxu1 %v8378_v18  ;;  %v8446_v18 = vld [vmem:[%s10082_s12 + $0x568] sm:$0xff] }
 0x14d   : > { %3204 = vmatpush.bf16.msrb.mxu2 %v8386_v19  ;;  %v8454_v19 = vld [vmem:[%s10082_s12 + $0x5a8] sm:$0xff] }
 0x14e   : > { %3217 = vmatpush.bf16.msrb.mxu3 %v8394_v20  ;;  %v8462_v20 = vld [vmem:[%s10082_s12 + $0x5e8] sm:$0xff] }
 0x14f   : > { %3179 = vmatpush.bf16.msrb.mxu0 %v8369_v21 }
 0x150   : > { %3192 = vmatpush.bf16.msrb.mxu1 %v8377_v22  ;;  %v8437_v22 = vld [vmem:[%s10082_s12 + $0x520] sm:$0xff] }
 0x151   : > { %3205 = vmatpush.bf16.msrb.mxu2 %v8385_v23  ;;  %v8445_v23 = vld [vmem:[%s10082_s12 + $0x560] sm:$0xff] }
 0x152   : > { %3218 = vmatpush.bf16.msrb.mxu3 %v8393_v24  ;;  %3180 = vmatmul.bf16.vlgmr.msrb.gmra.mxu0 %v947_v33 }
 0x153   : > { %3224 = vmatpush.bf16.msra.mxu0 %v8408_v25  ;;  %3193 = vmatmul.bf16.vlgmr.msrb.gmra.mxu1 %v948_v35  ;;  %v8453_v25 = vld [vmem:[%s10082_s12 + $0x5a0] sm:$0xff] }
 0x154   : > { %3237 = vmatpush.bf16.msra.mxu1 %v8416_v28  ;;  %3206 = vmatmul.bf16.vlgmr.msrb.gmra.mxu2 %v949_v34  ;;  %v8436_v28 = vld [vmem:[%s10082_s12 + $0x518] sm:$0xff] }
 0x155   : > { %3250 = vmatpush.bf16.msra.mxu2 %v8424_v31  ;;  %3219 = vmatmul.bf16.vlgmr.msrb.gmra.mxu3 %v950_v36  ;;  %v8460_v31 = vld [vmem:[%s10082_s12 + $0x5d8] sm:$0xff]  ;;  %v8435_v36 = vld [vmem:[%s10082_s12 + $0x510] sm:$0xff] }
 0x156   : > { %3263 = vmatpush.bf16.msra.mxu3 %v8432_v32 }
 0x157   : > { %3225 = vmatpush.bf16.msra.mxu0 %v8407_v37  ;;  %v8443_v37 = vld [vmem:[%s10082_s12 + $0x550] sm:$0xff] }
 0x158   : > { %3238 = vmatpush.bf16.msra.mxu1 %v8415_v38 }
 0x159   : > { %3251 = vmatpush.bf16.msra.mxu2 %v8423_v39 }
 0x15a   : > { %3264 = vmatpush.bf16.msra.mxu3 %v8431_v40  ;;  %v8451_v40 = vld [vmem:[%s10082_s12 + $0x590] sm:$0xff] }
 0x15b   : > { %3226 = vmatpush.bf16.msra.mxu0 %v8406_v41  ;;  %v8459_v41 = vld [vmem:[%s10082_s12 + $0x5d0] sm:$0xff] }
 0x15c   : > { %3239 = vmatpush.bf16.msra.mxu1 %v8414_v42  ;;  %v8434_v42 = vld [vmem:[%s10082_s12 + $0x508] sm:$0xff] }
 0x15d   : > { %3252 = vmatpush.bf16.msra.mxu2 %v8422_v43  ;;  %v8442_v43 = vld [vmem:[%s10082_s12 + $0x548] sm:$0xff] }
 0x15e   : > { %3265 = vmatpush.bf16.msra.mxu3 %v8430_v44  ;;  %v8450_v44 = vld [vmem:[%s10082_s12 + $0x588] sm:$0xff] }
 0x15f   : > { %3227 = vmatpush.bf16.msra.mxu0 %v8405_v45  ;;  %v8458_v45 = vld [vmem:[%s10082_s12 + $0x5c8] sm:$0xff] }
 0x160   : > { %3240 = vmatpush.bf16.msra.mxu1 %v8413_v46 }
 0x161   : > { %3253 = vmatpush.bf16.msra.mxu2 %v8421_v47 }
 0x162   : > { %3266 = vmatpush.bf16.msra.mxu3 %v8429_v48  ;;  %v8433_v48 = vld [vmem:[%s10082_s12 + $0x500] sm:$0xff] }
 0x163   : > { %3228 = vmatpush.bf16.msra.mxu0 %v8404_v49  ;;  %v8441_v49 = vld [vmem:[%s10082_s12 + $0x540] sm:$0xff] }
 0x164   : > { %3241 = vmatpush.bf16.msra.mxu1 %v8412_v50  ;;  %v8449_v50 = vld [vmem:[%s10082_s12 + $0x580] sm:$0xff] }
 0x165   : > { %3254 = vmatpush.bf16.msra.mxu2 %v8420_v51  ;;  %v8457_v51 = vld [vmem:[%s10082_s12 + $0x5c0] sm:$0xff] }
 0x166   : > { %3267 = vmatpush.bf16.msra.mxu3 %v8428_v52  ;;  %v8472_v52 = vld [vmem:[%s10082_s12 + $0x638] sm:$0xff] }
 0x167   : > { %3229 = vmatpush.bf16.msra.mxu0 %v8403_v53  ;;  %v923_v53 = vld [vmem:[%s10076_s4 + $0xa0] sm:$0xff] }
 0x168   : > { %3242 = vmatpush.bf16.msra.mxu1 %v8411_v54  ;;  %v925_v54 = vld [vmem:[%s10076_s4 + $0xb0] sm:$0xff] }
 0x169   : > { %3255 = vmatpush.bf16.msra.mxu2 %v8419_v55  ;;  %v8480_v55 = vld [vmem:[%s10082_s12 + $0x678] sm:$0xff] }
 0x16a   : > { %3268 = vmatpush.bf16.msra.mxu3 %v8427_v56  ;;  %v924_v56 = vld [vmem:[%s10076_s4 + $0xa8] sm:$0xff] }
 0x16b   : > { %3230 = vmatpush.bf16.msra.mxu0 %v8402_v57  ;;  %v926_v57 = vld [vmem:[%s10076_s4 + $0xb8] sm:$0xff] }
 0x16c   : > { %3243 = vmatpush.bf16.msra.mxu1 %v8410_v58  ;;  %v8488_v58 = vld [vmem:[%s10082_s12 + $0x6b8] sm:$0xff] }
 0x16d   : > { %3256 = vmatpush.bf16.msra.mxu2 %v8418_v59  ;;  %v8496_v59 = vld [vmem:[%s10082_s12 + $0x6f8] sm:$0xff] }
 0x16e   : > { %3269 = vmatpush.bf16.msra.mxu3 %v8426_v60  ;;  %v955_v60 = vpack.c.bf16 %v923_v53, %v923_v53  ;;  %v8511_v53 = vld [vmem:[%s10082_s12 + $0x770] sm:$0xff] }
 0x16f   : > { %3231 = vmatpush.bf16.msra.mxu0 %v8401_v61  ;;  %v3025_v21 = vpop.f32.mrf.mxu0  ;;  %v957_v61 = vpack.c.bf16 %v925_v54, %v925_v54  ;;  %v8519_v54 = vld [vmem:[%s10082_s12 + $0x7b0] sm:$0xff] }
 0x170   : > { %3244 = vmatpush.bf16.msra.mxu1 %v8409_v62  ;;  %v3038_v24 = vpop.f32.mrf.mxu1  ;;  %v956_v62 = vpack.c.bf16 %v924_v56, %v924_v56  ;;  %v8502_v56 = vld [vmem:[%s10082_s12 + $0x728] sm:$0xff] }
 0x171   : > { %3257 = vmatpush.bf16.msra.mxu2 %v8417_v63  ;;  %v3039_v27 = vadd.f32 %v3038_v24, %v3025_v21  ;;  %v958_v63 = vpack.c.bf16 %v926_v57, %v926_v57  ;;  %v8467_v24 = vld [vmem:[%s10082_s12 + $0x610] sm:$0xff]  ;;  %v8510_v57 = vld [vmem:[%s10082_s12 + $0x768] sm:$0xff] }
 0x172   : > { %3270 = vmatpush.bf16.msra.mxu3 %v8425_v0  ;;  %3232 = vmatmul.bf16.vlgmr.msra.gmra.mxu0 %v951_v9  ;;  %v8471_v0 = vld [vmem:[%s10082_s12 + $0x630] sm:$0xff]  ;;  %v8469_v9 = vld [vmem:[%s10082_s12 + $0x620] sm:$0xff] }
 0x173   : > { %3276 = vmatpush.bf16.msrb.mxu0 %v8440_v1  ;;  %3245 = vmatmul.bf16.vlgmr.msra.gmra.mxu1 %v952_v11  ;;  %v8479_v1 = vld [vmem:[%s10082_s12 + $0x670] sm:$0xff] }
 0x174   : > { %3289 = vmatpush.bf16.msrb.mxu1 %v8448_v4  ;;  %3258 = vmatmul.bf16.vlgmr.msra.gmra.mxu2 %v953_v10  ;;  %v8470_v4 = vld [vmem:[%s10082_s12 + $0x628] sm:$0xff]  ;;  %v8477_v10 = vld [vmem:[%s10082_s12 + $0x660] sm:$0xff] }
 0x175   : > { %3302 = vmatpush.bf16.msrb.mxu2 %v8456_v7  ;;  %3271 = vmatmul.bf16.vlgmr.msra.gmra.mxu3 %v954_v12  ;;  %v8494_v7 = vld [vmem:[%s10082_s12 + $0x6e8] sm:$0xff] }
 0x176   : > { %3315 = vmatpush.bf16.msrb.mxu3 %v8464_v8 }
 0x177   : > { %3277 = vmatpush.bf16.msrb.mxu0 %v8439_v13  ;;  %v3051_v32 = vpop.f32.mrf.mxu2  ;;  %v3027_v35 = vpop.f32.mrf.mxu0  ;;  %v8485_v13 = vld [vmem:[%s10082_s12 + $0x6a0] sm:$0xff] }
 0x178   : > { %3290 = vmatpush.bf16.msrb.mxu1 %v8447_v14  ;;  %v3052_v33 = vadd.f32 %v3051_v32, %v3039_v27  ;;  %v3064_v34 = vpop.f32.mrf.mxu3  ;;  %v3040_v39 = vpop.f32.mrf.mxu1  ;;  %v8493_v14 = vld [vmem:[%s10082_s12 + $0x6e0] sm:$0xff]  ;;  %v8482_v32 = vld [vmem:[%s10082_s12 + $0x688] sm:$0xff] }
 0x179   : > { %3303 = vmatpush.bf16.msrb.mxu2 %v8455_v15  ;;  %v8489_v39 = vld [vmem:[%s10082_s12 + $0x6c0] sm:$0xff] }
 0x17a   : > { %3316 = vmatpush.bf16.msrb.mxu3 %v8463_v16  ;;  %v10336_v38 = vadd.f32 %v3064_v34, %v3052_v33  ;;  %v8468_v16 = vld [vmem:[%s10082_s12 + $0x618] sm:$0xff]  ;;  %v8490_v33 = vld [vmem:[%s10082_s12 + $0x6c8] sm:$0xff] }
 0x17b   : > { %3278 = vmatpush.bf16.msrb.mxu0 %v8438_v17  ;;  %v8476_v17 = vld [vmem:[%s10082_s12 + $0x658] sm:$0xff] }
 0x17c   : > { %3291 = vmatpush.bf16.msrb.mxu1 %v8446_v18  ;;  %v8484_v18 = vld [vmem:[%s10082_s12 + $0x698] sm:$0xff] }
 0x17d   : > { %3304 = vmatpush.bf16.msrb.mxu2 %v8454_v19  ;;  %v8492_v19 = vld [vmem:[%s10082_s12 + $0x6d8] sm:$0xff] }
 0x17e   : > { %3317 = vmatpush.bf16.msrb.mxu3 %v8462_v20 }
 0x17f   : > { %3279 = vmatpush.bf16.msrb.mxu0 %v8437_v22  ;;  %v3053_v46 = vpop.f32.mrf.mxu2 }
 0x180   : > { %3292 = vmatpush.bf16.msrb.mxu1 %v8445_v23  ;;  %v3066_v47 = vpop.f32.mrf.mxu3  ;;  %v8520_v46 = vld [vmem:[%s10082_s12 + $0x7b8] sm:$0xff] }
 0x181   : > { %3305 = vmatpush.bf16.msrb.mxu2 %v8453_v25  ;;  %v8475_v25 = vld [vmem:[%s10082_s12 + $0x650] sm:$0xff]  ;;  %v8528_v47 = vld [vmem:[%s10082_s12 + $0x7f8] sm:$0xff] }
 0x182   : > { %3318 = vmatpush.bf16.msrb.mxu3 %v8461_v26 }
 0x183   : > { %3280 = vmatpush.bf16.msrb.mxu0 %v8436_v28  ;;  %v8483_v28 = vld [vmem:[%s10082_s12 + $0x690] sm:$0xff] }
 0x184   : > { %3293 = vmatpush.bf16.msrb.mxu1 %v8444_v29  ;;  %v8491_v29 = vld [vmem:[%s10082_s12 + $0x6d0] sm:$0xff] }
 0x185   : > { %3306 = vmatpush.bf16.msrb.mxu2 %v8452_v30  ;;  %v8466_v30 = vld [vmem:[%s10082_s12 + $0x608] sm:$0xff] }
 0x186   : > { %3319 = vmatpush.bf16.msrb.mxu3 %v8460_v31  ;;  %v8474_v31 = vld [vmem:[%s10082_s12 + $0x648] sm:$0xff] }
 0x187   : > { %3281 = vmatpush.bf16.msrb.mxu0 %v8435_v36  ;;  %v8465_v36 = vld [vmem:[%s10082_s12 + $0x600] sm:$0xff] }
 0x188   : > { %3294 = vmatpush.bf16.msrb.mxu1 %v8443_v37  ;;  %v8473_v37 = vld [vmem:[%s10082_s12 + $0x640] sm:$0xff] }
 0x189   : > { %3307 = vmatpush.bf16.msrb.mxu2 %v8451_v40  ;;  %v8504_v40 = vld [vmem:[%s10082_s12 + $0x738] sm:$0xff] }
 0x18a   : > { %3320 = vmatpush.bf16.msrb.mxu3 %v8459_v41  ;;  %v927_v41 = vld [vmem:[%s10076_s4 + $0xc0] sm:$0xff] }
 0x18b   : > { %3282 = vmatpush.bf16.msrb.mxu0 %v8434_v42  ;;  %v929_v42 = vld [vmem:[%s10076_s4 + $0xd0] sm:$0xff] }
 0x18c   : > { %3295 = vmatpush.bf16.msrb.mxu1 %v8442_v43  ;;  %v8512_v43 = vld [vmem:[%s10082_s12 + $0x778] sm:$0xff] }
 0x18d   : > { %3308 = vmatpush.bf16.msrb.mxu2 %v8450_v44  ;;  %v928_v44 = vld [vmem:[%s10076_s4 + $0xc8] sm:$0xff] }
 0x18e   : > { %3321 = vmatpush.bf16.msrb.mxu3 %v8458_v45  ;;  %v930_v45 = vld [vmem:[%s10076_s4 + $0xd8] sm:$0xff] }
 0x18f   : > { %3283 = vmatpush.bf16.msrb.mxu0 %v8433_v48  ;;  %v3077_v8 = vpop.f32.mrf.mxu0  ;;  %v959_v48 = vpack.c.bf16 %v927_v41, %v927_v41 }
 0x190   : > { %3296 = vmatpush.bf16.msrb.mxu1 %v8441_v49  ;;  %v3078_v11 = vadd.f32 %v3077_v8, %v10336_v38  ;;  %v3090_v12 = vpop.f32.mrf.mxu1  ;;  %v8481_v38 = vld [vmem:[%s10082_s12 + $0x680] sm:$0xff]  ;;  %v961_v49 = vpack.c.bf16 %v929_v42, %v929_v42 }
 0x191   : > { %3309 = vmatpush.bf16.msrb.mxu2 %v8449_v50  ;;  %v960_v50 = vpack.c.bf16 %v928_v44, %v928_v44 }
 0x192   : > { %3322 = vmatpush.bf16.msrb.mxu3 %v8457_v51  ;;  %3284 = vmatmul.bf16.vlgmr.msrb.gmra.mxu0 %v955_v60  ;;  %v3091_v15 = vadd.f32 %v3090_v12, %v3078_v11  ;;  %v962_v51 = vpack.c.bf16 %v930_v45, %v930_v45 }
 0x193   : > { %3328 = vmatpush.bf16.msra.mxu0 %v8472_v52  ;;  %3297 = vmatmul.bf16.vlgmr.msrb.gmra.mxu1 %v956_v62  ;;  %v8503_v52 = vld [vmem:[%s10082_s12 + $0x730] sm:$0xff]  ;;  %v8501_v62 = vld [vmem:[%s10082_s12 + $0x720] sm:$0xff] }
 0x194   : > { %3341 = vmatpush.bf16.msra.mxu1 %v8480_v55  ;;  %3310 = vmatmul.bf16.vlgmr.msrb.gmra.mxu2 %v957_v61  ;;  %v8527_v55 = vld [vmem:[%s10082_s12 + $0x7f0] sm:$0xff] }
 0x195   : > { %3354 = vmatpush.bf16.msra.mxu2 %v8488_v58  ;;  %3323 = vmatmul.bf16.vlgmr.msrb.gmra.mxu3 %v958_v63  ;;  %v8518_v58 = vld [vmem:[%s10082_s12 + $0x7a8] sm:$0xff]  ;;  %v8509_v63 = vld [vmem:[%s10082_s12 + $0x760] sm:$0xff] }
 0x196   : > { %3367 = vmatpush.bf16.msra.mxu3 %v8496_v59  ;;  %v8526_v59 = vld [vmem:[%s10082_s12 + $0x7e8] sm:$0xff] }
 0x197   : > { %3329 = vmatpush.bf16.msra.mxu0 %v8471_v0  ;;  %v3103_v20 = vpop.f32.mrf.mxu2  ;;  %v3079_v23 = vpop.f32.mrf.mxu0 }
 0x198   : > { %3342 = vmatpush.bf16.msra.mxu1 %v8479_v1  ;;  %v3104_v21 = vadd.f32 %v3103_v20, %v3091_v15  ;;  %v3116_v22 = vpop.f32.mrf.mxu3  ;;  %v3092_v27 = vpop.f32.mrf.mxu1  ;;  %v8517_v1 = vld [vmem:[%s10082_s12 + $0x7a0] sm:$0xff]  ;;  %v8514_v20 = vld [vmem:[%s10082_s12 + $0x788] sm:$0xff] }
 0x199   : > { %3355 = vmatpush.bf16.msra.mxu2 %v8487_v2  ;;  %v8525_v2 = vld [vmem:[%s10082_s12 + $0x7e0] sm:$0xff] }
 0x19a   : > { %3368 = vmatpush.bf16.msra.mxu3 %v8495_v3  ;;  %v10375_v26 = vadd.f32 %v3116_v22, %v3104_v21  ;;  %v8522_v21 = vld [vmem:[%s10082_s12 + $0x7c8] sm:$0xff]  ;;  %v931_v27 = vld [vmem:[%s10076_s4 + $0xe0] sm:$0xff] }
 0x19b   : > { %3330 = vmatpush.bf16.msra.mxu0 %v8470_v4  ;;  %v8500_v4 = vld [vmem:[%s10082_s12 + $0x718] sm:$0xff] }
 0x19c   : > { %3343 = vmatpush.bf16.msra.mxu1 %v8478_v5  ;;  %v8508_v5 = vld [vmem:[%s10082_s12 + $0x758] sm:$0xff] }
 0x19d   : > { %3356 = vmatpush.bf16.msra.mxu2 %v8486_v6  ;;  %v8516_v6 = vld [vmem:[%s10082_s12 + $0x798] sm:$0xff] }
 0x19e   : > { %3369 = vmatpush.bf16.msra.mxu3 %v8494_v7  ;;  %v8524_v7 = vld [vmem:[%s10082_s12 + $0x7d8] sm:$0xff] }
 0x19f   : > { %3331 = vmatpush.bf16.msra.mxu0 %v8469_v9  ;;  %v3105_v34 = vpop.f32.mrf.mxu2 }
 0x1a0   : > { %3344 = vmatpush.bf16.msra.mxu1 %v8477_v10  ;;  %v3118_v35 = vpop.f32.mrf.mxu3 }
 0x1a1   : > { %3357 = vmatpush.bf16.msra.mxu2 %v8485_v13  ;;  %v8499_v13 = vld [vmem:[%s10082_s12 + $0x710] sm:$0xff] }
 0x1a2   : > { %3370 = vmatpush.bf16.msra.mxu3 %v8493_v14  ;;  %v8507_v14 = vld [vmem:[%s10082_s12 + $0x750] sm:$0xff] }
 0x1a3   : > { %3332 = vmatpush.bf16.msra.mxu0 %v8468_v16  ;;  %v8515_v16 = vld [vmem:[%s10082_s12 + $0x790] sm:$0xff] }
 0x1a4   : > { %3345 = vmatpush.bf16.msra.mxu1 %v8476_v17  ;;  %v8523_v17 = vld [vmem:[%s10082_s12 + $0x7d0] sm:$0xff] }
 0x1a5   : > { %3358 = vmatpush.bf16.msra.mxu2 %v8484_v18  ;;  %v8498_v18 = vld [vmem:[%s10082_s12 + $0x708] sm:$0xff] }
 0x1a6   : > { %3371 = vmatpush.bf16.msra.mxu3 %v8492_v19  ;;  %v8506_v19 = vld [vmem:[%s10082_s12 + $0x748] sm:$0xff] }
 0x1a7   : > { %3333 = vmatpush.bf16.msra.mxu0 %v8467_v24  ;;  %v8497_v24 = vld [vmem:[%s10082_s12 + $0x700] sm:$0xff] }
 0x1a8   : > { %3346 = vmatpush.bf16.msra.mxu1 %v8475_v25  ;;  %v8505_v25 = vld [vmem:[%s10082_s12 + $0x740] sm:$0xff] }
 0x1a9   : > { %3359 = vmatpush.bf16.msra.mxu2 %v8483_v28  ;;  %v932_v28 = vld [vmem:[%s10076_s4 + $0xe8] sm:$0xff] }
 0x1aa   : > { %3372 = vmatpush.bf16.msra.mxu3 %v8491_v29  ;;  %v8521_v29 = vld [vmem:[%s10082_s12 + $0x7c0] sm:$0xff] }
 0x1ab   : > { %3334 = vmatpush.bf16.msra.mxu0 %v8466_v30  ;;  %v933_v30 = vld [vmem:[%s10076_s4 + $0xf0] sm:$0xff] }
 0x1ac   : > { %3347 = vmatpush.bf16.msra.mxu1 %v8474_v31  ;;  %v934_v31 = vld [vmem:[%s10076_s4 + $0xf8] sm:$0xff]  ;;  %v965_v34 = vpack.c.bf16 %v933_v30, %v933_v30  ;;  %s11253_s4 = sld [smem:[#allocation59_spill]] (!%p7162_p7) }
 0x1ad   : > { %3360 = vmatpush.bf16.msra.mxu2 %v8482_v32  ;;  %v963_v32 = vpack.c.bf16 %v931_v27, %v931_v27  ;;  %v966_v35 = vpack.c.bf16 %v934_v31, %v934_v31 }
 0x1ae   : > { %3373 = vmatpush.bf16.msra.mxu3 %v8490_v33  ;;  %v964_v33 = vpack.c.bf16 %v932_v28, %v932_v28 }
 0x1af   : > { %3335 = vmatpush.bf16.msra.mxu0 %v8465_v36  ;;  %v3129_v60 = vpop.f32.mrf.mxu0 }
 0x1b0   : > { %3348 = vmatpush.bf16.msra.mxu1 %v8473_v37  ;;  %v3130_v61 = vadd.f32 %v3129_v60, %v10375_v26  ;;  %v3142_v0 = vpop.f32.mrf.mxu1  ;;  %v8513_v26 = vld [vmem:[%s10082_s12 + $0x780] sm:$0xff] }
 0x1b1   : > { %3361 = vmatpush.bf16.msra.mxu2 %v8481_v38 }
 0x1b2   : > { %3374 = vmatpush.bf16.msra.mxu3 %v8489_v39  ;;  %3336 = vmatmul.bf16.vlgmr.msra.gmra.mxu0 %v959_v48  ;;  %v3143_v3 = vadd.f32 %v3142_v0, %v3130_v61 }
 0x1b3   : > { %3380 = vmatpush.bf16.msrb.mxu0 %v8504_v40  ;;  %3349 = vmatmul.bf16.vlgmr.msra.gmra.mxu1 %v960_v50 }
 0x1b4   : > { %3393 = vmatpush.bf16.msrb.mxu1 %v8512_v43  ;;  %3362 = vmatmul.bf16.vlgmr.msra.gmra.mxu2 %v961_v49 }
 0x1b5   : > { %3406 = vmatpush.bf16.msrb.mxu2 %v8520_v46  ;;  %3375 = vmatmul.bf16.vlgmr.msra.gmra.mxu3 %v962_v51 }
 0x1b6   : > { %3419 = vmatpush.bf16.msrb.mxu3 %v8528_v47 }
 0x1b7   : > { %3381 = vmatpush.bf16.msrb.mxu0 %v8503_v52  ;;  %v3155_v8 = vpop.f32.mrf.mxu2  ;;  %v3131_v11 = vpop.f32.mrf.mxu0 }
 0x1b8   : > { %3394 = vmatpush.bf16.msrb.mxu1 %v8511_v53  ;;  %v3156_v9 = vadd.f32 %v3155_v8, %v3143_v3  ;;  %v3168_v10 = vpop.f32.mrf.mxu3  ;;  %v3144_v15 = vpop.f32.mrf.mxu1 }
 0x1b9   : > { %3407 = vmatpush.bf16.msrb.mxu2 %v8519_v54 }
 0x1ba   : > { %3420 = vmatpush.bf16.msrb.mxu3 %v8527_v55  ;;  %v3169_v12 = vadd.f32 %v3168_v10, %v3156_v9 }
 0x1bb   : > { %3382 = vmatpush.bf16.msrb.mxu0 %v8502_v56 }
 0x1bc   : > { %3395 = vmatpush.bf16.msrb.mxu1 %v8510_v57 }
 0x1bd   : > { %3408 = vmatpush.bf16.msrb.mxu2 %v8518_v58 }
 0x1be   : > { %3421 = vmatpush.bf16.msrb.mxu3 %v8526_v59 }
 0x1bf   : > { %3383 = vmatpush.bf16.msrb.mxu0 %v8501_v62  ;;  %v3157_v22 = vpop.f32.mrf.mxu2 }
 0x1c0   : > { %3396 = vmatpush.bf16.msrb.mxu1 %v8509_v63  ;;  %v3170_v23 = vpop.f32.mrf.mxu3 }
 0x1c1   : > { %3409 = vmatpush.bf16.msrb.mxu2 %v8517_v1 }
 0x1c2   : > { %3422 = vmatpush.bf16.msrb.mxu3 %v8525_v2 }
 0x1c3   : > { %3384 = vmatpush.bf16.msrb.mxu0 %v8500_v4 }
 0x1c4   : > { %3397 = vmatpush.bf16.msrb.mxu1 %v8508_v5 }
 0x1c5   : > { %3410 = vmatpush.bf16.msrb.mxu2 %v8516_v6 }
 0x1c6   : > { %3423 = vmatpush.bf16.msrb.mxu3 %v8524_v7 }
 0x1c7   : > { %3385 = vmatpush.bf16.msrb.mxu0 %v8499_v13 }
 0x1c8   : > { %3398 = vmatpush.bf16.msrb.mxu1 %v8507_v14 }
 0x1c9   : > { %3411 = vmatpush.bf16.msrb.mxu2 %v8515_v16 }
 0x1ca   : > { %3424 = vmatpush.bf16.msrb.mxu3 %v8523_v17 }
 0x1cb   : > { %3386 = vmatpush.bf16.msrb.mxu0 %v8498_v18 }
 0x1cc   : > { %3399 = vmatpush.bf16.msrb.mxu1 %v8506_v19 }
 0x1cd   : > { %3412 = vmatpush.bf16.msrb.mxu2 %v8514_v20 }
 0x1ce   : > { %3425 = vmatpush.bf16.msrb.mxu3 %v8522_v21 }
 0x1cf   : > { %3387 = vmatpush.bf16.msrb.mxu0 %v8497_v24  ;;  %v3181_v36 = vpop.f32.mrf.mxu0 }
 0x1d0   : > { %3400 = vmatpush.bf16.msrb.mxu1 %v8505_v25  ;;  %v3182_v37 = vadd.f32 %v3181_v36, %v3169_v12  ;;  %v3194_v38 = vpop.f32.mrf.mxu1 }
 0x1d1   : > { %3413 = vmatpush.bf16.msrb.mxu2 %v8513_v26 }
 0x1d2   : > { %3426 = vmatpush.bf16.msrb.mxu3 %v8521_v29  ;;  %3388 = vmatmul.bf16.vlgmr.msrb.gmra.mxu0 %v963_v32  ;;  %v3195_v39 = vadd.f32 %v3194_v38, %v3182_v37  ;;  %v967_v29 = vld [vmem:[#allocation2] sm:$0xff] }
 0x1d3   : > { %3401 = vmatmul.bf16.vlgmr.msrb.gmra.mxu1 %v964_v33 }
 0x1d4   : > { %3414 = vmatmul.bf16.vlgmr.msrb.gmra.mxu2 %v965_v34 }
 0x1d5   : > { %3427 = vmatmul.bf16.vlgmr.msrb.gmra.mxu3 %v966_v35 }
 0x1d7   : > { %v3207_v40 = vpop.f32.mrf.mxu2  ;;  %v3183_v43 = vpop.f32.mrf.mxu0 }
 0x1d8   : > { %v3208_v41 = vadd.f32 %v3207_v40, %v3195_v39  ;;  %v3220_v42 = vpop.f32.mrf.mxu3  ;;  %v3196_v45 = vpop.f32.mrf.mxu1 }
 0x1da   : > { %v3221_v44 = vadd.f32 %v3220_v42, %v3208_v41 }
 0x1df   : > { %v3209_v46 = vpop.f32.mrf.mxu2 }
 0x1e0   : > { %v3222_v47 = vpop.f32.mrf.mxu3 }
 0x1ef   : > { %v3233_v48 = vpop.f32.mrf.mxu0 }
 0x1f0   : > { %v3234_v49 = vadd.f32 %v3233_v48, %v3221_v44  ;;  %v3246_v50 = vpop.f32.mrf.mxu1 }
 0x1f2   : > { %v3247_v51 = vadd.f32 %v3246_v50, %v3234_v49 }
 0x1f7   : > { %v3259_v52 = vpop.f32.mrf.mxu2  ;;  %v3235_v55 = vpop.f32.mrf.mxu0 }
 0x1f8   : > { %v3260_v53 = vadd.f32 %v3259_v52, %v3247_v51  ;;  %v3272_v54 = vpop.f32.mrf.mxu3  ;;  %v3248_v57 = vpop.f32.mrf.mxu1 }
 0x1fa   : > { %v3273_v56 = vadd.f32 %v3272_v54, %v3260_v53 }
 0x1ff   : > { %v3261_v58 = vpop.f32.mrf.mxu2 }
 0x200   : > { %v3274_v59 = vpop.f32.mrf.mxu3 }
 0x20f   : > { %v3285_v60 = vpop.f32.mrf.mxu0 }
 0x210   : > { %v3298_v61 = vpop.f32.mrf.mxu1  ;;  %v3286_v7 = vadd.f32 %v3285_v60, %v3273_v56 }
 0x212   : > { %v3299_v11 = vadd.f32 %v3298_v61, %v3286_v7 }
 0x217   : > { %v3311_v62 = vpop.f32.mrf.mxu2  ;;  %v3287_v0 = vpop.f32.mrf.mxu0 }
 0x218   : > { %v3324_v63 = vpop.f32.mrf.mxu3  ;;  %v3300_v1 = vpop.f32.mrf.mxu1  ;;  %v3312_v12 = vadd.f32 %v3311_v62, %v3299_v11 }
 0x21a   : > { %v3325_v15 = vadd.f32 %v3324_v63, %v3312_v12 }
 0x21f   : > { %v3313_v2 = vpop.f32.mrf.mxu2 }
 0x220   : > { %v3326_v3 = vpop.f32.mrf.mxu3 }
 0x22f   : > { %v3337_v4 = vpop.f32.mrf.mxu0 }
 0x230   : > { %v3350_v5 = vpop.f32.mrf.mxu1  ;;  %v3338_v16 = vadd.f32 %v3337_v4, %v3325_v15 }
 0x232   : > { %v3351_v17 = vadd.f32 %v3350_v5, %v3338_v16 }
 0x237   : > { %v3363_v6 = vpop.f32.mrf.mxu2  ;;  %v3339_v9 = vpop.f32.mrf.mxu0 }
 0x238   : > { %v3376_v8 = vpop.f32.mrf.mxu3  ;;  %v3352_v10 = vpop.f32.mrf.mxu1  ;;  %v3364_v18 = vadd.f32 %v3363_v6, %v3351_v17 }
 0x23a   : > { %v3377_v19 = vadd.f32 %v3376_v8, %v3364_v18 }
 0x23f   : > { %v3365_v13 = vpop.f32.mrf.mxu2 }
 0x240   : > { %v3378_v14 = vpop.f32.mrf.mxu3 }
 0x24f   : > { %v3389_v20 = vpop.f32.mrf.mxu0 }
 0x250   : > { %v3402_v21 = vpop.f32.mrf.mxu1  ;;  %v3390_v22 = vadd.f32 %v3389_v20, %v3377_v19 }
 0x252   : > { %v3403_v23 = vadd.f32 %v3402_v21, %v3390_v22 }
 0x257   : > { %v3415_v24 = vpop.f32.mrf.mxu2  ;;  %v3391_v27 = vpop.f32.mrf.mxu0 }
 0x258   : > { %v3428_v25 = vpop.f32.mrf.mxu3  ;;  %v3416_v26 = vadd.f32 %v3415_v24, %v3403_v23  ;;  %v3404_v28 = vpop.f32.mrf.mxu1 }
 0x25a   : > { %v3429_v30 = vadd.f32 %v3428_v25, %v3416_v26 }
 0x25c   : > { %v3432_v31 = vadd.f32 %v3429_v30, %v967_v29  ;;  %3437 = sbr.rel (%p7162_p7) target bundleno = 1457 (0x5b1), region = 156 }
 0x25e   : > { %3433 = vst [vmem:[#allocation2] sm:$0xff] %v3432_v31 }
 0x25f   : > { %v3417_v32 = vpop.f32.mrf.mxu2 }
 0x260   : > { %v3430_v33 = vpop.f32.mrf.mxu3 }
 0x261   : > { %v8536_v34 = vld [vmem:[%s11250_s19 + $0x38] sm:$0xff]  ;;  %v8535_v35 = vld [vmem:[%s11251_s5 + $0x30] sm:$0xff]  ;;  %v8534_v38 = vld [vmem:[%s11251_s5 + $0x28] sm:$0xff]  ;;  %vm3565_vm0 = vcmask 523264   ;;  %vm3599_vm1 = vcmask 1045504   ;;  %vm3595_vm2 = vcmask 97280  }
 0x262   : > { %3514 = vmatpush.bf16.msra.mxu0 %v8536_v34  ;;  %v8540_v36 = vld [vmem:[%s11252_s3 + $0x18] sm:$0xff]  ;;  %v8539_v37 = vld [vmem:[%s11252_s3 + $0x10] sm:$0xff]  ;;  %v8533_v39 = vld [vmem:[%s11251_s5 + $0x20] sm:$0xff]  ;;  %vm3626_vm3 = vcmask 1040384   ;;  %vm3627_vm4 = vcmask 1041408   ;;  %v9697_v3 = vmov 65535  }
 0x263   : > { %3573 = vmatpush.bf16.msra.mxu1 %v8540_v36  ;;  %v8532_v40 = vld [vmem:[%s11251_s5 + $0x18] sm:$0xff]  ;;  %v9029_v41 = vld [vmem:[#allocation9] ss:$0 sm:$0xff]  ;;  %v8531_v42 = vld [vmem:[%s11251_s5 + $0x10] sm:$0xff]  ;;  %v3628_v4 = vsel %vm3626_vm3, 4294967295, %v9697_v3  ;;  %vm3622_vm5 = vcmask 23552  }
 0x264   : > { %v8530_v45 = vld [vmem:[%s11251_s5 + $0x8] sm:$0xff]  ;;  %v8529_v47 = vld [vmem:[%s11251_s5] sm:$0xff]  ;;  %v9031_v61 = vld [vmem:[#allocation12] ss:$0 sm:$0xff]  ;;  %v3629_v6 = vsel %vm3627_vm4, %v3628_v4, 0 }
 0x265   : > { %v3438_v43 = vld [vmem:[#allocation2] sm:$0xff]  ;;  %v8538_v49 = vld [vmem:[%s11252_s3 + $0x8] sm:$0xff]  ;;  %v3617_v5 = vld [vmem:[#allocation15] sm:$0x3] }
 0x266   : > { %3515 = vmatpush.bf16.msra.mxu0 %v8535_v35  ;;  %v3443_v44 = vadd.f32 %v9029_v41, %v3438_v43  ;;  %v8537_v50 = vld [vmem:[%s11252_s3] sm:$0xff]  ;;  %v9030_v51 = vld [vmem:[#allocation10] ss:$0 sm:$0xff]  ;;  %v3631_v7 = vand.u32 %v3629_v6, %v3617_v5  ;;  %v7220_v8 = vld [vmem:[#allocation18] sm:$0xf] }
 0x267   : > { %3574 = vmatpush.bf16.msra.mxu1 %v8539_v37  ;;  %v7214_v57 = vld [vmem:[%s11253_s4] sm:$0xf]  ;;  %v8541_v58 = vld [vmem:[%s11253_s4] sm:$0x30]  ;;  %v8542_v9 = vld [vmem:[#allocation18] sm:$0x30] }
 0x268   : > { %v3444_v46 = vmax.f32 %v3443_v44, 0.0  ;;  %v7215_v59 = vor.u32 %v8541_v58, %v7214_v57  ;;  %3640 = vmatpush.bf16.msra.mxu3 %v3631_v7  ;;  %v7221_v10 = vor.u32 %v8542_v9, %v7220_v8  ;;  %v9032_v12 = vld [vmem:[#allocation13] ss:$0 sm:$0xff]  ;;  %v8546_v17 = vld [vmem:[#allocation21 + $0x18] sm:$0xff]  ;;  %v8544_v19 = vld [vmem:[#allocation21 + $0x8] sm:$0xff] }
 0x269   : > { %v8545_v18 = vld [vmem:[#allocation21 + $0x10] sm:$0xff]  ;;  %v8543_v26 = vld [vmem:[#allocation21] sm:$0xff]  ;;  %v9034_v27 = vld [vmem:[#allocation19] ss:$0 sm:$0xff] }
 0x26a   : > { %3516 = vmatpush.bf16.msra.mxu0 %v8534_v38  ;;  %v3445_v48 = vpack.c.bf16 %v3444_v46, %v3444_v46  ;;  %v3601_v60 = vsel %vm3599_vm1, %v7215_v59, 0  ;;  %v3663_v11 = vsel %vm3599_vm1, %v7221_v10, 0  ;;  %v9033_v20 = vld [vmem:[#allocation16] ss:$0 sm:$0xff]  ;;  %v9035_v33 = vld [vmem:[#allocation22] ss:$0 sm:$0xff] }
 0x26b   : > { %3575 = vmatpush.bf16.msra.mxu1 %v8538_v49  ;;  %3610 = vmatpush.bf16.msra.mxu2 %v3601_v60 }
 0x26c   : > { %3723 = vmatpush.bf16.msrb.mxu3 %v8546_v17 }
 0x26e   : > { %3517 = vmatpush.bf16.msra.mxu0 %v8533_v39 }
 0x26f   : > { %3576 = vmatpush.bf16.msra.mxu1 %v8537_v50  ;;  %3672 = vmatpush.bf16.msrb.mxu2 %v3663_v11 }
 0x270   : > { %3724 = vmatpush.bf16.msrb.mxu3 %v8545_v18 }
 0x272   : > { %3518 = vmatpush.bf16.msra.mxu0 %v8532_v40 }
 0x274   : > { %3725 = vmatpush.bf16.msrb.mxu3 %v8544_v19 }
 0x276   : > { %3519 = vmatpush.bf16.msra.mxu0 %v8531_v42 }
 0x278   : > { %3726 = vmatpush.bf16.msrb.mxu3 %v8543_v26 }
 0x27a   : > { %3520 = vmatpush.bf16.msra.mxu0 %v8530_v45 }
 0x27e   : > { %3521 = vmatpush.bf16.msra.mxu0 %v8529_v47 }
 0x281   : > { %3522 = vmatmul.bf16.vlgmr.msra.gmra.mxu0 %v3445_v48 }
 0x2fe   : > { %v3523_v52 = vpop.f32.mrf.mxu0 }
 0x2ff   : > { %v3524_v53 = vadd.f32 %v9030_v51, %v3523_v52 }
 0x301   : > { %v3527_v54 = vmax.f32 %v3524_v53, 0.0 }
 0x303   : > { %v3528_v55 = vpack.c.bf16 %v3527_v54, %v3527_v54 }
 0x305   : > { %7211 = vmatmul.msk.bf16.vlgmr.msra.gmra.mxu1 %vm3565_vm0, %v3528_v55 }
 0x306   : > { %v3525_v56 = vpop.f32.mrf.mxu0 }
 0x382   : > { %v3578_v62 = vpop.f32.mrf.mxu1 }
 0x383   : > { %v3579_v63 = vadd.f32 %v9031_v61, %v3578_v62 }
 0x385   : > { %v3582_v0 = vmax.f32 %v3579_v63, 0.0 }
 0x387   : > { %v3583_v1 = vpack.c.bf16 %v3582_v0, %v3582_v0 }
 0x389   : > { %7216 = vmatmul.msk.bf16.vlgmr.msra.gmra.mxu2 %vm3595_vm2, %v3583_v1 }
 0x38a   : > { %v3580_v2 = vpop.f32.mrf.mxu1 }
 0x40c   : > { %v3612_v13 = vpop.f32.mrf.mxu2 }
 0x40d   : > { %v3613_v14 = vadd.f32 %v9032_v12, %v3612_v13 }
 0x40f   : > { %v3616_v15 = vpack.c.bf16 %v3613_v14, %v3613_v14 }
 0x411   : > { %7217 = vmatmul.msk.bf16.vlgmr.msra.gmra.mxu3 %vm3622_vm5, %v3616_v15 }
 0x414   : > { %v3614_v16 = vpop.f32.mrf.mxu2 }
 0x494   : > { %v3642_v21 = vpop.f32.mrf.mxu3 }
 0x495   : > { %v3643_v22 = vadd.f32 %v9033_v20, %v3642_v21 }
 0x497   : > { %v3646_v23 = vmax.f32 %v3643_v22, 0.0 }
 0x499   : > { %v3647_v24 = vpack.c.bf16 %v3646_v23, %v3646_v23 }
 0x49b   : > { %7222 = vmatmul.msk.bf16.vlgmr.msrb.gmra.mxu2 %vm3595_vm2, %v3647_v24 }
 0x49c   : > { %v3644_v25 = vpop.f32.mrf.mxu3 }
 0x51e   : > { %v3674_v28 = vpop.f32.mrf.mxu2 }
 0x51f   : > { %v3675_v29 = vadd.f32 %v9034_v27, %v3674_v28 }
 0x521   : > { %v3678_v30 = vmax.f32 %v3675_v29, 0.0 }
 0x523   : > { %v3679_v31 = vpack.c.bf16 %v3678_v30, %v3678_v30 }
 0x525   : > { %7239 = vmatmul.msk.bf16.vlgmr.msrb.gmra.mxu3 %vm3565_vm0, %v3679_v31 }
 0x526   : > { %v3676_v32 = vpop.f32.mrf.mxu2 }
 0x5a8   : > { %v3728_v34 = vpop.f32.mrf.mxu3 }
 0x5a9   : > { %v3729_v35 = vadd.f32 %v9035_v33, %v3728_v34 }
 0x5ab   : > { %v3732_v36 = vmax.f32 %v3729_v35, 0.0 }
 0x5ad   : > { %v3733_v37 = vpack.c.bf16 %v3732_v36, %v3732_v36 }
 0x5af   : > { %3734 = vst [vmem:[#allocation3] sm:$0xf] %v3733_v37 }
 0x5b0   : > { %v3730_v38 = vpop.f32.mrf.mxu3 }
 0x5b1 PF: > { %s11254_s12 = sld [smem:[#allocation41_spill]] }
 0x5b7   : > { %p7240_p11 = scmp.ne.s32.totalorder %s11254_s12, 1 }
 0x5b9   : > { %3738 = sbr.rel (%p7240_p11) target bundleno = 1873 (0x751), region = 160 }
 0x5be   : > { %v8139_v39 = vld [vmem:[%s10116_s15 + $0x700] sm:$0xf]  ;;  %v8771_v41 = vld [vmem:[%s10116_s15 + $0x704] sm:$0xf]  ;;  %v8147_v44 = vld [vmem:[%s10116_s15 + $0x708] sm:$0xf] }
 0x5bf   : > { %v8787_v40 = vld [vmem:[%s10116_s15 + $0x77c] sm:$0xf0]  ;;  %v8141_v43 = vld [vmem:[%s10116_s15 + $0x780] sm:$0xf0]  ;;  %v8788_v45 = vld [vmem:[%s10116_s15 + $0x784] sm:$0xf0] }
 0x5c0   : > { %v8140_v42 = vor.u32 %v8787_v40, %v8139_v39  ;;  %v8144_v46 = vor.u32 %v8771_v41, %v8141_v43  ;;  %v8148_v47 = vor.u32 %v8788_v45, %v8147_v44  ;;  %v8772_v48 = vld [vmem:[%s10116_s15 + $0x70c] sm:$0xf]  ;;  %v8011_v50 = vld [vmem:[%s10116_s15 + $0x600] sm:$0xf]  ;;  %v8739_v53 = vld [vmem:[%s10116_s15 + $0x604] sm:$0xf] }
 0x5c1   : > { %v8149_v49 = vld [vmem:[%s10116_s15 + $0x788] sm:$0xf0]  ;;  %v8755_v52 = vld [vmem:[%s10116_s15 + $0x67c] sm:$0xf0]  ;;  %v8013_v54 = vld [vmem:[%s10116_s15 + $0x680] sm:$0xf0] }
 0x5c2   : > { %5348 = vmatpush.bf16.msra.mxu0 %v8140_v42  ;;  %v8152_v51 = vor.u32 %v8772_v48, %v8149_v49  ;;  %5361 = vmatpush.bf16.msra.mxu1 %v8144_v46  ;;  %v8012_v55 = vor.u32 %v8755_v52, %v8011_v50  ;;  %v8016_v56 = vor.u32 %v8739_v53, %v8013_v54  ;;  %v8019_v57 = vld [vmem:[%s10116_s15 + $0x608] sm:$0xf]  ;;  %v8740_v59 = vld [vmem:[%s10116_s15 + $0x60c] sm:$0xf]  ;;  %v7883_v62 = vld [vmem:[%s10116_s15 + $0x500] sm:$0xf] }
 0x5c3   : > { %5374 = vmatpush.bf16.msra.mxu2 %v8148_v47  ;;  %v8756_v58 = vld [vmem:[%s10116_s15 + $0x684] sm:$0xf0]  ;;  %v8021_v61 = vld [vmem:[%s10116_s15 + $0x688] sm:$0xf0]  ;;  %v8723_v63 = vld [vmem:[%s10116_s15 + $0x57c] sm:$0xf0] }
 0x5c4   : > { %5387 = vmatpush.bf16.msra.mxu3 %v8152_v51  ;;  %v8020_v60 = vor.u32 %v8756_v58, %v8019_v57  ;;  %v8024_v0 = vor.u32 %v8740_v59, %v8021_v61  ;;  %v8707_v1 = vld [vmem:[%s10116_s15 + $0x504] sm:$0xf]  ;;  %v7891_v3 = vld [vmem:[%s10116_s15 + $0x508] sm:$0xf]  ;;  %v7884_v4 = vor.u32 %v8723_v63, %v7883_v62  ;;  %v8708_v6 = vld [vmem:[%s10116_s15 + $0x50c] sm:$0xf] }
 0x5c5   : > { %v7885_v2 = vld [vmem:[%s10116_s15 + $0x580] sm:$0xf0]  ;;  %v8724_v5 = vld [vmem:[%s10116_s15 + $0x584] sm:$0xf0]  ;;  %v7893_v7 = vld [vmem:[%s10116_s15 + $0x588] sm:$0xf0] }
 0x5c6   : > { %5349 = vmatpush.bf16.msra.mxu0 %v8012_v55  ;;  %5362 = vmatpush.bf16.msra.mxu1 %v8016_v56  ;;  %v7888_v8 = vor.u32 %v8707_v1, %v7885_v2  ;;  %v7892_v9 = vor.u32 %v8724_v5, %v7891_v3  ;;  %v7755_v10 = vld [vmem:[%s10116_s15 + $0x400] sm:$0xf]  ;;  %v8675_v12 = vld [vmem:[%s10116_s15 + $0x404] sm:$0xf]  ;;  %v7896_v13 = vor.u32 %v8708_v6, %v7893_v7  ;;  %v7763_v15 = vld [vmem:[%s10116_s15 + $0x408] sm:$0xf] }
 0x5c7   : > { %5375 = vmatpush.bf16.msra.mxu2 %v8020_v60  ;;  %v8691_v11 = vld [vmem:[%s10116_s15 + $0x47c] sm:$0xf0]  ;;  %v7757_v14 = vld [vmem:[%s10116_s15 + $0x480] sm:$0xf0]  ;;  %v8692_v16 = vld [vmem:[%s10116_s15 + $0x484] sm:$0xf0] }
 0x5c8   : > { %5388 = vmatpush.bf16.msra.mxu3 %v8024_v0  ;;  %v8676_v17 = vld [vmem:[%s10116_s15 + $0x40c] sm:$0xf]  ;;  %v7756_v19 = vor.u32 %v8691_v11, %v7755_v10  ;;  %v7760_v20 = vor.u32 %v8675_v12, %v7757_v14  ;;  %v7764_v21 = vor.u32 %v8692_v16, %v7763_v15  ;;  %v7627_v22 = vld [vmem:[%s10116_s15 + $0x300] sm:$0xf]  ;;  %v8643_v24 = vld [vmem:[%s10116_s15 + $0x304] sm:$0xf] }
 0x5c9   : > { %v7765_v18 = vld [vmem:[%s10116_s15 + $0x488] sm:$0xf0]  ;;  %v8659_v23 = vld [vmem:[%s10116_s15 + $0x37c] sm:$0xf0]  ;;  %v7629_v26 = vld [vmem:[%s10116_s15 + $0x380] sm:$0xf0] }
 0x5ca   : > { %5350 = vmatpush.bf16.msra.mxu0 %v7884_v4  ;;  %5363 = vmatpush.bf16.msra.mxu1 %v7888_v8  ;;  %v7768_v25 = vor.u32 %v8676_v17, %v7765_v18  ;;  %v7635_v27 = vld [vmem:[%s10116_s15 + $0x308] sm:$0xf]  ;;  %v8644_v29 = vld [vmem:[%s10116_s15 + $0x30c] sm:$0xf]  ;;  %v7628_v31 = vor.u32 %v8659_v23, %v7627_v22  ;;  %v7632_v32 = vor.u32 %v8643_v24, %v7629_v26  ;;  %v7499_v34 = vld [vmem:[%s10116_s15 + $0x200] sm:$0xf] }
 0x5cb   : > { %5376 = vmatpush.bf16.msra.mxu2 %v7892_v9  ;;  %v8660_v28 = vld [vmem:[%s10116_s15 + $0x384] sm:$0xf0]  ;;  %v7637_v30 = vld [vmem:[%s10116_s15 + $0x388] sm:$0xf0]  ;;  %v8627_v35 = vld [vmem:[%s10116_s15 + $0x27c] sm:$0xf0] }
 0x5cc   : > { %5389 = vmatpush.bf16.msra.mxu3 %v7896_v13  ;;  %v7636_v33 = vor.u32 %v8660_v28, %v7635_v27  ;;  %v8611_v36 = vld [vmem:[%s10116_s15 + $0x204] sm:$0xf]  ;;  %v7640_v37 = vor.u32 %v8644_v29, %v7637_v30  ;;  %v7507_v39 = vld [vmem:[%s10116_s15 + $0x208] sm:$0xf]  ;;  %v8612_v41 = vld [vmem:[%s10116_s15 + $0x20c] sm:$0xf]  ;;  %v7500_v43 = vor.u32 %v8627_v35, %v7499_v34 }
 0x5cd   : > { %v7501_v38 = vld [vmem:[%s10116_s15 + $0x280] sm:$0xf0]  ;;  %v8628_v40 = vld [vmem:[%s10116_s15 + $0x284] sm:$0xf0]  ;;  %v7509_v42 = vld [vmem:[%s10116_s15 + $0x288] sm:$0xf0] }
 0x5ce   : > { %5351 = vmatpush.bf16.msra.mxu0 %v7756_v19  ;;  %5364 = vmatpush.bf16.msra.mxu1 %v7760_v20  ;;  %v7504_v44 = vor.u32 %v8611_v36, %v7501_v38  ;;  %v7508_v45 = vor.u32 %v8628_v40, %v7507_v39  ;;  %v7371_v46 = vld [vmem:[%s10116_s15 + $0x100] sm:$0xf]  ;;  %v8579_v48 = vld [vmem:[%s10116_s15 + $0x104] sm:$0xf]  ;;  %v7512_v49 = vor.u32 %v8612_v41, %v7509_v42  ;;  %v7379_v51 = vld [vmem:[%s10116_s15 + $0x108] sm:$0xf] }
 0x5cf   : > { %5377 = vmatpush.bf16.msra.mxu2 %v7764_v21  ;;  %v8595_v47 = vld [vmem:[%s10116_s15 + $0x17c] sm:$0xf0]  ;;  %v7373_v50 = vld [vmem:[%s10116_s15 + $0x180] sm:$0xf0]  ;;  %v8596_v52 = vld [vmem:[%s10116_s15 + $0x184] sm:$0xf0] }
 0x5d0   : > { %5390 = vmatpush.bf16.msra.mxu3 %v7768_v25  ;;  %v8580_v53 = vld [vmem:[%s10116_s15 + $0x10c] sm:$0xf]  ;;  %v7372_v55 = vor.u32 %v8595_v47, %v7371_v46  ;;  %v7243_v56 = vld [vmem:[%s10116_s15] sm:$0xf]  ;;  %v7376_v58 = vor.u32 %v8579_v48, %v7373_v50  ;;  %v7380_v59 = vor.u32 %v8596_v52, %v7379_v51  ;;  %v8547_v60 = vld [vmem:[%s10116_s15 + $0x4] sm:$0xf] }
 0x5d1   : > { %v7381_v54 = vld [vmem:[%s10116_s15 + $0x188] sm:$0xf0]  ;;  %v8563_v57 = vld [vmem:[%s10116_s15 + $0x7c] sm:$0xf0]  ;;  %v7245_v61 = vld [vmem:[%s10116_s15 + $0x80] sm:$0xf0] }
 0x5d2   : > { %5352 = vmatpush.bf16.msra.mxu0 %v7628_v31  ;;  %5365 = vmatpush.bf16.msra.mxu1 %v7632_v32  ;;  %v7251_v62 = vld [vmem:[%s10116_s15 + $0x8] sm:$0xf]  ;;  %v7384_v63 = vor.u32 %v8580_v53, %v7381_v54  ;;  %v8548_v1 = vld [vmem:[%s10116_s15 + $0xc] sm:$0xf]  ;;  %v8155_v3 = vld [vmem:[%s10116_s15 + $0x710] sm:$0xf]  ;;  %v7244_v6 = vor.u32 %v8563_v57, %v7243_v56  ;;  %v7248_v10 = vor.u32 %v8547_v60, %v7245_v61 }
 0x5d3   : > { %5378 = vmatpush.bf16.msra.mxu2 %v7636_v33  ;;  %v8564_v0 = vld [vmem:[%s10116_s15 + $0x84] sm:$0xf0]  ;;  %v7253_v2 = vld [vmem:[%s10116_s15 + $0x88] sm:$0xf0]  ;;  %v8789_v4 = vld [vmem:[%s10116_s15 + $0x78c] sm:$0xf0] }
 0x5d4   : > { %5391 = vmatpush.bf16.msra.mxu3 %v7640_v37  ;;  %v8773_v5 = vld [vmem:[%s10116_s15 + $0x714] sm:$0xf]  ;;  %v8163_v8 = vld [vmem:[%s10116_s15 + $0x718] sm:$0xf]  ;;  %v7252_v11 = vor.u32 %v8564_v0, %v7251_v62  ;;  %v8774_v12 = vld [vmem:[%s10116_s15 + $0x71c] sm:$0xf]  ;;  %v7256_v14 = vor.u32 %v8548_v1, %v7253_v2  ;;  %v8156_v15 = vor.u32 %v8789_v4, %v8155_v3 }
 0x5d5   : > { %v8157_v7 = vld [vmem:[%s10116_s15 + $0x790] sm:$0xf0]  ;;  %v8790_v9 = vld [vmem:[%s10116_s15 + $0x794] sm:$0xf0]  ;;  %v8165_v13 = vld [vmem:[%s10116_s15 + $0x798] sm:$0xf0] }
 0x5d6   : > { %5353 = vmatpush.bf16.msra.mxu0 %v7500_v43  ;;  %5366 = vmatpush.bf16.msra.mxu1 %v7504_v44  ;;  %v8160_v16 = vor.u32 %v8773_v5, %v8157_v7  ;;  %v8164_v17 = vor.u32 %v8790_v9, %v8163_v8  ;;  %v8027_v18 = vld [vmem:[%s10116_s15 + $0x610] sm:$0xf]  ;;  %v8741_v20 = vld [vmem:[%s10116_s15 + $0x614] sm:$0xf]  ;;  %v8168_v21 = vor.u32 %v8774_v12, %v8165_v13  ;;  %v8035_v23 = vld [vmem:[%s10116_s15 + $0x618] sm:$0xf] }
 0x5d7   : > { %5379 = vmatpush.bf16.msra.mxu2 %v7508_v45  ;;  %v8757_v19 = vld [vmem:[%s10116_s15 + $0x68c] sm:$0xf0]  ;;  %v8029_v22 = vld [vmem:[%s10116_s15 + $0x690] sm:$0xf0]  ;;  %v8758_v24 = vld [vmem:[%s10116_s15 + $0x694] sm:$0xf0] }
 0x5d8   : > { %5392 = vmatpush.bf16.msra.mxu3 %v7512_v49  ;;  %v8742_v25 = vld [vmem:[%s10116_s15 + $0x61c] sm:$0xf]  ;;  %v8028_v27 = vor.u32 %v8757_v19, %v8027_v18  ;;  %v8032_v28 = vor.u32 %v8741_v20, %v8029_v22  ;;  %v8036_v29 = vor.u32 %v8758_v24, %v8035_v23  ;;  %v7899_v30 = vld [vmem:[%s10116_s15 + $0x510] sm:$0xf]  ;;  %v8709_v32 = vld [vmem:[%s10116_s15 + $0x514] sm:$0xf] }
 0x5d9   : > { %v8037_v26 = vld [vmem:[%s10116_s15 + $0x698] sm:$0xf0]  ;;  %v8725_v31 = vld [vmem:[%s10116_s15 + $0x58c] sm:$0xf0]  ;;  %v7901_v34 = vld [vmem:[%s10116_s15 + $0x590] sm:$0xf0] }
 0x5da   : > { %5354 = vmatpush.bf16.msra.mxu0 %v7372_v55  ;;  %5367 = vmatpush.bf16.msra.mxu1 %v7376_v58  ;;  %v8040_v33 = vor.u32 %v8742_v25, %v8037_v26  ;;  %v7907_v35 = vld [vmem:[%s10116_s15 + $0x518] sm:$0xf]  ;;  %v8710_v37 = vld [vmem:[%s10116_s15 + $0x51c] sm:$0xf]  ;;  %v7900_v39 = vor.u32 %v8725_v31, %v7899_v30  ;;  %v10566_v40 = vld [vmem:[#allocation3] sm:$0xf]  ;;  %v7904_v41 = vor.u32 %v8709_v32, %v7901_v34 }
 0x5db   : > { %5380 = vmatpush.bf16.msra.mxu2 %v7380_v59  ;;  %v8726_v36 = vld [vmem:[%s10116_s15 + $0x594] sm:$0xf0]  ;;  %v7909_v38 = vld [vmem:[%s10116_s15 + $0x598] sm:$0xf0]  ;;  %v7771_v43 = vld [vmem:[%s10116_s15 + $0x410] sm:$0xf] }
 0x5dc   : > { %5393 = vmatpush.bf16.msra.mxu3 %v7384_v63  ;;  %v7908_v42 = vor.u32 %v8726_v36, %v7907_v35  ;;  %v8693_v44 = vld [vmem:[%s10116_s15 + $0x48c] sm:$0xf0]  ;;  %v8677_v45 = vld [vmem:[%s10116_s15 + $0x414] sm:$0xf]  ;;  %v7912_v46 = vor.u32 %v8710_v37, %v7909_v38  ;;  %v7779_v48 = vld [vmem:[%s10116_s15 + $0x418] sm:$0xf] }
 0x5dd   : > { %v7773_v47 = vld [vmem:[%s10116_s15 + $0x490] sm:$0xf0]  ;;  %v8694_v49 = vld [vmem:[%s10116_s15 + $0x494] sm:$0xf0]  ;;  %v8678_v50 = vld [vmem:[%s10116_s15 + $0x41c] sm:$0xf]  ;;  %v7772_v52 = vor.u32 %v8693_v44, %v7771_v43 }
 0x5de   : > { %5355 = vmatpush.bf16.msra.mxu0 %v7244_v6  ;;  %5368 = vmatpush.bf16.msra.mxu1 %v7248_v10  ;;  %v7781_v51 = vld [vmem:[%s10116_s15 + $0x498] sm:$0xf0]  ;;  %v7776_v53 = vor.u32 %v8677_v45, %v7773_v47  ;;  %v7780_v54 = vor.u32 %v8694_v49, %v7779_v48  ;;  %v7643_v55 = vld [vmem:[%s10116_s15 + $0x310] sm:$0xf]  ;;  %v8645_v57 = vld [vmem:[%s10116_s15 + $0x314] sm:$0xf] }
 0x5df   : > { %5381 = vmatpush.bf16.msra.mxu2 %v7252_v11  ;;  %v8661_v56 = vld [vmem:[%s10116_s15 + $0x38c] sm:$0xf0]  ;;  %v7784_v58 = vor.u32 %v8678_v50, %v7781_v51  ;;  %v7645_v59 = vld [vmem:[%s10116_s15 + $0x390] sm:$0xf0]  ;;  %v7651_v60 = vld [vmem:[%s10116_s15 + $0x318] sm:$0xf] }
 0x5e0   : > { %5394 = vmatpush.bf16.msra.mxu3 %v7256_v14  ;;  %v8662_v61 = vld [vmem:[%s10116_s15 + $0x394] sm:$0xf0]  ;;  %v8646_v62 = vld [vmem:[%s10116_s15 + $0x31c] sm:$0xf]  ;;  %v7644_v0 = vor.u32 %v8661_v56, %v7643_v55  ;;  %v7648_v1 = vor.u32 %v8645_v57, %v7645_v59  ;;  %v7515_v3 = vld [vmem:[%s10116_s15 + $0x210] sm:$0xf] }
 0x5e1   : > { %5356 = vmatmul.bf16.vlgmr.msra.gmra.mxu0 %v10566_v40  ;;  %5369 = vmatmul.bf16.vlgmr.msra.gmra.mxu1 %v10566_v40  ;;  %v7653_v63 = vld [vmem:[%s10116_s15 + $0x398] sm:$0xf0]  ;;  %v7652_v2 = vor.u32 %v8662_v61, %v7651_v60  ;;  %v8629_v4 = vld [vmem:[%s10116_s15 + $0x28c] sm:$0xf0]  ;;  %v8613_v5 = vld [vmem:[%s10116_s15 + $0x214] sm:$0xf] }
 0x5e2   : > { %5400 = vmatpush.bf16.msrb.mxu0 %v8156_v15  ;;  %5413 = vmatpush.bf16.msrb.mxu1 %v8160_v16  ;;  %v7656_v6 = vor.u32 %v8646_v62, %v7653_v63  ;;  %v7517_v7 = vld [vmem:[%s10116_s15 + $0x290] sm:$0xf0]  ;;  %v7523_v8 = vld [vmem:[%s10116_s15 + $0x218] sm:$0xf]  ;;  %v8614_v10 = vld [vmem:[%s10116_s15 + $0x21c] sm:$0xf]  ;;  %v7516_v12 = vor.u32 %v8629_v4, %v7515_v3 }
 0x5e3   : > { %5426 = vmatpush.bf16.msrb.mxu2 %v8164_v17  ;;  %5395 = vmatmul.bf16.vlgmr.msra.gmra.mxu3 %v10566_v40  ;;  %v8630_v9 = vld [vmem:[%s10116_s15 + $0x294] sm:$0xf0]  ;;  %v7525_v11 = vld [vmem:[%s10116_s15 + $0x298] sm:$0xf0]  ;;  %v7520_v13 = vor.u32 %v8613_v5, %v7517_v7  ;;  %v7387_v15 = vld [vmem:[%s10116_s15 + $0x110] sm:$0xf] }
 0x5e4   : > { %5439 = vmatpush.bf16.msrb.mxu3 %v8168_v21  ;;  %5382 = vmatmul.bf16.vlgmr.msra.gmra.mxu2 %v10566_v40  ;;  %v7524_v14 = vor.u32 %v8630_v9, %v7523_v8  ;;  %v8597_v16 = vld [vmem:[%s10116_s15 + $0x18c] sm:$0xf0]  ;;  %v8581_v17 = vld [vmem:[%s10116_s15 + $0x114] sm:$0xf]  ;;  %v7528_v18 = vor.u32 %v8614_v10, %v7525_v11  ;;  %v7395_v20 = vld [vmem:[%s10116_s15 + $0x118] sm:$0xf] }
 0x5e5   : > { %v7389_v19 = vld [vmem:[%s10116_s15 + $0x190] sm:$0xf0]  ;;  %v8598_v21 = vld [vmem:[%s10116_s15 + $0x194] sm:$0xf0]  ;;  %v8582_v22 = vld [vmem:[%s10116_s15 + $0x11c] sm:$0xf]  ;;  %v7388_v24 = vor.u32 %v8597_v16, %v7387_v15 }
 0x5e6   : > { %5401 = vmatpush.bf16.msrb.mxu0 %v8028_v27  ;;  %5414 = vmatpush.bf16.msrb.mxu1 %v8032_v28  ;;  %v7397_v23 = vld [vmem:[%s10116_s15 + $0x198] sm:$0xf0]  ;;  %v7259_v25 = vld [vmem:[%s10116_s15 + $0x10] sm:$0xf]  ;;  %v7392_v27 = vor.u32 %v8581_v17, %v7389_v19  ;;  %v7396_v28 = vor.u32 %v8598_v21, %v7395_v20  ;;  %v7261_v30 = vld [vmem:[%s10116_s15 + $0x90] sm:$0xf0] }
 0x5e7   : > { %5427 = vmatpush.bf16.msrb.mxu2 %v8036_v29  ;;  %v8565_v26 = vld [vmem:[%s10116_s15 + $0x8c] sm:$0xf0]  ;;  %v8549_v29 = vld [vmem:[%s10116_s15 + $0x14] sm:$0xf]  ;;  %v7267_v31 = vld [vmem:[%s10116_s15 + $0x18] sm:$0xf]  ;;  %v7400_v32 = vor.u32 %v8582_v22, %v7397_v23 }
 0x5e8   : > { %5440 = vmatpush.bf16.msrb.mxu3 %v8040_v33  ;;  %v8566_v33 = vld [vmem:[%s10116_s15 + $0x94] sm:$0xf0]  ;;  %v8550_v34 = vld [vmem:[%s10116_s15 + $0x1c] sm:$0xf]  ;;  %v8171_v36 = vld [vmem:[%s10116_s15 + $0x720] sm:$0xf]  ;;  %v7264_v44 = vor.u32 %v8549_v29, %v7261_v30 }
 0x5e9   : > { %v7269_v35 = vld [vmem:[%s10116_s15 + $0x98] sm:$0xf0]  ;;  %v8791_v37 = vld [vmem:[%s10116_s15 + $0x79c] sm:$0xf0]  ;;  %v8775_v38 = vld [vmem:[%s10116_s15 + $0x724] sm:$0xf]  ;;  %v7268_v45 = vor.u32 %v8566_v33, %v7267_v31 }
 0x5ea   : > { %5402 = vmatpush.bf16.msrb.mxu0 %v7900_v39  ;;  %5415 = vmatpush.bf16.msrb.mxu1 %v7904_v41  ;;  %v7260_v39 = vor.u32 %v8565_v26, %v7259_v25  ;;  %v8173_v41 = vld [vmem:[%s10116_s15 + $0x7a0] sm:$0xf0]  ;;  %v8792_v43 = vld [vmem:[%s10116_s15 + $0x7a4] sm:$0xf0]  ;;  %v8181_v47 = vld [vmem:[%s10116_s15 + $0x7a8] sm:$0xf0]  ;;  %v7272_v48 = vor.u32 %v8550_v34, %v7269_v35  ;;  %v8172_v49 = vor.u32 %v8791_v37, %v8171_v36 }
 0x5eb   : > { %5428 = vmatpush.bf16.msrb.mxu2 %v7908_v42  ;;  %v8179_v42 = vld [vmem:[%s10116_s15 + $0x728] sm:$0xf]  ;;  %v8176_v50 = vor.u32 %v8775_v38, %v8173_v41  ;;  %v8045_v56 = vld [vmem:[%s10116_s15 + $0x6a0] sm:$0xf0]  ;;  %v8744_v59 = vld [vmem:[%s10116_s15 + $0x62c] sm:$0xf] }
 0x5ec   : > { %5441 = vmatpush.bf16.msrb.mxu3 %v7912_v46  ;;  %v8776_v46 = vld [vmem:[%s10116_s15 + $0x72c] sm:$0xf]  ;;  %v8180_v51 = vor.u32 %v8792_v43, %v8179_v42  ;;  %v8051_v57 = vld [vmem:[%s10116_s15 + $0x628] sm:$0xf]  ;;  %v7917_v4 = vld [vmem:[%s10116_s15 + $0x5a0] sm:$0xf0] }
 0x5ed   : > { %v8184_v55 = vor.u32 %v8776_v46, %v8181_v47  ;;  %v8053_v60 = vld [vmem:[%s10116_s15 + $0x6a8] sm:$0xf0]  ;;  %v7923_v5 = vld [vmem:[%s10116_s15 + $0x528] sm:$0xf]  ;;  %v7789_v16 = vld [vmem:[%s10116_s15 + $0x4a0] sm:$0xf0] }
 0x5ee   : > { %5403 = vmatpush.bf16.msrb.mxu0 %v7772_v52  ;;  %5416 = vmatpush.bf16.msrb.mxu1 %v7776_v53  ;;  %v8043_v52 = vld [vmem:[%s10116_s15 + $0x620] sm:$0xf]  ;;  %v8056_v3 = vor.u32 %v8744_v59, %v8053_v60  ;;  %v8712_v7 = vld [vmem:[%s10116_s15 + $0x52c] sm:$0xf]  ;;  %v7795_v17 = vld [vmem:[%s10116_s15 + $0x428] sm:$0xf] }
 0x5ef   : > { %5429 = vmatpush.bf16.msrb.mxu2 %v7780_v54  ;;  %v8759_v53 = vld [vmem:[%s10116_s15 + $0x69c] sm:$0xf0]  ;;  %v8743_v54 = vld [vmem:[%s10116_s15 + $0x624] sm:$0xf]  ;;  %v7925_v8 = vld [vmem:[%s10116_s15 + $0x5a8] sm:$0xf0] }
 0x5f0   : > { %5442 = vmatpush.bf16.msrb.mxu3 %v7784_v58  ;;  %v8760_v58 = vld [vmem:[%s10116_s15 + $0x6a4] sm:$0xf0]  ;;  %v8044_v61 = vor.u32 %v8759_v53, %v8043_v52  ;;  %v8048_v62 = vor.u32 %v8743_v54, %v8045_v56  ;;  %v7928_v15 = vor.u32 %v8712_v7, %v7925_v8  ;;  %v8680_v19 = vld [vmem:[%s10116_s15 + $0x42c] sm:$0xf]  ;;  %v8663_v25 = vld [vmem:[%s10116_s15 + $0x39c] sm:$0xf0] }
 0x5f1   : > { %v8052_v63 = vor.u32 %v8760_v58, %v8051_v57  ;;  %v7797_v20 = vld [vmem:[%s10116_s15 + $0x4a8] sm:$0xf0]  ;;  %v8647_v26 = vld [vmem:[%s10116_s15 + $0x324] sm:$0xf]  ;;  %v7667_v29 = vld [vmem:[%s10116_s15 + $0x328] sm:$0xf] }
 0x5f2   : > { %5404 = vmatpush.bf16.msrb.mxu0 %v7644_v0  ;;  %5417 = vmatpush.bf16.msrb.mxu1 %v7648_v1  ;;  %v7915_v0 = vld [vmem:[%s10116_s15 + $0x520] sm:$0xf]  ;;  %v8664_v30 = vld [vmem:[%s10116_s15 + $0x3a4] sm:$0xf0]  ;;  %v8648_v31 = vld [vmem:[%s10116_s15 + $0x32c] sm:$0xf] }
 0x5f3   : > { %5430 = vmatpush.bf16.msrb.mxu2 %v7652_v2  ;;  %v8727_v1 = vld [vmem:[%s10116_s15 + $0x59c] sm:$0xf0]  ;;  %v8711_v2 = vld [vmem:[%s10116_s15 + $0x524] sm:$0xf]  ;;  %v7668_v35 = vor.u32 %v8664_v30, %v7667_v29  ;;  %v7539_v42 = vld [vmem:[%s10116_s15 + $0x228] sm:$0xf] }
 0x5f4   : > { %5443 = vmatpush.bf16.msrb.mxu3 %v7656_v6  ;;  %v8728_v6 = vld [vmem:[%s10116_s15 + $0x5a4] sm:$0xf0]  ;;  %v7916_v9 = vor.u32 %v8727_v1, %v7915_v0  ;;  %v7920_v10 = vor.u32 %v8711_v2, %v7917_v4  ;;  %v7531_v36 = vld [vmem:[%s10116_s15 + $0x220] sm:$0xf]  ;;  %v8615_v38 = vld [vmem:[%s10116_s15 + $0x224] sm:$0xf] }
 0x5f5   : > { %v7924_v11 = vor.u32 %v8728_v6, %v7923_v5  ;;  %v8631_v37 = vld [vmem:[%s10116_s15 + $0x29c] sm:$0xf0]  ;;  %v7533_v41 = vld [vmem:[%s10116_s15 + $0x2a0] sm:$0xf0]  ;;  %v8632_v43 = vld [vmem:[%s10116_s15 + $0x2a4] sm:$0xf0] }
 0x5f6   : > { %5405 = vmatpush.bf16.msrb.mxu0 %v7516_v12  ;;  %5418 = vmatpush.bf16.msrb.mxu1 %v7520_v13  ;;  %v7787_v12 = vld [vmem:[%s10116_s15 + $0x420] sm:$0xf]  ;;  %v7532_v46 = vor.u32 %v8631_v37, %v7531_v36  ;;  %v7536_v47 = vor.u32 %v8615_v38, %v7533_v41  ;;  %v7405_v53 = vld [vmem:[%s10116_s15 + $0x1a0] sm:$0xf0]  ;;  %v7411_v54 = vld [vmem:[%s10116_s15 + $0x128] sm:$0xf] }
 0x5f7   : > { %5431 = vmatpush.bf16.msrb.mxu2 %v7524_v14  ;;  %v8695_v13 = vld [vmem:[%s10116_s15 + $0x49c] sm:$0xf0]  ;;  %v8679_v14 = vld [vmem:[%s10116_s15 + $0x424] sm:$0xf]  ;;  %v8584_v56 = vld [vmem:[%s10116_s15 + $0x12c] sm:$0xf] }
 0x5f8   : > { %5444 = vmatpush.bf16.msrb.mxu3 %v7528_v18  ;;  %v8696_v18 = vld [vmem:[%s10116_s15 + $0x4a4] sm:$0xf0]  ;;  %v7788_v21 = vor.u32 %v8695_v13, %v7787_v12  ;;  %v7792_v22 = vor.u32 %v8679_v14, %v7789_v16  ;;  %v7413_v57 = vld [vmem:[%s10116_s15 + $0x1a8] sm:$0xf0]  ;;  %v7275_v59 = vld [vmem:[%s10116_s15 + $0x20] sm:$0xf] }
 0x5f9   : > { %v7796_v23 = vor.u32 %v8696_v18, %v7795_v17  ;;  %v8567_v60 = vld [vmem:[%s10116_s15 + $0x9c] sm:$0xf0]  ;;  %v7277_v0 = vld [vmem:[%s10116_s15 + $0xa0] sm:$0xf0]  ;;  %v7283_v1 = vld [vmem:[%s10116_s15 + $0x28] sm:$0xf]  ;;  %v7416_v2 = vor.u32 %v8584_v56, %v7413_v57 }
 0x5fa   : > { %5406 = vmatpush.bf16.msrb.mxu0 %v7388_v24  ;;  %5419 = vmatpush.bf16.msrb.mxu1 %v7392_v27  ;;  %v7659_v24 = vld [vmem:[%s10116_s15 + $0x320] sm:$0xf]  ;;  %v7800_v27 = vor.u32 %v8680_v19, %v7797_v20  ;;  %v8552_v4 = vld [vmem:[%s10116_s15 + $0x2c] sm:$0xf]  ;;  %v8187_v6 = vld [vmem:[%s10116_s15 + $0x730] sm:$0xf] }
 0x5fb   : > { %5432 = vmatpush.bf16.msrb.mxu2 %v7396_v28  ;;  %v7661_v28 = vld [vmem:[%s10116_s15 + $0x3a0] sm:$0xf0]  ;;  %v7660_v33 = vor.u32 %v8663_v25, %v7659_v24  ;;  %v7285_v5 = vld [vmem:[%s10116_s15 + $0xa8] sm:$0xf0]  ;;  %v8793_v7 = vld [vmem:[%s10116_s15 + $0x7ac] sm:$0xf0] }
 0x5fc   : > { %5445 = vmatpush.bf16.msrb.mxu3 %v7400_v32  ;;  %v7669_v32 = vld [vmem:[%s10116_s15 + $0x3a8] sm:$0xf0]  ;;  %v7664_v34 = vor.u32 %v8647_v26, %v7661_v28  ;;  %v8777_v8 = vld [vmem:[%s10116_s15 + $0x734] sm:$0xf]  ;;  %v8794_v12 = vld [vmem:[%s10116_s15 + $0x7b4] sm:$0xf0]  ;;  %v7288_v17 = vor.u32 %v8552_v4, %v7285_v5  ;;  %v8188_v18 = vor.u32 %v8793_v7, %v8187_v6 }
 0x5fd   : > { %v8197_v16 = vld [vmem:[%s10116_s15 + $0x7b8] sm:$0xf0]  ;;  %v8061_v25 = vld [vmem:[%s10116_s15 + $0x6b0] sm:$0xf0]  ;;  %v8067_v26 = vld [vmem:[%s10116_s15 + $0x638] sm:$0xf] }
 0x5fe   : > { %5407 = vmatpush.bf16.msrb.mxu0 %v7260_v39  ;;  %5420 = vmatpush.bf16.msrb.mxu1 %v7264_v44  ;;  %v7672_v39 = vor.u32 %v8648_v31, %v7669_v32  ;;  %v8616_v44 = vld [vmem:[%s10116_s15 + $0x22c] sm:$0xf]  ;;  %v8746_v28 = vld [vmem:[%s10116_s15 + $0x63c] sm:$0xf]  ;;  %v7933_v37 = vld [vmem:[%s10116_s15 + $0x5b0] sm:$0xf0] }
 0x5ff   : > { %5433 = vmatpush.bf16.msrb.mxu2 %v7268_v45  ;;  %v7541_v45 = vld [vmem:[%s10116_s15 + $0x2a8] sm:$0xf0]  ;;  %v8069_v29 = vld [vmem:[%s10116_s15 + $0x6b8] sm:$0xf0]  ;;  %v7939_v38 = vld [vmem:[%s10116_s15 + $0x538] sm:$0xf] }
 0x600   : > { %5446 = vmatpush.bf16.msrb.mxu3 %v7272_v48  ;;  %v7540_v48 = vor.u32 %v8632_v43, %v7539_v42  ;;  %v7544_v52 = vor.u32 %v8616_v44, %v7541_v45  ;;  %v8072_v36 = vor.u32 %v8746_v28, %v8069_v29  ;;  %v8714_v41 = vld [vmem:[%s10116_s15 + $0x53c] sm:$0xf]  ;;  %v7547_v6 = vld [vmem:[%s10116_s15 + $0x230] sm:$0xf] }
 0x601   : > { %5408 = vmatmul.bf16.vlgmr.msrb.gmra.mxu0 %v10566_v40  ;;  %5421 = vmatmul.bf16.vlgmr.msrb.gmra.mxu1 %v10566_v40  ;;  %v7941_v42 = vld [vmem:[%s10116_s15 + $0x5b8] sm:$0xf0]  ;;  %v8633_v7 = vld [vmem:[%s10116_s15 + $0x2ac] sm:$0xf0] }
 0x602   : > { %5452 = vmatpush.bf16.msra.mxu0 %v8172_v49  ;;  %5465 = vmatpush.bf16.msra.mxu1 %v8176_v50  ;;  %v7403_v49 = vld [vmem:[%s10116_s15 + $0x120] sm:$0xf]  ;;  %v7291_v28 = vld [vmem:[%s10116_s15 + $0x30] sm:$0xf] }
 0x603   : > { %5478 = vmatpush.bf16.msra.mxu2 %v8180_v51  ;;  %5447 = vmatmul.bf16.vlgmr.msrb.gmra.mxu3 %v10566_v40  ;;  %v8599_v50 = vld [vmem:[%s10116_s15 + $0x19c] sm:$0xf0]  ;;  %v8583_v51 = vld [vmem:[%s10116_s15 + $0x124] sm:$0xf]  ;;  %v8569_v29 = vld [vmem:[%s10116_s15 + $0xac] sm:$0xf0] }
 0x604   : > { %5491 = vmatpush.bf16.msra.mxu3 %v8184_v55  ;;  %5434 = vmatmul.bf16.vlgmr.msrb.gmra.mxu2 %v10566_v40  ;;  %v8600_v55 = vld [vmem:[%s10116_s15 + $0x1a4] sm:$0xf0]  ;;  %v7404_v58 = vor.u32 %v8599_v50, %v7403_v49  ;;  %v7944_v49 = vor.u32 %v8714_v41, %v7941_v42  ;;  %v7805_v50 = vld [vmem:[%s10116_s15 + $0x4b0] sm:$0xf0]  ;;  %v8795_v41 = vld [vmem:[%s10116_s15 + $0x7bc] sm:$0xf0] }
 0x605   : > { %v8779_v42 = vld [vmem:[%s10116_s15 + $0x744] sm:$0xf] }
 0x606   : > { %5453 = vmatpush.bf16.msra.mxu0 %v8044_v61  ;;  %5466 = vmatpush.bf16.msra.mxu1 %v8048_v62  ;;  %v7408_v61 = vor.u32 %v8583_v51, %v7405_v53  ;;  %v7412_v62 = vor.u32 %v8600_v55, %v7411_v54  ;;  %v7811_v51 = vld [vmem:[%s10116_s15 + $0x438] sm:$0xf]  ;;  %v8682_v53 = vld [vmem:[%s10116_s15 + $0x43c] sm:$0xf] }
 0x607   : > { %5479 = vmatpush.bf16.msra.mxu2 %v8052_v63  ;;  %v8551_v63 = vld [vmem:[%s10116_s15 + $0x24] sm:$0xf]  ;;  %v7813_v54 = vld [vmem:[%s10116_s15 + $0x4b8] sm:$0xf0] }
 0x608   : > { %5492 = vmatpush.bf16.msra.mxu3 %v8056_v3  ;;  %v8568_v3 = vld [vmem:[%s10116_s15 + $0xa4] sm:$0xf0]  ;;  %v7280_v13 = vor.u32 %v8551_v63, %v7277_v0  ;;  %v7683_v63 = vld [vmem:[%s10116_s15 + $0x338] sm:$0xf] }
 0x609   : > { %v7284_v14 = vor.u32 %v8568_v3, %v7283_v1  ;;  %v8666_v0 = vld [vmem:[%s10116_s15 + $0x3b4] sm:$0xf0]  ;;  %v8650_v1 = vld [vmem:[%s10116_s15 + $0x33c] sm:$0xf] }
 0x60a   : > { %5454 = vmatpush.bf16.msra.mxu0 %v7916_v9  ;;  %5467 = vmatpush.bf16.msra.mxu1 %v7920_v10  ;;  %v7276_v9 = vor.u32 %v8567_v60, %v7275_v59  ;;  %v8189_v10 = vld [vmem:[%s10116_s15 + $0x7b0] sm:$0xf0]  ;;  %v8665_v59 = vld [vmem:[%s10116_s15 + $0x3ac] sm:$0xf0]  ;;  %v7684_v5 = vor.u32 %v8666_v0, %v7683_v63  ;;  %v8085_v63 = vld [vmem:[%s10116_s15 + $0x6c8] sm:$0xf0] }
 0x60b   : > { %5480 = vmatpush.bf16.msra.mxu2 %v7924_v11  ;;  %v8195_v11 = vld [vmem:[%s10116_s15 + $0x738] sm:$0xf]  ;;  %v8192_v19 = vor.u32 %v8777_v8, %v8189_v10  ;;  %v8649_v60 = vld [vmem:[%s10116_s15 + $0x334] sm:$0xf] }
 0x60c   : > { %5493 = vmatpush.bf16.msra.mxu3 %v7928_v15  ;;  %v8778_v15 = vld [vmem:[%s10116_s15 + $0x73c] sm:$0xf]  ;;  %v8196_v20 = vor.u32 %v8794_v12, %v8195_v11  ;;  %v8617_v8 = vld [vmem:[%s10116_s15 + $0x234] sm:$0xf]  ;;  %v7555_v11 = vld [vmem:[%s10116_s15 + $0x238] sm:$0xf] }
 0x60d   : > { %v8200_v24 = vor.u32 %v8778_v15, %v8197_v16  ;;  %v7549_v10 = vld [vmem:[%s10116_s15 + $0x2b0] sm:$0xf0]  ;;  %v8634_v12 = vld [vmem:[%s10116_s15 + $0x2b4] sm:$0xf0]  ;;  %v7548_v15 = vor.u32 %v8633_v7, %v7547_v6  ;;  %v7949_v7 = vld [vmem:[%s10116_s15 + $0x5c0] sm:$0xf0] }
 0x60e   : > { %5455 = vmatpush.bf16.msra.mxu0 %v7788_v21  ;;  %5468 = vmatpush.bf16.msra.mxu1 %v7792_v22  ;;  %v8059_v21 = vld [vmem:[%s10116_s15 + $0x630] sm:$0xf]  ;;  %v7552_v16 = vor.u32 %v8617_v8, %v7549_v10  ;;  %v7955_v8 = vld [vmem:[%s10116_s15 + $0x548] sm:$0xf]  ;;  %v8716_v10 = vld [vmem:[%s10116_s15 + $0x54c] sm:$0xf] }
 0x60f   : > { %5481 = vmatpush.bf16.msra.mxu2 %v7796_v23  ;;  %v8761_v22 = vld [vmem:[%s10116_s15 + $0x6ac] sm:$0xf0]  ;;  %v8745_v23 = vld [vmem:[%s10116_s15 + $0x634] sm:$0xf] }
 0x610   : > { %5494 = vmatpush.bf16.msra.mxu3 %v7800_v27  ;;  %v8762_v27 = vld [vmem:[%s10116_s15 + $0x6b4] sm:$0xf0]  ;;  %v8060_v30 = vor.u32 %v8761_v22, %v8059_v21  ;;  %v8064_v31 = vor.u32 %v8745_v23, %v8061_v25  ;;  %v7421_v22 = vld [vmem:[%s10116_s15 + $0x1b0] sm:$0xf0]  ;;  %v8586_v25 = vld [vmem:[%s10116_s15 + $0x13c] sm:$0xf] }
 0x611   : > { %v8068_v32 = vor.u32 %v8762_v27, %v8067_v26  ;;  %v7427_v23 = vld [vmem:[%s10116_s15 + $0x138] sm:$0xf]  ;;  %v7429_v26 = vld [vmem:[%s10116_s15 + $0x1b8] sm:$0xf0] }
 0x612   : > { %5456 = vmatpush.bf16.msra.mxu0 %v7660_v33  ;;  %5469 = vmatpush.bf16.msra.mxu1 %v7664_v34  ;;  %v7931_v33 = vld [vmem:[%s10116_s15 + $0x530] sm:$0xf] }
 0x613   : > { %5482 = vmatpush.bf16.msra.mxu2 %v7668_v35  ;;  %v8729_v34 = vld [vmem:[%s10116_s15 + $0x5ac] sm:$0xf0]  ;;  %v8713_v35 = vld [vmem:[%s10116_s15 + $0x534] sm:$0xf] }
 0x614   : > { %5495 = vmatpush.bf16.msra.mxu3 %v7672_v39  ;;  %v8730_v39 = vld [vmem:[%s10116_s15 + $0x5b4] sm:$0xf0]  ;;  %v7932_v43 = vor.u32 %v8729_v34, %v7931_v33  ;;  %v7936_v44 = vor.u32 %v8713_v35, %v7933_v37  ;;  %v7293_v33 = vld [vmem:[%s10116_s15 + $0xb0] sm:$0xf0]  ;;  %v7432_v35 = vor.u32 %v8586_v25, %v7429_v26  ;;  %v8554_v37 = vld [vmem:[%s10116_s15 + $0x3c] sm:$0xf] }
 0x615   : > { %v7940_v45 = vor.u32 %v8730_v39, %v7939_v38  ;;  %v7299_v34 = vld [vmem:[%s10116_s15 + $0x38] sm:$0xf]  ;;  %v7301_v38 = vld [vmem:[%s10116_s15 + $0xb8] sm:$0xf0]  ;;  %v8203_v39 = vld [vmem:[%s10116_s15 + $0x740] sm:$0xf] }
 0x616   : > { %5457 = vmatpush.bf16.msra.mxu0 %v7532_v46  ;;  %5470 = vmatpush.bf16.msra.mxu1 %v7536_v47  ;;  %v7803_v46 = vld [vmem:[%s10116_s15 + $0x430] sm:$0xf]  ;;  %v7691_v26 = vld [vmem:[%s10116_s15 + $0x340] sm:$0xf] }
 0x617   : > { %5483 = vmatpush.bf16.msra.mxu2 %v7540_v48  ;;  %v8697_v47 = vld [vmem:[%s10116_s15 + $0x4ac] sm:$0xf0]  ;;  %v8681_v48 = vld [vmem:[%s10116_s15 + $0x434] sm:$0xf] }
 0x618   : > { %5496 = vmatpush.bf16.msra.mxu3 %v7544_v52  ;;  %v8698_v52 = vld [vmem:[%s10116_s15 + $0x4b4] sm:$0xf0]  ;;  %v7804_v55 = vor.u32 %v8697_v47, %v7803_v46  ;;  %v7808_v56 = vor.u32 %v8681_v48, %v7805_v50  ;;  %v8796_v46 = vld [vmem:[%s10116_s15 + $0x7c4] sm:$0xf0]  ;;  %v8213_v50 = vld [vmem:[%s10116_s15 + $0x7c8] sm:$0xf0] }
 0x619   : > { %v7812_v57 = vor.u32 %v8698_v52, %v7811_v51  ;;  %v7304_v51 = vor.u32 %v8554_v37, %v7301_v38  ;;  %v8204_v52 = vor.u32 %v8795_v41, %v8203_v39  ;;  %v7563_v38 = vld [vmem:[%s10116_s15 + $0x240] sm:$0xf]  ;;  %v8619_v41 = vld [vmem:[%s10116_s15 + $0x244] sm:$0xf] }
 0x61a   : > { %5458 = vmatpush.bf16.msra.mxu0 %v7404_v58  ;;  %5471 = vmatpush.bf16.msra.mxu1 %v7408_v61  ;;  %v7675_v58 = vld [vmem:[%s10116_s15 + $0x330] sm:$0xf]  ;;  %v7816_v61 = vor.u32 %v8682_v53, %v7813_v54  ;;  %v8635_v39 = vld [vmem:[%s10116_s15 + $0x2bc] sm:$0xf0] }
 0x61b   : > { %5484 = vmatpush.bf16.msra.mxu2 %v7412_v62  ;;  %v7677_v62 = vld [vmem:[%s10116_s15 + $0x3b0] sm:$0xf0]  ;;  %v7676_v3 = vor.u32 %v8665_v59, %v7675_v58  ;;  %v8077_v59 = vld [vmem:[%s10116_s15 + $0x6c0] sm:$0xf0] }
 0x61c   : > { %5497 = vmatpush.bf16.msra.mxu3 %v7416_v2  ;;  %v7685_v2 = vld [vmem:[%s10116_s15 + $0x3b8] sm:$0xf0]  ;;  %v7680_v4 = vor.u32 %v8649_v60, %v7677_v62  ;;  %v8083_v60 = vld [vmem:[%s10116_s15 + $0x648] sm:$0xf]  ;;  %v8748_v62 = vld [vmem:[%s10116_s15 + $0x64c] sm:$0xf] }
 0x61d   : > { %v8088_v6 = vor.u32 %v8748_v62, %v8085_v63  ;;  %v8571_v62 = vld [vmem:[%s10116_s15 + $0xbc] sm:$0xf0] }
 0x61e   : > { %5459 = vmatpush.bf16.msra.mxu0 %v7276_v9  ;;  %5472 = vmatpush.bf16.msra.mxu1 %v7280_v13  ;;  %v7688_v9 = vor.u32 %v8650_v1, %v7685_v2  ;;  %v8618_v13 = vld [vmem:[%s10116_s15 + $0x23c] sm:$0xf] }
 0x61f   : > { %5485 = vmatpush.bf16.msra.mxu2 %v7284_v14  ;;  %v7557_v14 = vld [vmem:[%s10116_s15 + $0x2b8] sm:$0xf0] }
 0x620   : > { %5498 = vmatpush.bf16.msra.mxu3 %v7288_v17  ;;  %v7556_v17 = vor.u32 %v8634_v12, %v7555_v11  ;;  %v7560_v21 = vor.u32 %v8618_v13, %v7557_v14  ;;  %v7957_v11 = vld [vmem:[%s10116_s15 + $0x5c8] sm:$0xf0] }
 0x621   : > { %5460 = vmatmul.bf16.vlgmr.msra.gmra.mxu0 %v10566_v40  ;;  %5473 = vmatmul.bf16.vlgmr.msra.gmra.mxu1 %v10566_v40 }
 0x622   : > { %5504 = vmatpush.bf16.msrb.mxu0 %v8188_v18  ;;  %5517 = vmatpush.bf16.msrb.mxu1 %v8192_v19  ;;  %v7419_v18 = vld [vmem:[%s10116_s15 + $0x130] sm:$0xf] }
 0x623   : > { %5530 = vmatpush.bf16.msrb.mxu2 %v8196_v20  ;;  %5499 = vmatmul.bf16.vlgmr.msra.gmra.mxu3 %v10566_v40  ;;  %v8601_v19 = vld [vmem:[%s10116_s15 + $0x1ac] sm:$0xf0]  ;;  %v8585_v20 = vld [vmem:[%s10116_s15 + $0x134] sm:$0xf] }
 0x624   : > { %5543 = vmatpush.bf16.msrb.mxu3 %v8200_v24  ;;  %5486 = vmatmul.bf16.vlgmr.msra.gmra.mxu2 %v10566_v40  ;;  %v8602_v24 = vld [vmem:[%s10116_s15 + $0x1b4] sm:$0xf0]  ;;  %v7420_v27 = vor.u32 %v8601_v19, %v7419_v18  ;;  %v7960_v18 = vor.u32 %v8716_v10, %v7957_v11  ;;  %v7821_v19 = vld [vmem:[%s10116_s15 + $0x4c0] sm:$0xf0]  ;;  %v8781_v10 = vld [vmem:[%s10116_s15 + $0x754] sm:$0xf] }
 0x626   : > { %5505 = vmatpush.bf16.msrb.mxu0 %v8060_v30  ;;  %5518 = vmatpush.bf16.msrb.mxu1 %v8064_v31  ;;  %v7424_v30 = vor.u32 %v8585_v20, %v7421_v22  ;;  %v7428_v31 = vor.u32 %v8602_v24, %v7427_v23  ;;  %v7827_v20 = vld [vmem:[%s10116_s15 + $0x448] sm:$0xf]  ;;  %v8684_v22 = vld [vmem:[%s10116_s15 + $0x44c] sm:$0xf] }
 0x627   : > { %5531 = vmatpush.bf16.msrb.mxu2 %v8068_v32  ;;  %v8553_v32 = vld [vmem:[%s10116_s15 + $0x34] sm:$0xf] }
 0x628   : > { %5544 = vmatpush.bf16.msrb.mxu3 %v8072_v36  ;;  %v8570_v36 = vld [vmem:[%s10116_s15 + $0xb4] sm:$0xf0]  ;;  %v7296_v47 = vor.u32 %v8553_v32, %v7293_v33  ;;  %v8668_v32 = vld [vmem:[%s10116_s15 + $0x3c4] sm:$0xf0]  ;;  %v8652_v33 = vld [vmem:[%s10116_s15 + $0x34c] sm:$0xf] }
 0x629   : > { %v7300_v48 = vor.u32 %v8570_v36, %v7299_v34  ;;  %v7701_v34 = vld [vmem:[%s10116_s15 + $0x3c8] sm:$0xf0] }
 0x62a   : > { %5506 = vmatpush.bf16.msrb.mxu0 %v7932_v43  ;;  %5519 = vmatpush.bf16.msrb.mxu1 %v7936_v44  ;;  %v7292_v43 = vor.u32 %v8569_v29, %v7291_v28  ;;  %v8205_v44 = vld [vmem:[%s10116_s15 + $0x7c0] sm:$0xf0] }
 0x62b   : > { %5532 = vmatpush.bf16.msrb.mxu2 %v7940_v45  ;;  %v8211_v45 = vld [vmem:[%s10116_s15 + $0x748] sm:$0xf]  ;;  %v8208_v53 = vor.u32 %v8779_v42, %v8205_v44  ;;  %v8651_v28 = vld [vmem:[%s10116_s15 + $0x344] sm:$0xf]  ;;  %v7704_v42 = vor.u32 %v8652_v33, %v7701_v34  ;;  %v7963_v34 = vld [vmem:[%s10116_s15 + $0x550] sm:$0xf] }
 0x62c   : > { %5545 = vmatpush.bf16.msrb.mxu3 %v7944_v49  ;;  %v8780_v49 = vld [vmem:[%s10116_s15 + $0x74c] sm:$0xf]  ;;  %v8212_v54 = vor.u32 %v8796_v46, %v8211_v45  ;;  %v7571_v44 = vld [vmem:[%s10116_s15 + $0x248] sm:$0xf] }
 0x62d   : > { %v8216_v58 = vor.u32 %v8780_v49, %v8213_v50  ;;  %v8636_v45 = vld [vmem:[%s10116_s15 + $0x2c4] sm:$0xf0]  ;;  %v8620_v46 = vld [vmem:[%s10116_s15 + $0x24c] sm:$0xf] }
 0x62e   : > { %5507 = vmatpush.bf16.msrb.mxu0 %v7804_v55  ;;  %5520 = vmatpush.bf16.msrb.mxu1 %v7808_v56  ;;  %v8075_v55 = vld [vmem:[%s10116_s15 + $0x640] sm:$0xf]  ;;  %v7572_v50 = vor.u32 %v8636_v45, %v7571_v44  ;;  %v7973_v44 = vld [vmem:[%s10116_s15 + $0x5d8] sm:$0xf0] }
 0x62f   : > { %5533 = vmatpush.bf16.msrb.mxu2 %v7812_v57  ;;  %v8763_v56 = vld [vmem:[%s10116_s15 + $0x6bc] sm:$0xf0]  ;;  %v8747_v57 = vld [vmem:[%s10116_s15 + $0x644] sm:$0xf] }
 0x630   : > { %5546 = vmatpush.bf16.msrb.mxu3 %v7816_v61  ;;  %v8764_v61 = vld [vmem:[%s10116_s15 + $0x6c4] sm:$0xf0]  ;;  %v8076_v0 = vor.u32 %v8763_v56, %v8075_v55  ;;  %v8080_v1 = vor.u32 %v8747_v57, %v8077_v59  ;;  %v7437_v55 = vld [vmem:[%s10116_s15 + $0x1c0] sm:$0xf0]  ;;  %v7445_v59 = vld [vmem:[%s10116_s15 + $0x1c8] sm:$0xf0] }
 0x631   : > { %v8084_v2 = vor.u32 %v8764_v61, %v8083_v60  ;;  %v7443_v56 = vld [vmem:[%s10116_s15 + $0x148] sm:$0xf]  ;;  %v7307_v61 = vld [vmem:[%s10116_s15 + $0x40] sm:$0xf] }
 0x632   : > { %5508 = vmatpush.bf16.msrb.mxu0 %v7676_v3  ;;  %5521 = vmatpush.bf16.msrb.mxu1 %v7680_v4  ;;  %v7947_v3 = vld [vmem:[%s10116_s15 + $0x540] sm:$0xf]  ;;  %v8604_v57 = vld [vmem:[%s10116_s15 + $0x1c4] sm:$0xf0]  ;;  %v7308_v11 = vor.u32 %v8571_v62, %v7307_v61 }
 0x633   : > { %5534 = vmatpush.bf16.msrb.mxu2 %v7684_v5  ;;  %v8731_v4 = vld [vmem:[%s10116_s15 + $0x5bc] sm:$0xf0]  ;;  %v8715_v5 = vld [vmem:[%s10116_s15 + $0x544] sm:$0xf] }
 0x634   : > { %5547 = vmatpush.bf16.msrb.mxu3 %v7688_v9  ;;  %v8732_v9 = vld [vmem:[%s10116_s15 + $0x5c4] sm:$0xf0]  ;;  %v7948_v12 = vor.u32 %v8731_v4, %v7947_v3  ;;  %v7952_v13 = vor.u32 %v8715_v5, %v7949_v7  ;;  %v7317_v7 = vld [vmem:[%s10116_s15 + $0xc8] sm:$0xf0] }
 0x635   : > { %v7956_v14 = vor.u32 %v8732_v9, %v7955_v8  ;;  %v7315_v3 = vld [vmem:[%s10116_s15 + $0x48] sm:$0xf]  ;;  %v8219_v8 = vld [vmem:[%s10116_s15 + $0x750] sm:$0xf] }
 0x636   : > { %5509 = vmatpush.bf16.msrb.mxu0 %v7548_v15  ;;  %5522 = vmatpush.bf16.msrb.mxu1 %v7552_v16  ;;  %v7819_v15 = vld [vmem:[%s10116_s15 + $0x440] sm:$0xf]  ;;  %v8572_v5 = vld [vmem:[%s10116_s15 + $0xc4] sm:$0xf0]  ;;  %v8797_v9 = vld [vmem:[%s10116_s15 + $0x7cc] sm:$0xf0] }
 0x637   : > { %5535 = vmatpush.bf16.msrb.mxu2 %v7556_v17  ;;  %v8699_v16 = vld [vmem:[%s10116_s15 + $0x4bc] sm:$0xf0]  ;;  %v8683_v17 = vld [vmem:[%s10116_s15 + $0x444] sm:$0xf] }
 0x638   : > { %5548 = vmatpush.bf16.msrb.mxu3 %v7560_v21  ;;  %v8700_v21 = vld [vmem:[%s10116_s15 + $0x4c4] sm:$0xf0]  ;;  %v7820_v23 = vor.u32 %v8699_v16, %v7819_v15  ;;  %v7824_v24 = vor.u32 %v8683_v17, %v7821_v19  ;;  %v7316_v16 = vor.u32 %v8572_v5, %v7315_v3  ;;  %v8782_v17 = vld [vmem:[%s10116_s15 + $0x75c] sm:$0xf]  ;;  %v7715_v3 = vld [vmem:[%s10116_s15 + $0x358] sm:$0xf] }
 0x639   : > { %v7828_v25 = vor.u32 %v8700_v21, %v7827_v20  ;;  %v8220_v20 = vor.u32 %v8797_v9, %v8219_v8  ;;  %v7579_v9 = vld [vmem:[%s10116_s15 + $0x250] sm:$0xf] }
 0x63a   : > { %5510 = vmatpush.bf16.msrb.mxu0 %v7420_v27  ;;  %5523 = vmatpush.bf16.msrb.mxu1 %v7424_v30  ;;  %v8667_v27 = vld [vmem:[%s10116_s15 + $0x3bc] sm:$0xf0]  ;;  %v7693_v30 = vld [vmem:[%s10116_s15 + $0x3c0] sm:$0xf0] }
 0x63b   : > { %5536 = vmatpush.bf16.msrb.mxu2 %v7428_v31  ;;  %v7699_v31 = vld [vmem:[%s10116_s15 + $0x348] sm:$0xf]  ;;  %v7696_v36 = vor.u32 %v8651_v28, %v7693_v30  ;;  %v8766_v28 = vld [vmem:[%s10116_s15 + $0x6d4] sm:$0xf0]  ;;  %v8101_v30 = vld [vmem:[%s10116_s15 + $0x6d8] sm:$0xf0] }
 0x63c   : > { %5549 = vmatpush.bf16.msrb.mxu3 %v7432_v35  ;;  %v7692_v35 = vor.u32 %v8667_v27, %v7691_v26  ;;  %v7700_v37 = vor.u32 %v8668_v32, %v7699_v31  ;;  %v8093_v26 = vld [vmem:[%s10116_s15 + $0x6d0] sm:$0xf0]  ;;  %v8099_v27 = vld [vmem:[%s10116_s15 + $0x658] sm:$0xf] }
 0x63d   : > { %v8100_v33 = vor.u32 %v8766_v28, %v8099_v27  ;;  %v7451_v28 = vld [vmem:[%s10116_s15 + $0x150] sm:$0xf] }
 0x63e   : > { %5511 = vmatpush.bf16.msrb.mxu0 %v7292_v43  ;;  %5524 = vmatpush.bf16.msrb.mxu1 %v7296_v47  ;;  %v7565_v43 = vld [vmem:[%s10116_s15 + $0x2c0] sm:$0xf0]  ;;  %v7573_v47 = vld [vmem:[%s10116_s15 + $0x2c8] sm:$0xf0] }
 0x63f   : > { %5537 = vmatpush.bf16.msrb.mxu2 %v7300_v48  ;;  %v7564_v48 = vor.u32 %v8635_v39, %v7563_v38  ;;  %v7568_v49 = vor.u32 %v8619_v41, %v7565_v43  ;;  %v7965_v38 = vld [vmem:[%s10116_s15 + $0x5d0] sm:$0xf0]  ;;  %v7971_v39 = vld [vmem:[%s10116_s15 + $0x558] sm:$0xf]  ;;  %v8718_v43 = vld [vmem:[%s10116_s15 + $0x55c] sm:$0xf] }
 0x640   : > { %5550 = vmatpush.bf16.msrb.mxu3 %v7304_v51  ;;  %v7435_v51 = vld [vmem:[%s10116_s15 + $0x140] sm:$0xf]  ;;  %v8734_v41 = vld [vmem:[%s10116_s15 + $0x5d4] sm:$0xf0] }
 0x641   : > { %5512 = vmatmul.bf16.vlgmr.msrb.gmra.mxu0 %v10566_v40  ;;  %5525 = vmatmul.bf16.vlgmr.msrb.gmra.mxu1 %v10566_v40 }
 0x642   : > { %5556 = vmatpush.bf16.msra.mxu0 %v8204_v52  ;;  %5569 = vmatpush.bf16.msra.mxu1 %v8208_v53  ;;  %v8603_v52 = vld [vmem:[%s10116_s15 + $0x1bc] sm:$0xf0]  ;;  %v8587_v53 = vld [vmem:[%s10116_s15 + $0x144] sm:$0xf] }
 0x643   : > { %5582 = vmatpush.bf16.msra.mxu2 %v8212_v54  ;;  %5551 = vmatmul.bf16.vlgmr.msrb.gmra.mxu3 %v10566_v40  ;;  %v7576_v54 = vor.u32 %v8620_v46, %v7573_v47  ;;  %v7436_v60 = vor.u32 %v8603_v52, %v7435_v51  ;;  %v7440_v63 = vor.u32 %v8587_v53, %v7437_v55  ;;  %v7835_v46 = vld [vmem:[%s10116_s15 + $0x450] sm:$0xf]  ;;  %v7837_v51 = vld [vmem:[%s10116_s15 + $0x4d0] sm:$0xf0]  ;;  %v7843_v53 = vld [vmem:[%s10116_s15 + $0x458] sm:$0xf] }
 0x644   : > { %5595 = vmatpush.bf16.msra.mxu3 %v8216_v58  ;;  %5538 = vmatmul.bf16.vlgmr.msrb.gmra.mxu2 %v10566_v40  ;;  %v7829_v40 = vld [vmem:[%s10116_s15 + $0x4c8] sm:$0xf0]  ;;  %v7976_v52 = vor.u32 %v8718_v43, %v7973_v44  ;;  %v10853_v55 = vld [vmem:[%s10123_s30] sm:$0xff]  ;;  %v7323_v44 = vld [vmem:[%s10116_s15 + $0x50] sm:$0xf] }
 0x645   : > { %v7832_v29 = vor.u32 %v8684_v22, %v7829_v40  ;;  %v8588_v58 = vld [vmem:[%s10116_s15 + $0x14c] sm:$0xf]  ;;  %v8091_v40 = vld [vmem:[%s10116_s15 + $0x650] sm:$0xf]  ;;  %v4005_v5 = vperm.slane %v10853_v55, 1 }
 0x646   : > { %5557 = vmatpush.bf16.msra.mxu0 %v8076_v0  ;;  %5570 = vmatpush.bf16.msra.mxu1 %v8080_v1  ;;  %v7444_v0 = vor.u32 %v8604_v57, %v7443_v56  ;;  %v8555_v1 = vld [vmem:[%s10116_s15 + $0x44] sm:$0xf]  ;;  %v7448_v4 = vor.u32 %v8588_v58, %v7445_v59  ;;  %v8686_v56 = vld [vmem:[%s10116_s15 + $0x45c] sm:$0xf]  ;;  %v7707_v59 = vld [vmem:[%s10116_s15 + $0x350] sm:$0xf] }
 0x647   : > { %5583 = vmatpush.bf16.msra.mxu2 %v8084_v2  ;;  %v7309_v2 = vld [vmem:[%s10116_s15 + $0xc0] sm:$0xf0]  ;;  %v7845_v57 = vld [vmem:[%s10116_s15 + $0x4d8] sm:$0xf0] }
 0x648   : > { %5596 = vmatpush.bf16.msra.mxu3 %v8088_v6  ;;  %v8556_v6 = vld [vmem:[%s10116_s15 + $0x4c] sm:$0xf]  ;;  %v7312_v15 = vor.u32 %v8555_v1, %v7309_v2  ;;  %v4004_v1 = vperm.slane %v10853_v55, 0  ;;  %v7848_v2 = vor.u32 %v8686_v56, %v7845_v57 }
 0x649   : > { %v7320_v19 = vor.u32 %v8556_v6, %v7317_v7  ;;  %v8654_v6 = vld [vmem:[%s10116_s15 + $0x35c] sm:$0xf] }
 0x64a   : > { %5558 = vmatpush.bf16.msra.mxu0 %v7948_v12  ;;  %5571 = vmatpush.bf16.msra.mxu1 %v7952_v13  ;;  %v8221_v12 = vld [vmem:[%s10116_s15 + $0x7d0] sm:$0xf0]  ;;  %v8227_v13 = vld [vmem:[%s10116_s15 + $0x758] sm:$0xf]  ;;  %v7717_v7 = vld [vmem:[%s10116_s15 + $0x3d8] sm:$0xf0] }
 0x64b   : > { %5584 = vmatpush.bf16.msra.mxu2 %v7956_v14  ;;  %v8798_v14 = vld [vmem:[%s10116_s15 + $0x7d4] sm:$0xf0]  ;;  %v8224_v21 = vor.u32 %v8781_v10, %v8221_v12 }
 0x64c   : > { %5597 = vmatpush.bf16.msra.mxu3 %v7960_v18  ;;  %v8229_v18 = vld [vmem:[%s10116_s15 + $0x7d8] sm:$0xf0]  ;;  %v8228_v22 = vor.u32 %v8798_v14, %v8227_v13  ;;  %v8637_v13 = vld [vmem:[%s10116_s15 + $0x2cc] sm:$0xf0]  ;;  %v8621_v14 = vld [vmem:[%s10116_s15 + $0x254] sm:$0xf] }
 0x64e   : > { %5559 = vmatpush.bf16.msra.mxu0 %v7820_v23  ;;  %5572 = vmatpush.bf16.msra.mxu1 %v7824_v24  ;;  %v8765_v23 = vld [vmem:[%s10116_s15 + $0x6cc] sm:$0xf0]  ;;  %v8749_v24 = vld [vmem:[%s10116_s15 + $0x654] sm:$0xf] }
 0x64f   : > { %5585 = vmatpush.bf16.msra.mxu2 %v7828_v25  ;;  %v8232_v25 = vor.u32 %v8782_v17, %v8229_v18  ;;  %v8092_v31 = vor.u32 %v8765_v23, %v8091_v40  ;;  %v8096_v32 = vor.u32 %v8749_v24, %v8093_v26  ;;  %v7720_v18 = vor.u32 %v8654_v6, %v7717_v7  ;;  %v8622_v40 = vld [vmem:[%s10116_s15 + $0x25c] sm:$0xf]  ;;  %v8245_v6 = vld [vmem:[%s10116_s15 + $0x7e8] sm:$0xf0] }
 0x650   : > { %5598 = vmatpush.bf16.msra.mxu3 %v7832_v29  ;;  %v8750_v29 = vld [vmem:[%s10116_s15 + $0x65c] sm:$0xf]  ;;  %v4007_v24 = vperm.slane %v10853_v55, 3 }
 0x651   : > { %v7589_v23 = vld [vmem:[%s10116_s15 + $0x2d8] sm:$0xf0] }
 0x652   : > { %5560 = vmatpush.bf16.msra.mxu0 %v7692_v35  ;;  %5573 = vmatpush.bf16.msra.mxu1 %v7696_v36  ;;  %v8733_v35 = vld [vmem:[%s10116_s15 + $0x5cc] sm:$0xf0]  ;;  %v8717_v36 = vld [vmem:[%s10116_s15 + $0x554] sm:$0xf] }
 0x653   : > { %5586 = vmatpush.bf16.msra.mxu2 %v7700_v37  ;;  %v8104_v37 = vor.u32 %v8750_v29, %v8101_v30  ;;  %v7964_v45 = vor.u32 %v8733_v35, %v7963_v34  ;;  %v7968_v47 = vor.u32 %v8717_v36, %v7965_v38  ;;  %v8605_v29 = vld [vmem:[%s10116_s15 + $0x1cc] sm:$0xf0]  ;;  %v8589_v30 = vld [vmem:[%s10116_s15 + $0x154] sm:$0xf]  ;;  %v7459_v34 = vld [vmem:[%s10116_s15 + $0x158] sm:$0xf] }
 0x654   : > { %5599 = vmatpush.bf16.msra.mxu3 %v7704_v42  ;;  %v10838_v42 = vld [vmem:[#allocation3] sm:$0xf]  ;;  %v8606_v35 = vld [vmem:[%s10116_s15 + $0x1d4] sm:$0xf0]  ;;  %v8590_v38 = vld [vmem:[%s10116_s15 + $0x15c] sm:$0xf]  ;;  %v7452_v43 = vor.u32 %v8605_v29, %v7451_v28 }
 0x655   : > { %v8719_v28 = vld [vmem:[%s10116_s15 + $0x564] sm:$0xf] }
 0x656   : > { %5561 = vmatpush.bf16.msra.mxu0 %v7564_v48  ;;  %5574 = vmatpush.bf16.msra.mxu1 %v7568_v49  ;;  %v7972_v48 = vor.u32 %v8734_v41, %v7971_v39  ;;  %v8701_v49 = vld [vmem:[%s10116_s15 + $0x4cc] sm:$0xf0]  ;;  %v7461_v39 = vld [vmem:[%s10116_s15 + $0x1d8] sm:$0xf0] }
 0x657   : > { %5587 = vmatpush.bf16.msra.mxu2 %v7572_v50  ;;  %v8685_v50 = vld [vmem:[%s10116_s15 + $0x454] sm:$0xf]  ;;  %v7836_v58 = vor.u32 %v8701_v49, %v7835_v46  ;;  %v7464_v57 = vor.u32 %v8590_v38, %v7461_v39 }
 0x658   : > { %5600 = vmatpush.bf16.msra.mxu3 %v7576_v54  ;;  %v8702_v54 = vld [vmem:[%s10116_s15 + $0x4d4] sm:$0xf0]  ;;  %v7840_v61 = vor.u32 %v8685_v50, %v7837_v51  ;;  %v8557_v46 = vld [vmem:[%s10116_s15 + $0x54] sm:$0xf]  ;;  %v7460_v50 = vor.u32 %v8606_v35, %v7459_v34  ;;  %v7989_v34 = vld [vmem:[%s10116_s15 + $0x5e8] sm:$0xf0] }
 0x659   : > { %v7844_v62 = vor.u32 %v8702_v54, %v7843_v53  ;;  %v7325_v51 = vld [vmem:[%s10116_s15 + $0xd0] sm:$0xf0]  ;;  %v8574_v53 = vld [vmem:[%s10116_s15 + $0xd4] sm:$0xf0] }
 0x65a   : > { %5562 = vmatpush.bf16.msra.mxu0 %v7436_v60  ;;  %5575 = vmatpush.bf16.msra.mxu1 %v7440_v63  ;;  %v8669_v60 = vld [vmem:[%s10116_s15 + $0x3cc] sm:$0xf0]  ;;  %v8653_v63 = vld [vmem:[%s10116_s15 + $0x354] sm:$0xf] }
 0x65b   : > { %5588 = vmatpush.bf16.msra.mxu2 %v7444_v0  ;;  %v7709_v0 = vld [vmem:[%s10116_s15 + $0x3d0] sm:$0xf0]  ;;  %v7708_v8 = vor.u32 %v8669_v60, %v7707_v59  ;;  %v7333_v59 = vld [vmem:[%s10116_s15 + $0xd8] sm:$0xf0]  ;;  %v8235_v60 = vld [vmem:[%s10116_s15 + $0x760] sm:$0xf] }
 0x65c   : > { %5601 = vmatpush.bf16.msra.mxu3 %v7448_v4  ;;  %v8670_v4 = vld [vmem:[%s10116_s15 + $0x3d4] sm:$0xf0] }
 0x65d   : > { %v7716_v12 = vor.u32 %v8670_v4, %v7715_v3  ;;  %v7328_v3 = vor.u32 %v8557_v46, %v7325_v51  ;;  %v7859_v46 = vld [vmem:[%s10116_s15 + $0x468] sm:$0xf] }
 0x65e   : > { %5563 = vmatpush.bf16.msra.mxu0 %v7308_v11  ;;  %5576 = vmatpush.bf16.msra.mxu1 %v7312_v15  ;;  %v5357_v10 = vpop.f32.mrf.mxu0  ;;  %v7712_v11 = vor.u32 %v8653_v63, %v7709_v0  ;;  %v7581_v15 = vld [vmem:[%s10116_s15 + $0x2d0] sm:$0xf0]  ;;  %v5370_v17 = vpop.f32.mrf.mxu1  ;;  %v8237_v0 = vld [vmem:[%s10116_s15 + $0x7e0] sm:$0xf0] }
 0x65f   : > { %5589 = vmatpush.bf16.msra.mxu2 %v7316_v16  ;;  %v5358_v16 = vadd.f32 %v5357_v10, %v4004_v1  ;;  %v7584_v26 = vor.u32 %v8621_v14, %v7581_v15  ;;  %v8243_v1 = vld [vmem:[%s10116_s15 + $0x768] sm:$0xf] }
 0x660   : > { %5602 = vmatpush.bf16.msra.mxu3 %v7320_v19  ;;  %v7587_v19 = vld [vmem:[%s10116_s15 + $0x258] sm:$0xf] }
 0x661   : > { %5564 = vmatmul.bf16.vlgmr.msra.gmra.mxu0 %v10838_v42  ;;  %5577 = vmatmul.bf16.vlgmr.msra.gmra.mxu1 %v10838_v42  ;;  %9036 = vtanh.f32 %v5358_v16 }
 0x662   : > { %5608 = vmatpush.bf16.msrb.mxu0 %v8220_v20  ;;  %5621 = vmatpush.bf16.msrb.mxu1 %v8224_v21  ;;  %v8638_v20 = vld [vmem:[%s10116_s15 + $0x2d4] sm:$0xf0]  ;;  %v5371_v21 = vadd.f32 %v5370_v17, %v4005_v5  ;;  %v8784_v5 = vld [vmem:[%s10116_s15 + $0x76c] sm:$0xf]  ;;  %v8751_v17 = vld [vmem:[%s10116_s15 + $0x664] sm:$0xf] }
 0x663   : > { %5634 = vmatpush.bf16.msrb.mxu2 %v8228_v22  ;;  %5603 = vmatmul.bf16.vlgmr.msra.gmra.mxu3 %v10838_v42  ;;  %v4006_v22 = vperm.slane %v10853_v55, 2  ;;  %v7588_v27 = vor.u32 %v8638_v20, %v7587_v19  ;;  %v8248_v19 = vor.u32 %v8784_v5, %v8245_v6  ;;  %v8115_v20 = vld [vmem:[%s10116_s15 + $0x668] sm:$0xf]  ;;  %v4011_v5 = vperm.slane %v10853_v55, 7 }
 0x664   : > { %5647 = vmatpush.bf16.msrb.mxu3 %v8232_v25  ;;  %5590 = vmatmul.bf16.vlgmr.msra.gmra.mxu2 %v10838_v42  ;;  %v7580_v25 = vor.u32 %v8637_v13, %v7579_v9  ;;  %9038 = vtanh.f32 %v5371_v21  ;;  %v8768_v21 = vld [vmem:[%s10116_s15 + $0x6e4] sm:$0xf0] }
 0x666   : > { %5609 = vmatpush.bf16.msrb.mxu0 %v8092_v31  ;;  %5622 = vmatpush.bf16.msrb.mxu1 %v8096_v32  ;;  %v7592_v32 = vor.u32 %v8622_v40, %v7589_v23  ;;  %v5372_v54 = vpop.f32.mrf.mxu1  ;;  %v8117_v40 = vld [vmem:[%s10116_s15 + $0x6e8] sm:$0xf0] }
 0x667   : > { %5635 = vmatpush.bf16.msrb.mxu2 %v8100_v33  ;;  %v5383_v31 = vpop.f32.mrf.mxu2  ;;  %v7453_v33 = vld [vmem:[%s10116_s15 + $0x1d0] sm:$0xf0] }
 0x668   : > { %5648 = vmatpush.bf16.msrb.mxu3 %v8104_v37  ;;  %v5384_v36 = vadd.f32 %v5383_v31, %v4006_v22  ;;  %v5396_v37 = vpop.f32.mrf.mxu3  ;;  %v7456_v49 = vor.u32 %v8589_v30, %v7453_v33  ;;  %v8752_v22 = vld [vmem:[%s10116_s15 + $0x66c] sm:$0xf]  ;;  %v7981_v30 = vld [vmem:[%s10116_s15 + $0x5e0] sm:$0xf0]  ;;  %v7987_v31 = vld [vmem:[%s10116_s15 + $0x568] sm:$0xf] }
 0x669   : > { %v5397_v41 = vadd.f32 %v5396_v37, %v4007_v24  ;;  %v8120_v29 = vor.u32 %v8752_v22, %v8117_v40  ;;  %v8720_v33 = vld [vmem:[%s10116_s15 + $0x56c] sm:$0xf]  ;;  %v8703_v37 = vld [vmem:[%s10116_s15 + $0x4dc] sm:$0xf0]  ;;  %v7984_v38 = vor.u32 %v8719_v28, %v7981_v30  ;;  %v7469_v28 = vld [vmem:[%s10116_s15 + $0x1e0] sm:$0xf0] }
 0x66a   : > { %5610 = vmatpush.bf16.msrb.mxu0 %v7964_v45  ;;  %5623 = vmatpush.bf16.msrb.mxu1 %v7968_v47  ;;  %v8573_v45 = vld [vmem:[%s10116_s15 + $0xcc] sm:$0xf0]  ;;  %9040 = vtanh.f32 %v5384_v36  ;;  %v5359_v47 = vpop.f32.mrf.mxu0  ;;  %v7851_v36 = vld [vmem:[%s10116_s15 + $0x460] sm:$0xf] }
 0x66b   : > { %5636 = vmatpush.bf16.msrb.mxu2 %v7972_v48  ;;  %v9037_v48 = vpop.eup %9036  ;;  %9042 = vtanh.f32 %v5397_v41  ;;  %v7324_v63 = vor.u32 %v8573_v45, %v7323_v44  ;;  %v8687_v41 = vld [vmem:[%s10116_s15 + $0x464] sm:$0xf]  ;;  %v4008_v44 = vperm.slane %v10853_v55, 4  ;;  %v7992_v45 = vor.u32 %v8720_v33, %v7989_v34  ;;  %v8704_v47 = vld [vmem:[%s10116_s15 + $0x4e4] sm:$0xf0] }
 0x66c   : > { %5649 = vmatpush.bf16.msrb.mxu3 %v7976_v52  ;;  %v7331_v52 = vld [vmem:[%s10116_s15 + $0x58] sm:$0xf]  ;;  %v9039_v56 = vpop.eup %9038  ;;  %5796 = vst [vmem:[%s10130_s18] sm:$0xff] %v9037_v48  ;;  %v4009_v48 = vperm.slane %v10853_v55, 5  ;;  %v7852_v51 = vor.u32 %v8703_v37, %v7851_v36  ;;  %v7467_v22 = vld [vmem:[%s10116_s15 + $0x160] sm:$0xf] }
 0x66d   : > { %5797 = vst [vmem:[%s10130_s18 + $0x8] sm:$0xff] %v9039_v56  ;;  %v7332_v4 = vor.u32 %v8574_v53, %v7331_v52  ;;  %v7723_v52 = vld [vmem:[%s10116_s15 + $0x360] sm:$0xf]  ;;  %v7860_v56 = vor.u32 %v8704_v47, %v7859_v46  ;;  %v8608_v33 = vld [vmem:[%s10116_s15 + $0x1e4] sm:$0xf0] }
 0x66e   : > { %5611 = vmatpush.bf16.msrb.mxu0 %v7836_v58  ;;  %5624 = vmatpush.bf16.msrb.mxu1 %v7840_v61  ;;  %v8558_v58 = vld [vmem:[%s10116_s15 + $0x5c] sm:$0xf]  ;;  %v8799_v61 = vld [vmem:[%s10116_s15 + $0x7dc] sm:$0xf0]  ;;  %v8592_v34 = vld [vmem:[%s10116_s15 + $0x16c] sm:$0xf] }
 0x66f   : > { %5637 = vmatpush.bf16.msrb.mxu2 %v7844_v62  ;;  %v8783_v62 = vld [vmem:[%s10116_s15 + $0x764] sm:$0xf]  ;;  %v5385_v7 = vpop.f32.mrf.mxu2  ;;  %v7336_v9 = vor.u32 %v8558_v58, %v7333_v59  ;;  %v8236_v10 = vor.u32 %v8799_v61, %v8235_v60  ;;  %v8607_v40 = vld [vmem:[%s10116_s15 + $0x1dc] sm:$0xf0]  ;;  %v8576_v46 = vld [vmem:[%s10116_s15 + $0xe4] sm:$0xf0] }
 0x670   : > { %5650 = vmatpush.bf16.msrb.mxu3 %v7848_v2  ;;  %v8800_v2 = vld [vmem:[%s10116_s15 + $0x7e4] sm:$0xf0]  ;;  %v5398_v13 = vpop.f32.mrf.mxu3  ;;  %v8240_v15 = vor.u32 %v8783_v62, %v8237_v0  ;;  %v8655_v58 = vld [vmem:[%s10116_s15 + $0x364] sm:$0xf]  ;;  %v7339_v36 = vld [vmem:[%s10116_s15 + $0x60] sm:$0xf]  ;;  %v7468_v37 = vor.u32 %v8607_v40, %v7467_v22 }
 0x671   : > { %v8244_v16 = vor.u32 %v8800_v2, %v8243_v1  ;;  %v7725_v59 = vld [vmem:[%s10116_s15 + $0x3e0] sm:$0xf0]  ;;  %v8672_v0 = vld [vmem:[%s10116_s15 + $0x3e4] sm:$0xf0]  ;;  %v4010_v2 = vperm.slane %v10853_v55, 6 }
 0x672   : > { %5612 = vmatpush.bf16.msrb.mxu0 %v7708_v8  ;;  %5625 = vmatpush.bf16.msrb.mxu1 %v7712_v11  ;;  %v9041_v8 = vpop.eup %9040  ;;  %v8107_v11 = vld [vmem:[%s10116_s15 + $0x660] sm:$0xf]  ;;  %v7728_v7 = vor.u32 %v8655_v58, %v7725_v59  ;;  %v7603_v55 = vld [vmem:[%s10116_s15 + $0x268] sm:$0xf]  ;;  %v8560_v47 = vld [vmem:[%s10116_s15 + $0x6c] sm:$0xf] }
 0x673   : > { %5638 = vmatpush.bf16.msrb.mxu2 %v7716_v12  ;;  %v8767_v12 = vld [vmem:[%s10116_s15 + $0x6dc] sm:$0xf0]  ;;  %v9043_v14 = vpop.eup %9042  ;;  %5798 = vst [vmem:[%s10130_s18 + $0x10] sm:$0xff] %v9041_v8  ;;  %v8253_v58 = vld [vmem:[%s10116_s15 + $0x7f0] sm:$0xf0] }
 0x674   : > { %5651 = vmatpush.bf16.msrb.mxu3 %v7720_v18  ;;  %v8109_v18 = vld [vmem:[%s10116_s15 + $0x6e0] sm:$0xf0]  ;;  %5799 = vst [vmem:[%s10130_s18 + $0x18] sm:$0xff] %v9043_v14  ;;  %v8108_v23 = vor.u32 %v8767_v12, %v8107_v11  ;;  %v8003_v22 = vld [vmem:[%s10116_s15 + $0x578] sm:$0xf] }
 0x675   : > { %v8112_v24 = vor.u32 %v8751_v17, %v8109_v18  ;;  %v8623_v11 = vld [vmem:[%s10116_s15 + $0x264] sm:$0xf]  ;;  %v8624_v18 = vld [vmem:[%s10116_s15 + $0x26c] sm:$0xf]  ;;  %v8738_v40 = vld [vmem:[%s10116_s15 + $0x5f4] sm:$0xf0] }
 0x676   : > { %5613 = vmatpush.bf16.msrb.mxu0 %v7580_v25  ;;  %5626 = vmatpush.bf16.msrb.mxu1 %v7584_v26  ;;  %v8116_v25 = vor.u32 %v8768_v21, %v8115_v20  ;;  %v7979_v26 = vld [vmem:[%s10116_s15 + $0x560] sm:$0xf]  ;;  %v7597_v14 = vld [vmem:[%s10116_s15 + $0x2e0] sm:$0xf0] }
 0x677   : > { %5639 = vmatpush.bf16.msrb.mxu2 %v7588_v27  ;;  %v8735_v27 = vld [vmem:[%s10116_s15 + $0x5dc] sm:$0xf0] }
 0x678   : > { %5652 = vmatpush.bf16.msrb.mxu3 %v7592_v32  ;;  %v8736_v32 = vld [vmem:[%s10116_s15 + $0x5e4] sm:$0xf0]  ;;  %v7980_v35 = vor.u32 %v8735_v27, %v7979_v26  ;;  %v8591_v27 = vld [vmem:[%s10116_s15 + $0x164] sm:$0xf] }
 0x679   : > { %v7988_v39 = vor.u32 %v8736_v32, %v7987_v31 }
 0x67a   : > { %5614 = vmatpush.bf16.msrb.mxu0 %v7452_v43  ;;  %5627 = vmatpush.bf16.msrb.mxu1 %v7456_v49  ;;  %v7853_v43 = vld [vmem:[%s10116_s15 + $0x4e0] sm:$0xf0]  ;;  %v8688_v49 = vld [vmem:[%s10116_s15 + $0x46c] sm:$0xf] }
 0x67b   : > { %5640 = vmatpush.bf16.msrb.mxu2 %v7460_v50  ;;  %v7861_v50 = vld [vmem:[%s10116_s15 + $0x4e8] sm:$0xf0]  ;;  %v7856_v54 = vor.u32 %v8687_v41, %v7853_v43  ;;  %v7341_v41 = vld [vmem:[%s10116_s15 + $0xe0] sm:$0xf0]  ;;  %v7472_v43 = vor.u32 %v8591_v27, %v7469_v28  ;;  %v7867_v27 = vld [vmem:[%s10116_s15 + $0x470] sm:$0xf] }
 0x67c   : > { %5653 = vmatpush.bf16.msrb.mxu3 %v7464_v57  ;;  %v8671_v57 = vld [vmem:[%s10116_s15 + $0x3dc] sm:$0xf0]  ;;  %v7864_v62 = vor.u32 %v8688_v49, %v7861_v50  ;;  %v8705_v28 = vld [vmem:[%s10116_s15 + $0x4ec] sm:$0xf0] }
 0x67d   : > { %v7724_v6 = vor.u32 %v8671_v57, %v7723_v52  ;;  %v8251_v52 = vld [vmem:[%s10116_s15 + $0x770] sm:$0xf]  ;;  %v8785_v57 = vld [vmem:[%s10116_s15 + $0x774] sm:$0xf] }
 0x67e   : > { %5615 = vmatpush.bf16.msrb.mxu0 %v7324_v63  ;;  %5628 = vmatpush.bf16.msrb.mxu1 %v7328_v3  ;;  %v5409_v53 = vpop.f32.mrf.mxu0  ;;  %v5422_v61 = vpop.f32.mrf.mxu1  ;;  %v7731_v63 = vld [vmem:[%s10116_s15 + $0x368] sm:$0xf]  ;;  %v8656_v3 = vld [vmem:[%s10116_s15 + $0x36c] sm:$0xf] }
 0x67f   : > { %5641 = vmatpush.bf16.msrb.mxu2 %v7332_v4  ;;  %v5410_v60 = vadd.f32 %v5409_v53, %v4008_v44  ;;  %v5423_v1 = vadd.f32 %v5422_v61, %v4009_v48  ;;  %v7733_v4 = vld [vmem:[%s10116_s15 + $0x3e8] sm:$0xf0]  ;;  %v7732_v8 = vor.u32 %v8672_v0, %v7731_v63  ;;  %v8801_v53 = vld [vmem:[%s10116_s15 + $0x7ec] sm:$0xf0]  ;;  %v8802_v61 = vld [vmem:[%s10116_s15 + $0x7f4] sm:$0xf0] }
 0x680   : > { %5654 = vmatpush.bf16.msrb.mxu3 %v7336_v9  ;;  %v7595_v9 = vld [vmem:[%s10116_s15 + $0x260] sm:$0xf]  ;;  %v7736_v13 = vor.u32 %v8656_v3, %v7733_v4  ;;  %v8786_v0 = vld [vmem:[%s10116_s15 + $0x77c] sm:$0xf]  ;;  %v8252_v3 = vor.u32 %v8801_v53, %v8251_v52  ;;  %v8256_v4 = vor.u32 %v8785_v57, %v8253_v58  ;;  %v7747_v53 = vld [vmem:[%s10116_s15 + $0x378] sm:$0xf] }
 0x681   : > { %5616 = vmatmul.bf16.vlgmr.msrb.gmra.mxu0 %v10838_v42  ;;  %5629 = vmatmul.bf16.vlgmr.msrb.gmra.mxu1 %v10838_v42  ;;  %9044 = vtanh.f32 %v5410_v60  ;;  %v8259_v60 = vld [vmem:[%s10116_s15 + $0x778] sm:$0xf]  ;;  %v8658_v58 = vld [vmem:[%s10116_s15 + $0x37c] sm:$0xf] }
 0x682   : > { %5660 = vmatpush.bf16.msra.mxu0 %v8236_v10  ;;  %5673 = vmatpush.bf16.msra.mxu1 %v8240_v15  ;;  %9046 = vtanh.f32 %v5423_v1  ;;  %v8639_v10 = vld [vmem:[%s10116_s15 + $0x2dc] sm:$0xf0]  ;;  %v8640_v15 = vld [vmem:[%s10116_s15 + $0x2e4] sm:$0xf0]  ;;  %v8261_v1 = vld [vmem:[%s10116_s15 + $0x7f8] sm:$0xf0] }
 0x683   : > { %5686 = vmatpush.bf16.msra.mxu2 %v8244_v16  ;;  %5655 = vmatmul.bf16.vlgmr.msrb.gmra.mxu3 %v10838_v42  ;;  %v7596_v21 = vor.u32 %v8639_v10, %v7595_v9  ;;  %v7604_v26 = vor.u32 %v8640_v15, %v7603_v55  ;;  %v8264_v9 = vor.u32 %v8786_v0, %v8261_v1  ;;  %v8125_v10 = vld [vmem:[%s10116_s15 + $0x6f0] sm:$0xf0]  ;;  %v7995_v15 = vld [vmem:[%s10116_s15 + $0x570] sm:$0xf] }
 0x684   : > { %5699 = vmatpush.bf16.msra.mxu3 %v8248_v19  ;;  %5642 = vmatmul.bf16.vlgmr.msrb.gmra.mxu2 %v10838_v42  ;;  %v7605_v19 = vld [vmem:[%s10116_s15 + $0x2e8] sm:$0xf0]  ;;  %v7611_v0 = vld [vmem:[%s10116_s15 + $0x270] sm:$0xf] }
 0x685   : > { %v7608_v32 = vor.u32 %v8624_v18, %v7605_v19  ;;  %v8737_v18 = vld [vmem:[%s10116_s15 + $0x5ec] sm:$0xf0]  ;;  %v8721_v19 = vld [vmem:[%s10116_s15 + $0x574] sm:$0xf] }
 0x686   : > { %5661 = vmatpush.bf16.msra.mxu0 %v8108_v23  ;;  %5674 = vmatpush.bf16.msra.mxu1 %v8112_v24  ;;  %v5448_v17 = vpop.f32.mrf.mxu3  ;;  %v5411_v23 = vpop.f32.mrf.mxu0  ;;  %v8641_v1 = vld [vmem:[%s10116_s15 + $0x2ec] sm:$0xf0] }
 0x687   : > { %5687 = vmatpush.bf16.msra.mxu2 %v8116_v25  ;;  %v5435_v12 = vpop.f32.mrf.mxu2  ;;  %v5449_v20 = vadd.f32 %v5448_v17, %v4011_v5  ;;  %v9045_v24 = vpop.eup %9044  ;;  %v7600_v25 = vor.u32 %v8623_v11, %v7597_v14  ;;  %v8260_v5 = vor.u32 %v8802_v61, %v8259_v60  ;;  %v8131_v11 = vld [vmem:[%s10116_s15 + $0x678] sm:$0xf]  ;;  %v8133_v14 = vld [vmem:[%s10116_s15 + $0x6f8] sm:$0xf0]  ;;  %v10997_v23 = vld [vmem:[%s10123_s30 + $0x8] sm:$0xff] }
 0x688   : > { %5700 = vmatpush.bf16.msra.mxu3 %v8120_v29  ;;  %v5436_v16 = vadd.f32 %v5435_v12, %v4010_v2  ;;  %v7475_v29 = vld [vmem:[%s10116_s15 + $0x168] sm:$0xf]  ;;  %v5424_v30 = vpop.f32.mrf.mxu1  ;;  %v9047_v31 = vpop.eup %9046  ;;  %5800 = vst [vmem:[%s10130_s18 + $0x20] sm:$0xff] %v9045_v24  ;;  %v8770_v12 = vld [vmem:[%s10116_s15 + $0x6f4] sm:$0xf0]  ;;  %v4014_v57 = vperm.slane %v10997_v23, 2 }
 0x689   : > { %5801 = vst [vmem:[%s10130_s18 + $0x28] sm:$0xff] %v9047_v31  ;;  %v7476_v44 = vor.u32 %v8608_v33, %v7475_v29  ;;  %v8132_v17 = vor.u32 %v8770_v12, %v8131_v11  ;;  %v8722_v24 = vld [vmem:[%s10116_s15 + $0x57c] sm:$0xf]  ;;  %v8004_v30 = vor.u32 %v8738_v40, %v8003_v22  ;;  %v8689_v31 = vld [vmem:[%s10116_s15 + $0x474] sm:$0xf]  ;;  %v4012_v33 = vperm.slane %v10997_v23, 0 }
 0x68a   : > { %5662 = vmatpush.bf16.msra.mxu0 %v7980_v35  ;;  %5675 = vmatpush.bf16.msra.mxu1 %v7984_v38  ;;  %9048 = vtanh.f32 %v5436_v16  ;;  %v7477_v35 = vld [vmem:[%s10116_s15 + $0x1e8] sm:$0xf0]  ;;  %v8575_v38 = vld [vmem:[%s10116_s15 + $0xdc] sm:$0xf0]  ;;  %v4015_v60 = vperm.slane %v10997_v23, 3 }
 0x68b   : > { %5688 = vmatpush.bf16.msra.mxu2 %v7988_v39  ;;  %9050 = vtanh.f32 %v5449_v20  ;;  %v8559_v39 = vld [vmem:[%s10116_s15 + $0x64] sm:$0xf]  ;;  %v7480_v50 = vor.u32 %v8592_v34, %v7477_v35  ;;  %v7340_v59 = vor.u32 %v8575_v38, %v7339_v36  ;;  %v7997_v20 = vld [vmem:[%s10116_s15 + $0x5f0] sm:$0xf0]  ;;  %v7875_v35 = vld [vmem:[%s10116_s15 + $0x478] sm:$0xf] }
 0x68c   : > { %5701 = vmatpush.bf16.msra.mxu3 %v7992_v45  ;;  %v7347_v45 = vld [vmem:[%s10116_s15 + $0x68] sm:$0xf]  ;;  %v8000_v29 = vor.u32 %v8721_v19, %v7997_v20  ;;  %v8706_v36 = vld [vmem:[%s10116_s15 + $0x4f4] sm:$0xf0]  ;;  %v8690_v38 = vld [vmem:[%s10116_s15 + $0x47c] sm:$0xf] }
 0x68d   : > { %v7348_v63 = vor.u32 %v8576_v46, %v7347_v45  ;;  %v7876_v46 = vor.u32 %v8706_v36, %v7875_v35  ;;  %v7621_v11 = vld [vmem:[%s10116_s15 + $0x2f8] sm:$0xf0]  ;;  %v8593_v19 = vld [vmem:[%s10116_s15 + $0x174] sm:$0xf] }
 0x68e   : > { %5663 = vmatpush.bf16.msra.mxu0 %v7852_v51  ;;  %5676 = vmatpush.bf16.msra.mxu1 %v7856_v54  ;;  %v7349_v51 = vld [vmem:[%s10116_s15 + $0xe8] sm:$0xf0]  ;;  %v5450_v54 = vpop.f32.mrf.mxu3  ;;  %v7485_v20 = vld [vmem:[%s10116_s15 + $0x1f0] sm:$0xf0] }
 0x68f   : > { %5689 = vmatpush.bf16.msra.mxu2 %v7860_v56  ;;  %v5437_v48 = vpop.f32.mrf.mxu2  ;;  %v7352_v2 = vor.u32 %v8560_v47, %v7349_v51  ;;  %v8673_v47 = vld [vmem:[%s10116_s15 + $0x3ec] sm:$0xf0]  ;;  %v8674_v54 = vld [vmem:[%s10116_s15 + $0x3f4] sm:$0xf0] }
 0x690   : > { %5702 = vmatpush.bf16.msra.mxu3 %v7864_v62  ;;  %v9049_v49 = vpop.eup %9048  ;;  %v7344_v62 = vor.u32 %v8559_v39, %v7341_v41  ;;  %v7877_v39 = vld [vmem:[%s10116_s15 + $0x4f8] sm:$0xf0]  ;;  %v7868_v41 = vor.u32 %v8705_v28, %v7867_v27  ;;  %v8657_v48 = vld [vmem:[%s10116_s15 + $0x374] sm:$0xf] }
 0x691   : > { %v9051_v56 = vpop.eup %9050  ;;  %5802 = vst [vmem:[%s10130_s18 + $0x30] sm:$0xff] %v9049_v49  ;;  %v7741_v49 = vld [vmem:[%s10116_s15 + $0x3f0] sm:$0xf0]  ;;  %v7880_v52 = vor.u32 %v8690_v38, %v7877_v39  ;;  %v7493_v27 = vld [vmem:[%s10116_s15 + $0x1f8] sm:$0xf0] }
 0x692   : > { %5664 = vmatpush.bf16.msra.mxu0 %v7724_v6  ;;  %5677 = vmatpush.bf16.msra.mxu1 %v7728_v7  ;;  %5803 = vst [vmem:[%s10130_s18 + $0x38] sm:$0xff] %v9051_v56  ;;  %v8123_v6 = vld [vmem:[%s10116_s15 + $0x670] sm:$0xf]  ;;  %v7363_v38 = vld [vmem:[%s10116_s15 + $0x78] sm:$0xf] }
 0x693   : > { %5690 = vmatpush.bf16.msra.mxu2 %v7732_v8  ;;  %v8769_v7 = vld [vmem:[%s10116_s15 + $0x6ec] sm:$0xf0]  ;;  %v8753_v8 = vld [vmem:[%s10116_s15 + $0x674] sm:$0xf]  ;;  %v8578_v39 = vld [vmem:[%s10116_s15 + $0xf4] sm:$0xf0] }
 0x694   : > { %5703 = vmatpush.bf16.msra.mxu3 %v7736_v13  ;;  %v8754_v13 = vld [vmem:[%s10116_s15 + $0x67c] sm:$0xf]  ;;  %v8124_v55 = vor.u32 %v8769_v7, %v8123_v6  ;;  %v8128_v16 = vor.u32 %v8753_v8, %v8125_v10  ;;  %v7619_v6 = vld [vmem:[%s10116_s15 + $0x278] sm:$0xf] }
 0x695   : > { %v8642_v7 = vld [vmem:[%s10116_s15 + $0x2f4] sm:$0xf0]  ;;  %v8626_v10 = vld [vmem:[%s10116_s15 + $0x27c] sm:$0xf] }
 0x696   : > { %5665 = vmatpush.bf16.msra.mxu0 %v7596_v21  ;;  %5678 = vmatpush.bf16.msra.mxu1 %v7600_v25  ;;  %v8136_v21 = vor.u32 %v8754_v13, %v8133_v14  ;;  %v8005_v25 = vld [vmem:[%s10116_s15 + $0x5f8] sm:$0xf0]  ;;  %v7612_v13 = vor.u32 %v8641_v1, %v7611_v0  ;;  %v7483_v14 = vld [vmem:[%s10116_s15 + $0x170] sm:$0xf]  ;;  %v7624_v40 = vor.u32 %v8626_v10, %v7621_v11 }
 0x697   : > { %5691 = vmatpush.bf16.msra.mxu2 %v7604_v26  ;;  %v7996_v26 = vor.u32 %v8737_v18, %v7995_v15  ;;  %v8008_v34 = vor.u32 %v8722_v24, %v8005_v25  ;;  %v8609_v18 = vld [vmem:[%s10116_s15 + $0x1ec] sm:$0xf0]  ;;  %v7491_v24 = vld [vmem:[%s10116_s15 + $0x178] sm:$0xf] }
 0x698   : > { %5704 = vmatpush.bf16.msra.mxu3 %v7608_v32  ;;  %v7869_v32 = vld [vmem:[%s10116_s15 + $0x4f0] sm:$0xf0]  ;;  %v8610_v25 = vld [vmem:[%s10116_s15 + $0x1f4] sm:$0xf0]  ;;  %v7484_v28 = vor.u32 %v8609_v18, %v7483_v14 }
 0x699   : > { %v7872_v45 = vor.u32 %v8689_v31, %v7869_v32  ;;  %v7355_v31 = vld [vmem:[%s10116_s15 + $0x70] sm:$0xf] }
 0x69a   : > { %5666 = vmatpush.bf16.msra.mxu0 %v7468_v37  ;;  %5679 = vmatpush.bf16.msra.mxu1 %v7472_v43  ;;  %v4013_v37 = vperm.slane %v10997_v23, 1  ;;  %v7739_v43 = vld [vmem:[%s10116_s15 + $0x370] sm:$0xf] }
 0x69b   : > { %5692 = vmatpush.bf16.msra.mxu2 %v7476_v44  ;;  %v7740_v61 = vor.u32 %v8673_v47, %v7739_v43  ;;  %v8577_v32 = vld [vmem:[%s10116_s15 + $0xec] sm:$0xf0] }
 0x69c   : > { %5705 = vmatpush.bf16.msra.mxu3 %v7480_v50 }
 0x69e   : > { %5667 = vmatpush.bf16.msra.mxu0 %v7340_v59  ;;  %5680 = vmatpush.bf16.msra.mxu1 %v7344_v62  ;;  %v5461_v44 = vpop.f32.mrf.mxu0  ;;  %v5474_v51 = vpop.f32.mrf.mxu1  ;;  %v7749_v59 = vld [vmem:[%s10116_s15 + $0x3f8] sm:$0xf0]  ;;  %v7744_v62 = vor.u32 %v8657_v48, %v7741_v49  ;;  %v7364_v48 = vor.u32 %v8578_v39, %v7363_v38 }
 0x69f   : > { %5693 = vmatpush.bf16.msra.mxu2 %v7348_v63  ;;  %v5462_v50 = vadd.f32 %v5461_v44, %v4012_v33  ;;  %v5475_v56 = vadd.f32 %v5474_v51, %v4013_v37  ;;  %v7748_v63 = vor.u32 %v8674_v54, %v7747_v53  ;;  %v8561_v33 = vld [vmem:[%s10116_s15 + $0x74] sm:$0xf]  ;;  %v8562_v44 = vld [vmem:[%s10116_s15 + $0x7c] sm:$0xf]  ;;  %v4017_v51 = vperm.slane %v10997_v23, 5 }
 0x6a0   : > { %5706 = vmatpush.bf16.msra.mxu3 %v7352_v2  ;;  %v8625_v2 = vld [vmem:[%s10116_s15 + $0x274] sm:$0xf] }
 0x6a1   : > { %5668 = vmatmul.bf16.vlgmr.msra.gmra.mxu0 %v10838_v42  ;;  %5681 = vmatmul.bf16.vlgmr.msra.gmra.mxu1 %v10838_v42  ;;  %9052 = vtanh.f32 %v5462_v50  ;;  %v7357_v37 = vld [vmem:[%s10116_s15 + $0xf0] sm:$0xf0]  ;;  %v4016_v50 = vperm.slane %v10997_v23, 4 }
 0x6a2   : > { %5712 = vmatpush.bf16.msrb.mxu0 %v8252_v3  ;;  %5725 = vmatpush.bf16.msrb.mxu1 %v8256_v4  ;;  %9054 = vtanh.f32 %v5475_v56  ;;  %v7752_v4 = vor.u32 %v8658_v58, %v7749_v59  ;;  %v7360_v47 = vor.u32 %v8561_v33, %v7357_v37  ;;  %v4019_v58 = vperm.slane %v10997_v23, 7 }
 0x6a3   : > { %5738 = vmatpush.bf16.msrb.mxu2 %v8260_v5  ;;  %5707 = vmatmul.bf16.vlgmr.msra.gmra.mxu3 %v10838_v42  ;;  %v7613_v5 = vld [vmem:[%s10116_s15 + $0x2f0] sm:$0xf0] }
 0x6a4   : > { %5751 = vmatpush.bf16.msrb.mxu3 %v8264_v9  ;;  %5694 = vmatmul.bf16.vlgmr.msra.gmra.mxu2 %v10838_v42 }
 0x6a6   : > { %5713 = vmatpush.bf16.msrb.mxu0 %v8124_v55  ;;  %5726 = vmatpush.bf16.msrb.mxu1 %v8128_v16  ;;  %v5500_v9 = vpop.f32.mrf.mxu3  ;;  %v5463_v55 = vpop.f32.mrf.mxu0  ;;  %v7616_v16 = vor.u32 %v8625_v2, %v7613_v5  ;;  %v3998_v5 = vld [vmem:[%s10123_s30 + $0x10] sm:$0xff] }
 0x6a7   : > { %5739 = vmatpush.bf16.msrb.mxu2 %v8132_v17  ;;  %v5487_v3 = vpop.f32.mrf.mxu2  ;;  %v5501_v12 = vadd.f32 %v5500_v9, %v4015_v60  ;;  %v9053_v15 = vpop.eup %9052  ;;  %v7620_v17 = vor.u32 %v8642_v7, %v7619_v6  ;;  %v4020_v6 = vperm.slane %v3998_v5, 0  ;;  %v4021_v7 = vperm.slane %v3998_v5, 1 }
 0x6a8   : > { %5752 = vmatpush.bf16.msrb.mxu3 %v8136_v21  ;;  %v5488_v8 = vadd.f32 %v5487_v3, %v4014_v57  ;;  %v5476_v21 = vpop.f32.mrf.mxu1  ;;  %v9055_v22 = vpop.eup %9054  ;;  %5804 = vst [vmem:[%s10130_s18 + $0x40] sm:$0xff] %v9053_v15  ;;  %v4018_v57 = vperm.slane %v10997_v23, 6 }
 0x6a9   : > { %5805 = vst [vmem:[%s10130_s18 + $0x48] sm:$0xff] %v9055_v22 }
 0x6aa   : > { %5714 = vmatpush.bf16.msrb.mxu0 %v7996_v26  ;;  %5727 = vmatpush.bf16.msrb.mxu1 %v8000_v29  ;;  %9056 = vtanh.f32 %v5488_v8  ;;  %v8594_v26 = vld [vmem:[%s10116_s15 + $0x17c] sm:$0xf]  ;;  %v7488_v29 = vor.u32 %v8593_v19, %v7485_v20 }
 0x6ab   : > { %5740 = vmatpush.bf16.msrb.mxu2 %v8004_v30  ;;  %9058 = vtanh.f32 %v5501_v12  ;;  %v7492_v30 = vor.u32 %v8610_v25, %v7491_v24  ;;  %v7496_v36 = vor.u32 %v8594_v26, %v7493_v27  ;;  %v4022_v12 = vperm.slane %v3998_v5, 2 }
 0x6ac   : > { %5753 = vmatpush.bf16.msrb.mxu3 %v8008_v34  ;;  %v4024_v25 = vperm.slane %v3998_v5, 4  ;;  %v4025_v26 = vperm.slane %v3998_v5, 5 }
 0x6ae   : > { %5715 = vmatpush.bf16.msrb.mxu0 %v7868_v41  ;;  %5728 = vmatpush.bf16.msrb.mxu1 %v7872_v45  ;;  %v5502_v41 = vpop.f32.mrf.mxu3  ;;  %v7365_v45 = vld [vmem:[%s10116_s15 + $0xf8] sm:$0xf0] }
 0x6af   : > { %5741 = vmatpush.bf16.msrb.mxu2 %v7876_v46  ;;  %v5489_v34 = vpop.f32.mrf.mxu2  ;;  %v7356_v46 = vor.u32 %v8577_v32, %v7355_v31  ;;  %v7368_v49 = vor.u32 %v8562_v44, %v7365_v45  ;;  %v4026_v31 = vperm.slane %v3998_v5, 6  ;;  %v4027_v32 = vperm.slane %v3998_v5, 7 }
 0x6b0   : > { %5754 = vmatpush.bf16.msrb.mxu3 %v7880_v52  ;;  %v9057_v35 = vpop.eup %9056 }
 0x6b1   : > { %v9059_v43 = vpop.eup %9058  ;;  %5806 = vst [vmem:[%s10130_s18 + $0x50] sm:$0xff] %v9057_v35 }
 0x6b2   : > { %5716 = vmatpush.bf16.msrb.mxu0 %v7740_v61  ;;  %5729 = vmatpush.bf16.msrb.mxu1 %v7744_v62  ;;  %5807 = vst [vmem:[%s10130_s18 + $0x58] sm:$0xff] %v9059_v43 }
 0x6b3   : > { %5742 = vmatpush.bf16.msrb.mxu2 %v7748_v63 }
 0x6b4   : > { %5755 = vmatpush.bf16.msrb.mxu3 %v7752_v4 }
 0x6b6   : > { %5717 = vmatpush.bf16.msrb.mxu0 %v7612_v13  ;;  %5730 = vmatpush.bf16.msrb.mxu1 %v7616_v16  ;;  %v4023_v13 = vperm.slane %v3998_v5, 3 }
 0x6b7   : > { %5743 = vmatpush.bf16.msrb.mxu2 %v7620_v17 }
 0x6b8   : > { %5756 = vmatpush.bf16.msrb.mxu3 %v7624_v40 }
 0x6ba   : > { %5718 = vmatpush.bf16.msrb.mxu0 %v7484_v28  ;;  %5731 = vmatpush.bf16.msrb.mxu1 %v7488_v29 }
 0x6bb   : > { %5744 = vmatpush.bf16.msrb.mxu2 %v7492_v30 }
 0x6bc   : > { %5757 = vmatpush.bf16.msrb.mxu3 %v7496_v36 }
 0x6be   : > { %5719 = vmatpush.bf16.msrb.mxu0 %v7356_v46  ;;  %5732 = vmatpush.bf16.msrb.mxu1 %v7360_v47  ;;  %v5513_v52 = vpop.f32.mrf.mxu0  ;;  %v5526_v54 = vpop.f32.mrf.mxu1  ;;  %v3999_v47 = vld [vmem:[%s10123_s30 + $0x18] sm:$0xff] }
 0x6bf   : > { %5745 = vmatpush.bf16.msrb.mxu2 %v7364_v48  ;;  %v5514_v53 = vadd.f32 %v5513_v52, %v4016_v50  ;;  %v5527_v56 = vadd.f32 %v5526_v54, %v4017_v51  ;;  %v4028_v48 = vperm.slane %v3999_v47, 0  ;;  %v4030_v54 = vperm.slane %v3999_v47, 2 }
 0x6c0   : > { %5758 = vmatpush.bf16.msrb.mxu3 %v7368_v49  ;;  %v4029_v49 = vperm.slane %v3999_v47, 1 }
 0x6c1   : > { %5720 = vmatmul.bf16.vlgmr.msrb.gmra.mxu0 %v10838_v42  ;;  %5733 = vmatmul.bf16.vlgmr.msrb.gmra.mxu1 %v10838_v42  ;;  %9060 = vtanh.f32 %v5514_v53 }
 0x6c2   : > { %5746 = vmatmul.bf16.vlgmr.msrb.gmra.mxu2 %v10838_v42  ;;  %9062 = vtanh.f32 %v5527_v56  ;;  %v4031_v56 = vperm.slane %v3999_v47, 3 }
 0x6c3   : > { %5759 = vmatmul.bf16.vlgmr.msrb.gmra.mxu3 %v10838_v42 }
 0x6c6   : > { %v5552_v42 = vpop.f32.mrf.mxu3  ;;  %v5515_v62 = vpop.f32.mrf.mxu0 }
 0x6c7   : > { %v5539_v59 = vpop.f32.mrf.mxu2  ;;  %v5553_v61 = vadd.f32 %v5552_v42, %v4019_v58  ;;  %v9061_v63 = vpop.eup %9060 }
 0x6c8   : > { %v5540_v60 = vadd.f32 %v5539_v59, %v4018_v57  ;;  %v5528_v0 = vpop.f32.mrf.mxu1  ;;  %v9063_v1 = vpop.eup %9062  ;;  %5808 = vst [vmem:[%s10130_s18 + $0x60] sm:$0xff] %v9061_v63 }
 0x6c9   : > { %5809 = vst [vmem:[%s10130_s18 + $0x68] sm:$0xff] %v9063_v1 }
 0x6ca   : > { %9064 = vtanh.f32 %v5540_v60 }
 0x6cb   : > { %9066 = vtanh.f32 %v5553_v61 }
 0x6ce   : > { %v5554_v4 = vpop.f32.mrf.mxu3 }
 0x6cf   : > { %v5541_v2 = vpop.f32.mrf.mxu2  ;;  %v4032_v4 = vperm.slane %v3999_v47, 4 }
 0x6d0   : > { %v9065_v3 = vpop.eup %9064 }
 0x6d1   : > { %v9067_v23 = vpop.eup %9066  ;;  %5810 = vst [vmem:[%s10130_s18 + $0x70] sm:$0xff] %v9065_v3 }
 0x6d2   : > { %5811 = vst [vmem:[%s10130_s18 + $0x78] sm:$0xff] %v9067_v23  ;;  %v4033_v23 = vperm.slane %v3999_v47, 5 }
 0x6de   : > { %v5565_v8 = vpop.f32.mrf.mxu0  ;;  %v5578_v10 = vpop.f32.mrf.mxu1 }
 0x6df   : > { %v5566_v9 = vadd.f32 %v5565_v8, %v4020_v6  ;;  %v5579_v11 = vadd.f32 %v5578_v10, %v4021_v7  ;;  %v4035_v10 = vperm.slane %v3999_v47, 7 }
 0x6e1   : > { %9068 = vtanh.f32 %v5566_v9  ;;  %v4034_v9 = vperm.slane %v3999_v47, 6 }
 0x6e2   : > { %9070 = vtanh.f32 %v5579_v11 }
 0x6e6   : > { %v5604_v15 = vpop.f32.mrf.mxu3  ;;  %v5567_v17 = vpop.f32.mrf.mxu0 }
 0x6e7   : > { %v5591_v14 = vpop.f32.mrf.mxu2  ;;  %v5605_v16 = vadd.f32 %v5604_v15, %v4023_v13  ;;  %v9069_v18 = vpop.eup %9068 }
 0x6e8   : > { %v5592_v55 = vadd.f32 %v5591_v14, %v4022_v12  ;;  %v5580_v19 = vpop.f32.mrf.mxu1  ;;  %v9071_v20 = vpop.eup %9070  ;;  %5812 = vst [vmem:[%s10130_s18 + $0x80] sm:$0xff] %v9069_v18 }
 0x6e9   : > { %5813 = vst [vmem:[%s10130_s18 + $0x88] sm:$0xff] %v9071_v20 }
 0x6ea   : > { %9072 = vtanh.f32 %v5592_v55 }
 0x6eb   : > { %9074 = vtanh.f32 %v5605_v16 }
 0x6ee   : > { %v5606_v40 = vpop.f32.mrf.mxu3 }
 0x6ef   : > { %v5593_v21 = vpop.f32.mrf.mxu2 }
 0x6f0   : > { %v9073_v22 = vpop.eup %9072 }
 0x6f1   : > { %v9075_v24 = vpop.eup %9074  ;;  %5814 = vst [vmem:[%s10130_s18 + $0x90] sm:$0xff] %v9073_v22 }
 0x6f2   : > { %5815 = vst [vmem:[%s10130_s18 + $0x98] sm:$0xff] %v9075_v24 }
 0x6fe   : > { %v5617_v27 = vpop.f32.mrf.mxu0  ;;  %v5630_v29 = vpop.f32.mrf.mxu1 }
 0x6ff   : > { %v5618_v28 = vadd.f32 %v5617_v27, %v4024_v25  ;;  %v5631_v30 = vadd.f32 %v5630_v29, %v4025_v26 }
 0x701   : > { %9076 = vtanh.f32 %v5618_v28 }
 0x702   : > { %9078 = vtanh.f32 %v5631_v30 }
 0x706   : > { %v5656_v35 = vpop.f32.mrf.mxu3  ;;  %v5619_v37 = vpop.f32.mrf.mxu0 }
 0x707   : > { %v5643_v33 = vpop.f32.mrf.mxu2  ;;  %v5657_v36 = vadd.f32 %v5656_v35, %v4027_v32  ;;  %v9077_v38 = vpop.eup %9076 }
 0x708   : > { %v5644_v34 = vadd.f32 %v5643_v33, %v4026_v31  ;;  %v5632_v39 = vpop.f32.mrf.mxu1  ;;  %v9079_v41 = vpop.eup %9078  ;;  %5816 = vst [vmem:[%s10130_s18 + $0xa0] sm:$0xff] %v9077_v38 }
 0x709   : > { %5817 = vst [vmem:[%s10130_s18 + $0xa8] sm:$0xff] %v9079_v41 }
 0x70a   : > { %9080 = vtanh.f32 %v5644_v34 }
 0x70b   : > { %9082 = vtanh.f32 %v5657_v36 }
 0x70e   : > { %v5658_v45 = vpop.f32.mrf.mxu3 }
 0x70f   : > { %v5645_v43 = vpop.f32.mrf.mxu2 }
 0x710   : > { %v9081_v44 = vpop.eup %9080 }
 0x711   : > { %v9083_v46 = vpop.eup %9082  ;;  %5818 = vst [vmem:[%s10130_s18 + $0xb0] sm:$0xff] %v9081_v44 }
 0x712   : > { %5819 = vst [vmem:[%s10130_s18 + $0xb8] sm:$0xff] %v9083_v46 }
 0x71e   : > { %v5669_v50 = vpop.f32.mrf.mxu0  ;;  %v5682_v52 = vpop.f32.mrf.mxu1 }
 0x71f   : > { %v5670_v51 = vadd.f32 %v5669_v50, %v4028_v48  ;;  %v5683_v53 = vadd.f32 %v5682_v52, %v4029_v49 }
 0x721   : > { %9084 = vtanh.f32 %v5670_v51 }
 0x722   : > { %9086 = vtanh.f32 %v5683_v53 }
 0x726   : > { %v5708_v59 = vpop.f32.mrf.mxu3  ;;  %v5671_v42 = vpop.f32.mrf.mxu0 }
 0x727   : > { %v5695_v57 = vpop.f32.mrf.mxu2  ;;  %v5709_v60 = vadd.f32 %v5708_v59, %v4031_v56  ;;  %v9085_v61 = vpop.eup %9084 }
 0x728   : > { %v5696_v58 = vadd.f32 %v5695_v57, %v4030_v54  ;;  %v5684_v62 = vpop.f32.mrf.mxu1  ;;  %v9087_v63 = vpop.eup %9086  ;;  %5820 = vst [vmem:[%s10130_s18 + $0xc0] sm:$0xff] %v9085_v61 }
 0x729   : > { %5821 = vst [vmem:[%s10130_s18 + $0xc8] sm:$0xff] %v9087_v63 }
 0x72a   : > { %9088 = vtanh.f32 %v5696_v58 }
 0x72b   : > { %9090 = vtanh.f32 %v5709_v60 }
 0x72e   : > { %v5710_v2 = vpop.f32.mrf.mxu3 }
 0x72f   : > { %v5697_v0 = vpop.f32.mrf.mxu2 }
 0x730   : > { %v9089_v1 = vpop.eup %9088 }
 0x731   : > { %v9091_v3 = vpop.eup %9090  ;;  %5822 = vst [vmem:[%s10130_s18 + $0xd0] sm:$0xff] %v9089_v1 }
 0x732   : > { %5823 = vst [vmem:[%s10130_s18 + $0xd8] sm:$0xff] %v9091_v3 }
 0x73e   : > { %v5721_v5 = vpop.f32.mrf.mxu0  ;;  %v5734_v7 = vpop.f32.mrf.mxu1 }
 0x73f   : > { %v5722_v6 = vadd.f32 %v5721_v5, %v4032_v4  ;;  %v5735_v8 = vadd.f32 %v5734_v7, %v4033_v23 }
 0x741   : > { %9092 = vtanh.f32 %v5722_v6 }
 0x742   : > { %9094 = vtanh.f32 %v5735_v8 }
 0x745   : > { %v5747_v11 = vpop.f32.mrf.mxu2 }
 0x746   : > { %v5748_v12 = vadd.f32 %v5747_v11, %v4034_v9  ;;  %v5760_v13 = vpop.f32.mrf.mxu3  ;;  %v5723_v14 = vpop.f32.mrf.mxu0 }
 0x747   : > { %v9093_v55 = vpop.eup %9092  ;;  %v5761_v15 = vadd.f32 %v5760_v13, %v4035_v10  ;;  %v5736_v16 = vpop.f32.mrf.mxu1 }
 0x748   : > { %v9095_v17 = vpop.eup %9094  ;;  %5824 = vst [vmem:[%s10130_s18 + $0xe0] sm:$0xff] %v9093_v55  ;;  %9096 = vtanh.f32 %v5748_v12 }
 0x749   : > { %5825 = vst [vmem:[%s10130_s18 + $0xe8] sm:$0xff] %v9095_v17  ;;  %9098 = vtanh.f32 %v5761_v15 }
 0x74d   : > { %v5749_v18 = vpop.f32.mrf.mxu2 }
 0x74e   : > { %v9097_v19 = vpop.eup %9096  ;;  %v5762_v20 = vpop.f32.mrf.mxu3 }
 0x74f   : > { %v9099_v21 = vpop.eup %9098  ;;  %5826 = vst [vmem:[%s10130_s18 + $0xf0] sm:$0xff] %v9097_v19 }
 0x750   : > { %5827 = vst [vmem:[%s10130_s18 + $0xf8] sm:$0xff] %v9099_v21 }
 0x751 PF: > { %s11255_s15 = sld [smem:[#allocation41_spill]]  ;;  %s5843_s7 = sshll.u32 %s10130_s18, 4  ;;  %s5844_s7 = int_to_ptr.vmem [resolvable:$true] %s5843_s7 }
 0x752   : > { %s11256_s30 = sld [smem:[#allocation40_spill]]  ;;  %s5829_s19 = scalar_lea.sflag [#allocation6], %s10113_s14 }
 0x753   : > { %s11258_s16 = sld [smem:[#allocation67_spill]] }
 0x758   : > { %s5836_s17 = smul.u32 %s11256_s30, %s11255_s15 }
 0x759   : > { %s9541_s18 = scalar_lea.hbm %s11258_s16, 768 }
 0x75a   : > { %s8803_s20 = sshll.u32 %s5836_s17, 8 }
 0x75b   : > { %s5841_s8 = scalar_lea.hbm %s11258_s16, %s8803_s20 }
 0x75c   : > { %s5845_s0 = sshll.u32 %s5841_s8, 4  ;;  %s5846_s0 = int_to_ptr.hbm [resolvable:$true] %s5845_s0 }
 0x75d   : > { %s9535_s27 = sshra.s32 %s5846_s0, 4  ;;  %s9536_s27 = int_to_ptr.hbm [resolvable:$true] %s9535_s27 }
 0x75e   : > { %s9537_s6 = scalar_lea.hbm %s9536_s27, 256  ;;  %p9542_p9 = scmp.lt.s32.totalorder %s9536_s27, %s11258_s16 }
 0x75f   : > { %p9538_p1 = scmp.ne.s32.totalorder %s9536_s27, %s9537_s6  ;;  %p9543_p0 = scmp.lt.s32.totalorder %s9541_s18, %s9537_s6 }
 0x761   : > { %p9539_p4 = pnand %p9538_p1, %p9961_p12  ;;  %p9544_p10 = por %p9543_p0, %p9542_p9 }
 0x763   : > { %p9540_p8 = pneg %p9539_p4 }
 0x765   : > { %p9545_p5 = pnand %p9544_p10, %p9540_p8 }
 0x767   : > { %9548 = shalt.err (!%p9545_p5)
}
 0x768   : > { %8852 = dma.vmem_to_hbm [thread:$0]  (%p9961_p12), %s5844_s7, 4096, %s5846_s0, %s5829_s19  }
 0x769 PF: > { %s11259_s14 = sld [smem:[#allocation38_spill]]  ;;  %p8923_p3 = scmp.ge.s32.totalorder %s9679_s1, 2 }
 0x76b   : > { %p8899_p13 = pnand %p8923_p3, %p9966_p2 }
 0x76d   : > { %p8900_p6 = pneg %p8899_p13 }
 0x76f   : > { %s5857_s12 = sand.u32 1, %s11259_s14  }
 0x770   : > { %s5858_s15 = scalar_lea.sflag [#allocation6], %s5857_s12 }
 0x771   : > { %9634 = dma.done.wait (%p8900_p6), %s5858_s15, 4096  }
 0x772   : > { %9636 = vsyncadd (%p8900_p6), %s5858_s15, 4294963200  ;;  %s41_s1 = sadd.s32 1, %s9679_s1   ;;  %s11261_s30 = sld [smem:[#allocation48_spill]] }
 0x773   : > { %p38_p7 = scmp.ge.s32.totalorder %s41_s1, 8   ;;  %s11262_s23 = sld [smem:[#allocation39_spill]] }
 0x774   : > { %s11263_s29 = sld [smem:[#allocation47_spill]]  ;;  %s11268_s24 = smov %s9643_s25 }
 0x775   : > { %s11264_s0 = sld [smem:[#allocation42_spill]]  ;;  %s11269_s25 = smov %s9647_s26 }
 0x776   : > { %s11265_s17 = sld [smem:[#allocation43_spill]]  ;;  %s11271_s27 = smov %s9655_s28 }
 0x777   : > { %s11266_s18 = sld [smem:[#allocation45_spill]] }
 0x778   : > { %s11267_s19 = sld [smem:[#allocation46_spill]]  ;;  %s11270_s26 = smov %s11261_s30 }
 0x779   : > { %s11272_s28 = smov %s11262_s23  ;;  %40 = sbr.rel (!%p38_p7) target bundleno = 33 (0x21), region = 224 }
 0x77c   : > { %s11273_s30 = smov %s11265_s17 }
 0x77e   :  { %5864 = vsyncpa [#allocation5], 1 }
 0x77f   :  { %5866 = vsyncpa [#allocation5 + $0x1], 1 }
 0x780   :  { %5867 = vsyncpa [#allocation8], 1 }
 0x781   :  { %5869 = vsyncpa [#allocation8 + $0x1], 1 }
 0x782   :  { %5870 = vsyncpa [#allocation11], 1 }
 0x783   :  { %5871 = vsyncpa [#allocation14], 1 }
 0x784   :  { %5872 = vsyncpa [#allocation17], 1 }
 0x785   :  { %5873 = vsyncpa [#allocation20], 1 }
 0x786   :  { %5874 = vsyncpa [#allocation23], 1 }
 0x787   :  { %5875 = vsyncpa [#allocation6], 1 }
 0x788   :  { %5877 = vsyncpa [#allocation6 + $0x1], 1 }

</bundles_post_ra>
